<compile_context>
chip_gen: v5e
topology: v5e:2x2
jax: 0.10.0
libtpu: 0.0.40
codegen_flags: <defaults>
</compile_context>

<pallas_src>
import numpy as np
import jax
import jax.numpy as jnp
from jax.experimental import pallas as pl
from jax.experimental.pallas import tpu as pltpu

LANE = 128
BF16_SUBLANE = 16          # bf16 packs 16 rows per vreg sublane group
GRID_THRESHOLD = 64        # batches <= this use the single-shot (no-grid) path
VMEM_LIMIT_BYTES = 16 * 1024 * 1024


def _round_up(x, m):
    return (x + m - 1) // m * m


def _default_tile_m():
    """Batch tile for the gridded path: 128 on v5e (4x128 MXU), 256 on v6e/v7x."""
    try:
        kind = jax.devices()[0].device_kind.lower()
    except Exception:
        kind = ""
    return 128 if "v5" in kind else 256


# --------------------------- Parameter construction ------------------------ #

def build_mlp_params(key, input_dim, mlp_depth=5, mlp_type="small",
                     target_features=50, n_classes=1,
                     weight_dtype=jnp.bfloat16):
    """Replicates MLP.__init__ size schedule (input_dim >= 100 branch, skip=True)."""
    start_dim = 1024 if mlp_type == "small" else 2048
    end_dim = 128 if mlp_type == "small" else 256
    sizes = np.round(np.logspace(np.log10(start_dim), np.log10(end_dim),
                                 num=mlp_depth - 1)).astype(int).tolist()
    sizes.insert(0, input_dim)                      # e.g. [128, 1024, 512, 256, 128]

    skip_indices = [0] + [i for i in range(1, len(sizes), 2)]
    skip_sizes = [sizes[i] for i in skip_indices]   # e.g. [128, 1024, 256]

    keys = iter(jax.random.split(key, 64))

    def xavier(fan_in, fan_out):
        std = float(np.sqrt(2.0 / (fan_in + fan_out)))
        w = jax.random.normal(next(keys), (fan_in, fan_out), dtype=jnp.float32) * std
        # Stored as (in, out) — transpose of PyTorch (out, in). bf16 storage halves
        # HBM->VMEM weight streaming; accumulation stays f32 in the kernel.
        return w.astype(weight_dtype)

    params = {"blocks": [], "skip_blocks": []}
    for i in range(1, mlp_depth):
        params["blocks"].append((xavier(sizes[i - 1], sizes[i]),
                                 jnp.zeros((1, sizes[i]), jnp.float32)))
    for i in range(len(skip_sizes) - 1):
        params["skip_blocks"].append((xavier(skip_sizes[i], skip_sizes[i + 1]),
                                      jnp.zeros((1, skip_sizes[i + 1]), jnp.float32)))

    params["to_feats"] = (xavier(sizes[-1], target_features),
                          jnp.zeros((1, target_features), jnp.float32))
    params["final"] = (xavier(target_features, n_classes),
                       jnp.zeros((1, n_classes), jnp.float32))

    # Lane-dense (zero-padded) versions of the two narrow heads — exact math.
    tf_pad = _round_up(target_features, LANE)
    nc_pad = _round_up(n_classes, LANE)
    wf, bf = params["to_feats"]
    wn, bn = params["final"]
    params["to_feats_padded"] = (
        jnp.pad(wf, ((0, 0), (0, tf_pad - target_features))),
        jnp.pad(bf, ((0, 0), (0, tf_pad - target_features))))
    params["final_padded"] = (
        jnp.pad(wn, ((0, tf_pad - target_features), (0, nc_pad - n_classes))),
        jnp.pad(bn, ((0, 0), (0, nc_pad - n_classes))))
    params["n_classes"] = n_classes
    return params


# ------------------------------ Fused Pallas kernel ------------------------ #

def _make_fused_mlp_kernel(n_blocks, n_skips, out_dtype):
    """Kernel args: x_ref, (w,b)*n_blocks, (w,b)*n_skips, wf, bf, wn, bn, out_ref."""

    def kernel(*refs):
        x_ref = refs[0]
        out_ref = refs[-1]
        p = refs[1:-1]
        blk = [(p[2 * i], p[2 * i + 1]) for i in range(n_blocks)]
        off = 2 * n_blocks
        skp = [(p[off + 2 * i], p[off + 2 * i + 1]) for i in range(n_skips)]
        off += 2 * n_skips
        wf_r, bf_r, wn_r, bn_r = p[off], p[off + 1], p[off + 2], p[off + 3]

        def linear_f32(a_bf16, w_ref, b_ref):
            # bf16 operands into the MXU, f32 accumulation; bias add in f32.
            acc = jnp.dot(a_bf16, w_ref[...], preferred_element_type=jnp.float32)
            return acc + b_ref[...]

        # Activations carried in bf16 (halves vreg/VMEM footprint at TM=256);
        # bias / ReLU / residual math stays in f32 (v5e has no bf16 VPU path).
        a = x_ref[...].astype(jnp.bfloat16)
        skip_a = a
        s = 0
        for i in range(n_blocks):
            acc = jnp.maximum(linear_f32(a, blk[i][0], blk[i][1]), 0.0)
            if i % 2 == 0:
                sacc = jnp.maximum(linear_f32(skip_a, skp[s][0], skp[s][1]), 0.0)
                acc = acc + sacc                      # residual add in f32
                skip_a = sacc.astype(jnp.bfloat16)    # bf16 carry for next skip matmul
                s += 1
            a = acc.astype(jnp.bfloat16)              # bf16 carry for next matmul
        h = linear_f32(a, wf_r, bf_r)                           # to_feats (128-lane padded)
        o = linear_f32(h.astype(jnp.bfloat16), wn_r, bn_r)      # final    (128-lane padded)
        out_ref[...] = o.astype(out_dtype)

    return kernel


# ----------------------------------- Wrapper -------------------------------- #

def mlp_forward(x, params, tile_m=None):
    """Fused MLP forward: no-grid path for tiny M, batch-tiled grid otherwise."""
    n_blocks = len(params["blocks"])
    n_skips = len(params["skip_blocks"])
    wf, bf = params["to_feats_padded"]
    wn, bn = params["final_padded"]
    n_classes = params["n_classes"]

    M, D = x.shape
    out_n = wn.shape[1]

    weights = []
    for w, b in params["blocks"]:
        weights += [w, b]
    for w, b in params["skip_blocks"]:
        weights += [w, b]
    weights += [wf, bf, wn, bn]

    kernel = _make_fused_mlp_kernel(n_blocks, n_skips, jnp.float32)

    if M <= GRID_THRESHOLD:
        # --- Single-shot path: everything is a whole-array VMEM operand. ---
        Mp = _round_up(M, BF16_SUBLANE)
        xp = jnp.pad(x, ((0, Mp - M), (0, 0))) if Mp != M else x
        vmem_spec = pl.BlockSpec(memory_space=pltpu.MemorySpace.VMEM)
        out = pl.pallas_call(
            kernel,
            out_shape=jax.ShapeDtypeStruct((Mp, out_n), jnp.float32),
            in_specs=[vmem_spec] * (1 + len(weights)),
            out_specs=vmem_spec,
            compiler_params=pltpu.CompilerParams(vmem_limit_bytes=VMEM_LIMIT_BYTES),
        )(xp, *weights)
        return out[:M, :n_classes]

    # --- Batch-tiled path: grid over M, weights pinned via constant index_map. ---
    tm = tile_m or _default_tile_m()
    Mp = _round_up(M, tm)
    xp = jnp.pad(x, ((0, Mp - M), (0, 0))) if Mp != M else x
    grid = (Mp // tm,)

    in_specs = [pl.BlockSpec((tm, D), lambda i: (i, 0))]
    # Constant block index -> Pallas keeps each weight/bias resident in VMEM across
    # grid steps instead of re-streaming 2.5 MB per batch tile.
    in_specs += [pl.BlockSpec(w.shape, lambda i: (0, 0)) for w in weights]
    out_specs = pl.BlockSpec((tm, out_n), lambda i: (i, 0))

    out = pl.pallas_call(
        kernel,
        out_shape=jax.ShapeDtypeStruct((Mp, out_n), jnp.float32),
        grid=grid,
        in_specs=in_specs,
        out_specs=out_specs,
        compiler_params=pltpu.CompilerParams(
            dimension_semantics=("parallel",),        # megacore / v7x second TC
            vmem_limit_bytes=VMEM_LIMIT_BYTES),
    )(xp, *weights)
    return out[:M, :n_classes]


# ------------------------------ Pure-JAX reference ------------------------- #

def mlp_forward_ref(x, params):
    """Same math as the kernel (bf16 matmul inputs, f32 accumulation/bias/relu/residual,
    bf16 activation carries, unpadded heads), no Pallas."""

    def linear_f32(a_bf16, w, b):
        return jnp.dot(a_bf16, w, preferred_element_type=jnp.float32) + b

    a = x.astype(jnp.bfloat16)
    skip_a = a
    s = 0
    for i, (w, b) in enumerate(params["blocks"]):
        acc = jnp.maximum(linear_f32(a, w, b), 0.0)
        if i % 2 == 0:
            ws, bs = params["skip_blocks"][s]
            sacc = jnp.maximum(linear_f32(skip_a, ws, bs), 0.0)
            acc = acc + sacc
            skip_a = sacc.astype(jnp.bfloat16)
            s += 1
        a = acc.astype(jnp.bfloat16)
    wf, bf = params["to_feats"]
    h = linear_f32(a, wf, bf)
    wn, bn = params["final"]
    return linear_f32(h.astype(jnp.bfloat16), wn, bn)


# ----------------------------------- main ----------------------------------- #

if __name__ == "__main__":
    key = jax.random.PRNGKey(0)
    k_param, k_x1, k_x2 = jax.random.split(key, 3)

    input_dim = 128   # >= 100 -> full path with skip connections
    params = build_mlp_params(k_param, input_dim)

    # 1) Tiny batch -> single-shot (no-grid) path.
    x_small = jax.random.normal(k_x1, (8, input_dim), dtype=jnp.float32)
    out_small = jax.block_until_ready(mlp_forward(x_small, params))
    ref_small = jax.block_until_ready(mlp_forward_ref(x_small, params))
    assert out_small.shape == (8, 1), out_small.shape
    np.testing.assert_allclose(np.asarray(out_small), np.asarray(ref_small),
                               rtol=1e-2, atol=1e-2)

    # 2) Larger batch -> batch-tiled grid path (weights pinned across grid steps,
    #    "parallel" axis; exercises non-multiple-of-TM padding as well).
    x_big = jax.random.normal(k_x2, (552, input_dim), dtype=jnp.float32)
    out_big = jax.block_until_ready(mlp_forward(x_big, params))
    ref_big = jax.block_until_ready(mlp_forward_ref(x_big, params))
    assert out_big.shape == (552, 1), out_big.shape
    np.testing.assert_allclose(np.asarray(out_big), np.asarray(ref_big),
                               rtol=1e-2, atol=1e-2)

    print("KERNEL_OK")
</pallas_src>

<mosaic_0001>
module attributes {stable_mosaic.version = 11 : i64} {
  func.func @kernel(%arg0: memref<16x128xf32, #tpu.memory_space<vmem>>, %arg1: memref<128x1024xbf16, #tpu.memory_space<vmem>>, %arg2: memref<1x1024xf32, #tpu.memory_space<vmem>>, %arg3: memref<1024x512xbf16, #tpu.memory_space<vmem>>, %arg4: memref<1x512xf32, #tpu.memory_space<vmem>>, %arg5: memref<512x256xbf16, #tpu.memory_space<vmem>>, %arg6: memref<1x256xf32, #tpu.memory_space<vmem>>, %arg7: memref<256x128xbf16, #tpu.memory_space<vmem>>, %arg8: memref<1x128xf32, #tpu.memory_space<vmem>>, %arg9: memref<128x1024xbf16, #tpu.memory_space<vmem>>, %arg10: memref<1x1024xf32, #tpu.memory_space<vmem>>, %arg11: memref<1024x256xbf16, #tpu.memory_space<vmem>>, %arg12: memref<1x256xf32, #tpu.memory_space<vmem>>, %arg13: memref<128x128xbf16, #tpu.memory_space<vmem>>, %arg14: memref<1x128xf32, #tpu.memory_space<vmem>>, %arg15: memref<128x128xbf16, #tpu.memory_space<vmem>>, %arg16: memref<1x128xf32, #tpu.memory_space<vmem>>, %arg17: memref<16x128xf32, #tpu.memory_space<vmem>>) attributes {dimension_semantics = [], scalar_prefetch = 0 : i64, scratch_operands = 0 : i64, tpu.core_type = #tpu.core_type<tc>} {
    %c0 = arith.constant 0 : index
    %c0_0 = arith.constant 0 : index
    %0 = vector.load %arg0[%c0, %c0_0] : memref<16x128xf32, #tpu.memory_space<vmem>>, vector<16x128xf32>
    %1 = arith.truncf %0 : vector<16x128xf32> to vector<16x128xbf16>
    %c0_1 = arith.constant 0 : index
    %c0_2 = arith.constant 0 : index
    %2 = vector.load %arg1[%c0_1, %c0_2] : memref<128x1024xbf16, #tpu.memory_space<vmem>>, vector<128x1024xbf16>
    %cst = arith.constant dense<0.000000e+00> : vector<16x1024xf32>
    %3 = tpu.matmul %1, %2, %cst {dimension_numbers = #tpu.dot_dimension_numbers<[1], [0], [0], [1], [0, 0, 1, 1], [], []>} : vector<16x128xbf16>, vector<128x1024xbf16>, vector<16x1024xf32> -> vector<16x1024xf32>
    %c0_3 = arith.constant 0 : index
    %c0_4 = arith.constant 0 : index
    %4 = vector.load %arg2[%c0_3, %c0_4] : memref<1x1024xf32, #tpu.memory_space<vmem>>, vector<1x1024xf32>
    %5 = vector.broadcast %4 : vector<1x1024xf32> to vector<16x1024xf32>
    %6 = arith.addf %3, %5 : vector<16x1024xf32>
    %cst_5 = arith.constant 0.000000e+00 : f32
    %7 = vector.broadcast %cst_5 : f32 to vector<16x1024xf32>
    %8 = arith.maximumf %6, %7 : vector<16x1024xf32>
    %c0_6 = arith.constant 0 : index
    %c0_7 = arith.constant 0 : index
    %9 = vector.load %arg9[%c0_6, %c0_7] : memref<128x1024xbf16, #tpu.memory_space<vmem>>, vector<128x1024xbf16>
    %cst_8 = arith.constant dense<0.000000e+00> : vector<16x1024xf32>
    %10 = tpu.matmul %1, %9, %cst_8 {dimension_numbers = #tpu.dot_dimension_numbers<[1], [0], [0], [1], [0, 0, 1, 1], [], []>} : vector<16x128xbf16>, vector<128x1024xbf16>, vector<16x1024xf32> -> vector<16x1024xf32>
    %c0_9 = arith.constant 0 : index
    %c0_10 = arith.constant 0 : index
    %11 = vector.load %arg10[%c0_9, %c0_10] : memref<1x1024xf32, #tpu.memory_space<vmem>>, vector<1x1024xf32>
    %12 = vector.broadcast %11 : vector<1x1024xf32> to vector<16x1024xf32>
    %13 = arith.addf %10, %12 : vector<16x1024xf32>
    %cst_11 = arith.constant 0.000000e+00 : f32
    %14 = vector.broadcast %cst_11 : f32 to vector<16x1024xf32>
    %15 = arith.maximumf %13, %14 : vector<16x1024xf32>
    %16 = arith.addf %8, %15 : vector<16x1024xf32>
    %17 = arith.truncf %15 : vector<16x1024xf32> to vector<16x1024xbf16>
    %18 = arith.truncf %16 : vector<16x1024xf32> to vector<16x1024xbf16>
    %c0_12 = arith.constant 0 : index
    %c0_13 = arith.constant 0 : index
    %19 = vector.load %arg3[%c0_12, %c0_13] : memref<1024x512xbf16, #tpu.memory_space<vmem>>, vector<1024x512xbf16>
    %cst_14 = arith.constant dense<0.000000e+00> : vector<16x512xf32>
    %20 = tpu.matmul %18, %19, %cst_14 {dimension_numbers = #tpu.dot_dimension_numbers<[1], [0], [0], [1], [0, 0, 1, 1], [], []>} : vector<16x1024xbf16>, vector<1024x512xbf16>, vector<16x512xf32> -> vector<16x512xf32>
    %c0_15 = arith.constant 0 : index
    %c0_16 = arith.constant 0 : index
    %21 = vector.load %arg4[%c0_15, %c0_16] : memref<1x512xf32, #tpu.memory_space<vmem>>, vector<1x512xf32>
    %22 = vector.broadcast %21 : vector<1x512xf32> to vector<16x512xf32>
    %23 = arith.addf %20, %22 : vector<16x512xf32>
    %cst_17 = arith.constant 0.000000e+00 : f32
    %24 = vector.broadcast %cst_17 : f32 to vector<16x512xf32>
    %25 = arith.maximumf %23, %24 : vector<16x512xf32>
    %26 = arith.truncf %25 : vector<16x512xf32> to vector<16x512xbf16>
    %c0_18 = arith.constant 0 : index
    %c0_19 = arith.constant 0 : index
    %27 = vector.load %arg5[%c0_18, %c0_19] : memref<512x256xbf16, #tpu.memory_space<vmem>>, vector<512x256xbf16>
    %cst_20 = arith.constant dense<0.000000e+00> : vector<16x256xf32>
    %28 = tpu.matmul %26, %27, %cst_20 {dimension_numbers = #tpu.dot_dimension_numbers<[1], [0], [0], [1], [0, 0, 1, 1], [], []>} : vector<16x512xbf16>, vector<512x256xbf16>, vector<16x256xf32> -> vector<16x256xf32>
    %c0_21 = arith.constant 0 : index
    %c0_22 = arith.constant 0 : index
    %29 = vector.load %arg6[%c0_21, %c0_22] : memref<1x256xf32, #tpu.memory_space<vmem>>, vector<1x256xf32>
    %30 = vector.broadcast %29 : vector<1x256xf32> to vector<16x256xf32>
    %31 = arith.addf %28, %30 : vector<16x256xf32>
    %cst_23 = arith.constant 0.000000e+00 : f32
    %32 = vector.broadcast %cst_23 : f32 to vector<16x256xf32>
    %33 = arith.maximumf %31, %32 : vector<16x256xf32>
    %c0_24 = arith.constant 0 : index
    %c0_25 = arith.constant 0 : index
    %34 = vector.load %arg11[%c0_24, %c0_25] : memref<1024x256xbf16, #tpu.memory_space<vmem>>, vector<1024x256xbf16>
    %cst_26 = arith.constant dense<0.000000e+00> : vector<16x256xf32>
    %35 = tpu.matmul %17, %34, %cst_26 {dimension_numbers = #tpu.dot_dimension_numbers<[1], [0], [0], [1], [0, 0, 1, 1], [], []>} : vector<16x1024xbf16>, vector<1024x256xbf16>, vector<16x256xf32> -> vector<16x256xf32>
    %c0_27 = arith.constant 0 : index
    %c0_28 = arith.constant 0 : index
    %36 = vector.load %arg12[%c0_27, %c0_28] : memref<1x256xf32, #tpu.memory_space<vmem>>, vector<1x256xf32>
    %37 = vector.broadcast %36 : vector<1x256xf32> to vector<16x256xf32>
    %38 = arith.addf %35, %37 : vector<16x256xf32>
    %cst_29 = arith.constant 0.000000e+00 : f32
    %39 = vector.broadcast %cst_29 : f32 to vector<16x256xf32>
    %40 = arith.maximumf %38, %39 : vector<16x256xf32>
    %41 = arith.addf %33, %40 : vector<16x256xf32>
    %42 = arith.truncf %41 : vector<16x256xf32> to vector<16x256xbf16>
    %c0_30 = arith.constant 0 : index
    %c0_31 = arith.constant 0 : index
    %43 = vector.load %arg7[%c0_30, %c0_31] : memref<256x128xbf16, #tpu.memory_space<vmem>>, vector<256x128xbf16>
    %cst_32 = arith.constant dense<0.000000e+00> : vector<16x128xf32>
    %44 = tpu.matmul %42, %43, %cst_32 {dimension_numbers = #tpu.dot_dimension_numbers<[1], [0], [0], [1], [0, 0, 1, 1], [], []>} : vector<16x256xbf16>, vector<256x128xbf16>, vector<16x128xf32> -> vector<16x128xf32>
    %c0_33 = arith.constant 0 : index
    %c0_34 = arith.constant 0 : index
    %45 = vector.load %arg8[%c0_33, %c0_34] : memref<1x128xf32, #tpu.memory_space<vmem>>, vector<1x128xf32>
    %46 = vector.broadcast %45 : vector<1x128xf32> to vector<16x128xf32>
    %47 = arith.addf %44, %46 : vector<16x128xf32>
    %cst_35 = arith.constant 0.000000e+00 : f32
    %48 = vector.broadcast %cst_35 : f32 to vector<16x128xf32>
    %49 = arith.maximumf %47, %48 : vector<16x128xf32>
    %50 = arith.truncf %49 : vector<16x128xf32> to vector<16x128xbf16>
    %c0_36 = arith.constant 0 : index
    %c0_37 = arith.constant 0 : index
    %51 = vector.load %arg13[%c0_36, %c0_37] : memref<128x128xbf16, #tpu.memory_space<vmem>>, vector<128x128xbf16>
    %cst_38 = arith.constant dense<0.000000e+00> : vector<16x128xf32>
    %52 = tpu.matmul %50, %51, %cst_38 {dimension_numbers = #tpu.dot_dimension_numbers<[1], [0], [0], [1], [0, 0, 1, 1], [], []>} : vector<16x128xbf16>, vector<128x128xbf16>, vector<16x128xf32> -> vector<16x128xf32>
    %c0_39 = arith.constant 0 : index
    %c0_40 = arith.constant 0 : index
    %53 = vector.load %arg14[%c0_39, %c0_40] : memref<1x128xf32, #tpu.memory_space<vmem>>, vector<1x128xf32>
    %54 = vector.broadcast %53 : vector<1x128xf32> to vector<16x128xf32>
    %55 = arith.addf %52, %54 : vector<16x128xf32>
    %56 = arith.truncf %55 : vector<16x128xf32> to vector<16x128xbf16>
    %c0_41 = arith.constant 0 : index
    %c0_42 = arith.constant 0 : index
    %57 = vector.load %arg15[%c0_41, %c0_42] : memref<128x128xbf16, #tpu.memory_space<vmem>>, vector<128x128xbf16>
    %cst_43 = arith.constant dense<0.000000e+00> : vector<16x128xf32>
    %58 = tpu.matmul %56, %57, %cst_43 {dimension_numbers = #tpu.dot_dimension_numbers<[1], [0], [0], [1], [0, 0, 1, 1], [], []>} : vector<16x128xbf16>, vector<128x128xbf16>, vector<16x128xf32> -> vector<16x128xf32>
    %c0_44 = arith.constant 0 : index
    %c0_45 = arith.constant 0 : index
    %59 = vector.load %arg16[%c0_44, %c0_45] : memref<1x128xf32, #tpu.memory_space<vmem>>, vector<1x128xf32>
    %60 = vector.broadcast %59 : vector<1x128xf32> to vector<16x128xf32>
    %61 = arith.addf %58, %60 : vector<16x128xf32>
    %c0_46 = arith.constant 0 : index
    %c0_47 = arith.constant 0 : index
    %62 = vector.load %arg17[%c0_46, %c0_47] : memref<16x128xf32, #tpu.memory_space<vmem>>, vector<16x128xf32>
    tpu.vector_store %arg17[%c0_46, %c0_47], %61 {strides = array<i32>} : memref<16x128xf32, #tpu.memory_space<vmem>>, vector<16x128xf32>,
    return
  }
}

</mosaic_0001>

<bundles_post_ra>
// kernel: tpu_custom_call.1
= control target key start
LH: loop header
LB: loop body
LE: loop exit
PB: predicated region body
PF: predicated region fallthrough
CT: control target
= control target key end

     0   :  { %s9171_s0 = inlined_call_operand.hbm [shape: f32[16,128], index: 0, kind: input, shape index: {}]   ;;  %s9172_s1 = inlined_call_operand.hbm [shape: bf16[128,1024], index: 1, kind: input, shape index: {}]   ;;  %s9173_s2 = inlined_call_operand.hbm [shape: f32[1,1024], index: 2, kind: input, shape index: {}]   ;;  %s9174_s3 = inlined_call_operand.hbm [shape: bf16[1024,512], index: 3, kind: input, shape index: {}]   ;;  %s9175_s4 = inlined_call_operand.hbm [shape: f32[1,512], index: 4, kind: input, shape index: {}]   ;;  %s9176_s5 = inlined_call_operand.hbm [shape: bf16[512,256], index: 5, kind: input, shape index: {}]   ;;  %s9177_s6 = inlined_call_operand.hbm [shape: f32[1,256], index: 6, kind: input, shape index: {}]   ;;  %s9178_s7 = inlined_call_operand.hbm [shape: bf16[256,128], index: 7, kind: input, shape index: {}]   ;;  %s9179_s8 = inlined_call_operand.hbm [shape: f32[1,128], index: 8, kind: input, shape index: {}]   ;;  %s9180_s9 = inlined_call_operand.hbm [shape: bf16[128,1024], index: 9, kind: input, shape index: {}]   ;;  %s9181_s10 = inlined_call_operand.vmem [shape: f32[1,1024], index: 10, kind: input, shape index: {}]   ;;  %s9182_s11 = inlined_call_operand.hbm [shape: bf16[1024,256], index: 11, kind: input, shape index: {}]   ;;  %s9183_s12 = inlined_call_operand.vmem [shape: f32[1,256], index: 12, kind: input, shape index: {}]   ;;  %s9184_s13 = inlined_call_operand.hbm [shape: bf16[128,128], index: 13, kind: input, shape index: {}]   ;;  %s9185_s14 = inlined_call_operand.vmem [shape: f32[1,128], index: 14, kind: input, shape index: {}]   ;;  %s9186_s15 = inlined_call_operand.hbm [shape: bf16[128,128], index: 15, kind: input, shape index: {}]   ;;  %s9187_s16 = inlined_call_operand.vmem [shape: f32[1,128], index: 16, kind: input, shape index: {}]   ;;  %s9188_s17 = inlined_call_operand.hbm [shape: f32[16,128], index: 17, kind: output, shape index: {}]  }
   0x1   :  { %9189 = sst [smem:[#allocation32_spill]] %s9171_s0 }
   0x2   :  { %9190 = sst [smem:[#allocation33_spill]] %s9172_s1 }
   0x3   :  { %9191 = sst [smem:[#allocation34_spill]] %s9188_s17 }
   0x4   :  { %22 = vsyncpa [#allocation3], 0 }
   0x5   :  { %23 = vsyncpa [#allocation6], 0 }
   0x6   :  { %24 = vsyncpa [#allocation9], 0 }
   0x7   :  { %25 = vsyncpa [#allocation12], 0 }
   0x8   :  { %26 = vsyncpa [#allocation15], 0 }
   0x9   :  { %27 = vsyncpa [#allocation18], 0 }
   0xa   :  { %28 = vsyncpa [#allocation21], 0  ;;  %s9192_s26 = sld [smem:[#allocation33_spill]] }
  0x10   :  { %s47_s27 = sshll.u32 %s9192_s26, 4  ;;  %s48_s27 = int_to_ptr.hbm [resolvable:$true] %s47_s27 }
  0x11   :  { %29 = vsyncpa [#allocation4], 0  ;;  %s8639_s28 = smov [#allocation5]   ;;  %s71_s18 = sshll.u32 %s9174_s3, 4  ;;  %s72_s18 = int_to_ptr.hbm [resolvable:$true] %s71_s18 }
  0x12   :  { %s49_s29 = sshll.u32 %s8639_s28, 4  ;;  %s8640_s19 = smov 512   ;;  %s50_s29 = int_to_ptr.vmem [resolvable:$true] %s49_s29 }
  0x13   :  { %s8641_s1 = smov 32   ;;  %s8642_s20 = smov [#allocation8]  }
  0x14   :  { %55 = dma.hbm_to_vmem [thread:$0]  %s48_s27, 8192, %s50_s29, [#allocation6], %s8640_s19, %s8640_s19, %s8641_s1  }
  0x15   :  { %s73_s21 = sshll.u32 %s8642_s20, 4  ;;  %s8643_s22 = smov 256   ;;  %s74_s21 = int_to_ptr.vmem [resolvable:$true] %s73_s21 }
  0x16   :  { %s8644_s23 = smov 16   ;;  %s95_s26 = sshll.u32 %s9176_s5, 4  ;;  %s96_s26 = int_to_ptr.hbm [resolvable:$true] %s95_s26 }
  0x17   :  { %79 = dma.hbm_to_vmem [thread:$0]  %s72_s18, 32768, %s74_s21, [#allocation9], %s8643_s22, %s8643_s22, %s8644_s23  }
  0x18   :  { %s8645_s28 = smov [#allocation11]   ;;  %s119_s17 = sshll.u32 %s9178_s7, 4  ;;  %s120_s17 = int_to_ptr.hbm [resolvable:$true] %s119_s17 }
  0x19   :  { %s97_s3 = sshll.u32 %s8645_s28, 4  ;;  %s8646_s27 = smov 128   ;;  %s98_s3 = int_to_ptr.vmem [resolvable:$true] %s97_s3 }
  0x1a   :  { %s8647_s29 = smov 8   ;;  %s8648_s18 = smov [#allocation14]  }
  0x1b   :  { %103 = dma.hbm_to_vmem [thread:$0]  %s96_s26, 8192, %s98_s3, [#allocation12], %s8646_s27, %s8646_s27, %s8647_s29  }
  0x1c   :  { %s121_s20 = sshll.u32 %s8648_s18, 4  ;;  %s8649_s21 = smov 64   ;;  %s122_s20 = int_to_ptr.vmem [resolvable:$true] %s121_s20 }
  0x1d   :  { %s8650_s5 = smov 4   ;;  %s143_s7 = sshll.u32 %s9180_s9, 4  ;;  %s144_s7 = int_to_ptr.hbm [resolvable:$true] %s143_s7 }
  0x1e   :  { %127 = dma.hbm_to_vmem [thread:$0]  %s120_s17, 2048, %s122_s20, [#allocation15], %s8649_s21, %s8649_s21, %s8650_s5  }
  0x1f   :  { %s8651_s24 = smov [#allocation17]   ;;  %s173_s3 = sshll.u32 %s9184_s13, 4  ;;  %s174_s3 = int_to_ptr.hbm [resolvable:$true] %s173_s3 }
  0x20   :  { %s145_s25 = sshll.u32 %s8651_s24, 4  ;;  %s8652_s0 = smov [#allocation20]   ;;  %s146_s25 = int_to_ptr.vmem [resolvable:$true] %s145_s25 }
  0x21   :  { %151 = dma.hbm_to_vmem [thread:$0]  %s144_s7, 8192, %s146_s25, [#allocation18], %s8640_s19, %s8640_s19, %s8641_s1  }
  0x22   :  { %s175_s30 = sshll.u32 %s8652_s0, 4  ;;  %s9193_s20 = sld [smem:[#allocation32_spill]]  ;;  %s176_s30 = int_to_ptr.vmem [resolvable:$true] %s175_s30 }
  0x23   :  { %181 = dma.hbm_to_vmem [thread:$0]  %s174_s3, 1024, %s176_s30, [#allocation21], %s8649_s21, %s8649_s21, %s8650_s5  }
  0x24   :  { %s61_s13 = sshll.u32 %s9173_s2, 4  ;;  %s8653_s24 = smov [#allocation2]   ;;  %s62_s13 = int_to_ptr.hbm [resolvable:$true] %s61_s13 }
  0x25   :  { %s36_s28 = sshll.u32 %s8653_s24, 4  ;;  %s8654_s19 = smov [#allocation7]   ;;  %s37_s28 = int_to_ptr.vmem [resolvable:$true] %s36_s28 }
  0x26   :  { %s63_s1 = sshll.u32 %s8654_s19, 4  ;;  %s85_s26 = sshll.u32 %s9175_s4, 4  ;;  %s64_s1 = int_to_ptr.vmem [resolvable:$true] %s63_s1  ;;  %s86_s26 = int_to_ptr.hbm [resolvable:$true] %s85_s26 }
  0x27   :  { %66 = dma.hbm_to_vmem [thread:$0]  %s62_s13, 128, %s64_s1, [#allocation6]  }
  0x28   :  { %s34_s22 = sshll.u32 %s9193_s20, 4  ;;  %s109_s2 = sshll.u32 %s9177_s6, 4  ;;  %s35_s22 = int_to_ptr.hbm [resolvable:$true] %s34_s22  ;;  %s110_s2 = int_to_ptr.hbm [resolvable:$true] %s109_s2 }
  0x29   :  { %42 = dma.hbm_to_vmem [thread:$0]  %s35_s22, 256, %s37_s28, [#allocation3], %s8646_s27, %s8646_s27, %s8647_s29  }
  0x2a   :  { %s8655_s30 = smov [#allocation10]   ;;  %s8656_s18 = smov [#allocation13]  }
  0x2b   :  { %s87_s17 = sshll.u32 %s8655_s30, 4  ;;  %s111_s20 = sshll.u32 %s8656_s18, 4  ;;  %s88_s17 = int_to_ptr.vmem [resolvable:$true] %s87_s17  ;;  %s112_s20 = int_to_ptr.vmem [resolvable:$true] %s111_s20 }
  0x2c   :  { %90 = dma.hbm_to_vmem [thread:$0]  %s86_s26, 64, %s88_s17, [#allocation9]  }
  0x2d   :  { %s133_s23 = sshll.u32 %s9179_s8, 4  ;;  %s158_s24 = sshll.u32 %s9182_s11, 4  ;;  %s134_s23 = int_to_ptr.hbm [resolvable:$true] %s133_s23  ;;  %s159_s24 = int_to_ptr.hbm [resolvable:$true] %s158_s24 }
  0x2e   :  { %114 = dma.hbm_to_vmem [thread:$0]  %s110_s2, 32, %s112_s20, [#allocation12]  }
  0x2f   :  { %s8657_s28 = smov [#allocation16]   ;;  %s8658_s19 = smov [#allocation19]  }
  0x30   :  { %s135_s6 = sshll.u32 %s8657_s28, 4  ;;  %s160_s1 = sshll.u32 %s8658_s19, 4  ;;  %s136_s6 = int_to_ptr.vmem [resolvable:$true] %s135_s6  ;;  %s161_s1 = int_to_ptr.vmem [resolvable:$true] %s160_s1 }
  0x31   :  { %138 = dma.hbm_to_vmem [thread:$0]  %s134_s23, 16, %s136_s6, [#allocation15]  }
  0x32   :  { %s188_s26 = sshll.u32 %s9186_s15, 4  ;;  %s8659_s8 = smov [#allocation22]   ;;  %s189_s26 = int_to_ptr.hbm [resolvable:$true] %s188_s26 }
  0x33   :  { %166 = dma.hbm_to_vmem [thread:$0]  %s159_s24, 16384, %s161_s1, [#allocation18], %s8646_s27, %s8646_s27, %s8647_s29  }
  0x34   :  { %s190_s3 = sshll.u32 %s8659_s8, 4  ;;  %s191_s3 = int_to_ptr.vmem [resolvable:$true] %s190_s3 }
  0x35   :  { %196 = dma.hbm_to_vmem [thread:$0]  %s189_s26, 1024, %s191_s3, [#allocation21], %s8649_s21, %s8649_s21, %s8650_s5  }
  0x36   :  { %8623 = dma.done.wait [#allocation3], 256  }
  0x37   :  { %8624 = vsyncadd [#allocation3], 4294967040 }
  0x38   :  { %8625 = dma.done.wait [#allocation6], 8320  }
  0x39   :  { %8626 = vsyncadd [#allocation6], 4294958976 }
  0x3a   :  { %8627 = dma.done.wait [#allocation9], 32832  }
  0x3b   :  { %8628 = vsyncadd [#allocation9], 4294934464 }
  0x3c   :  { %8629 = dma.done.wait [#allocation12], 8224  }
  0x3d   :  { %8630 = vsyncadd [#allocation12], 4294959072 }
  0x3e   :  { %8631 = dma.done.wait [#allocation15], 2064  }
  0x3f   :  { %8632 = vsyncadd [#allocation15], 4294965232 }
  0x40   :  { %8633 = dma.done.wait [#allocation18], 24576  }
  0x41   :  { %8634 = vsyncadd [#allocation18], 4294942720 }
  0x42   :  { %8635 = dma.done.wait [#allocation21], 2048  }
  0x43   :  { %8636 = vsyncadd [#allocation21], 4294965248  ;;  %v5447_v0 = vld [vmem:[#allocation5 + $0x1c0] sm:$0xf]  ;;  %v7709_v2 = vld [vmem:[#allocation5 + $0x1c4] sm:$0xf] }
  0x44   :  { %v7713_v1 = vld [vmem:[#allocation5 + $0x1dc] sm:$0xf0]  ;;  %v5449_v4 = vld [vmem:[#allocation5 + $0x1e0] sm:$0xf0]  ;;  %v5455_v5 = vld [vmem:[#allocation5 + $0x1c8] sm:$0xf] }
  0x45   :  { %v5448_v3 = vor.u32 %v7713_v1, %v5447_v0  ;;  %v7714_v6 = vld [vmem:[#allocation5 + $0x1e4] sm:$0xf0]  ;;  %v5452_v7 = vor.u32 %v7709_v2, %v5449_v4  ;;  %v7710_v9 = vld [vmem:[#allocation5 + $0x1cc] sm:$0xf]  ;;  %v5415_v11 = vld [vmem:[#allocation5 + $0x180] sm:$0xf] }
  0x46   :  { %v5456_v8 = vor.u32 %v7714_v6, %v5455_v5  ;;  %v5457_v10 = vld [vmem:[#allocation5 + $0x1e8] sm:$0xf0]  ;;  %v7705_v13 = vld [vmem:[#allocation5 + $0x19c] sm:$0xf0]  ;;  %v7701_v14 = vld [vmem:[#allocation5 + $0x184] sm:$0xf] }
  0x47   :  { %656 = vmatpush.bf16.msra.mxu0 %v5448_v3  ;;  %v5460_v12 = vor.u32 %v7710_v9, %v5457_v10  ;;  %v5417_v15 = vld [vmem:[#allocation5 + $0x1a0] sm:$0xf0]  ;;  %670 = vmatpush.bf16.msra.mxu1 %v5452_v7  ;;  %v5416_v16 = vor.u32 %v7705_v13, %v5415_v11  ;;  %v5423_v18 = vld [vmem:[#allocation5 + $0x188] sm:$0xf]  ;;  %v7702_v20 = vld [vmem:[#allocation5 + $0x18c] sm:$0xf] }
  0x48   :  { %684 = vmatpush.bf16.msra.mxu2 %v5456_v8  ;;  %v5420_v17 = vor.u32 %v7701_v14, %v5417_v15  ;;  %v7706_v19 = vld [vmem:[#allocation5 + $0x1a4] sm:$0xf0]  ;;  %v5425_v22 = vld [vmem:[#allocation5 + $0x1a8] sm:$0xf0]  ;;  %v5383_v23 = vld [vmem:[#allocation5 + $0x140] sm:$0xf] }
  0x49   :  { %698 = vmatpush.bf16.msra.mxu3 %v5460_v12  ;;  %v5424_v21 = vor.u32 %v7706_v19, %v5423_v18  ;;  %v7697_v24 = vld [vmem:[#allocation5 + $0x15c] sm:$0xf0]  ;;  %v5428_v25 = vor.u32 %v7702_v20, %v5425_v22  ;;  %v7693_v26 = vld [vmem:[#allocation5 + $0x144] sm:$0xf]  ;;  %v5391_v28 = vld [vmem:[#allocation5 + $0x148] sm:$0xf] }
  0x4a   :  { %v5385_v27 = vld [vmem:[#allocation5 + $0x160] sm:$0xf0]  ;;  %v5384_v29 = vor.u32 %v7697_v24, %v5383_v23  ;;  %v7698_v30 = vld [vmem:[#allocation5 + $0x164] sm:$0xf0]  ;;  %v7694_v31 = vld [vmem:[#allocation5 + $0x14c] sm:$0xf] }
  0x4b   :  { %657 = vmatpush.bf16.msra.mxu0 %v5416_v16  ;;  %v5393_v32 = vld [vmem:[#allocation5 + $0x168] sm:$0xf0]  ;;  %671 = vmatpush.bf16.msra.mxu1 %v5420_v17  ;;  %v5388_v33 = vor.u32 %v7693_v26, %v5385_v27  ;;  %v5392_v34 = vor.u32 %v7698_v30, %v5391_v28  ;;  %v5351_v35 = vld [vmem:[#allocation5 + $0x100] sm:$0xf]  ;;  %v7685_v37 = vld [vmem:[#allocation5 + $0x104] sm:$0xf] }
  0x4c   :  { %685 = vmatpush.bf16.msra.mxu2 %v5424_v21  ;;  %v7689_v36 = vld [vmem:[#allocation5 + $0x11c] sm:$0xf0]  ;;  %v5396_v38 = vor.u32 %v7694_v31, %v5393_v32  ;;  %v5353_v39 = vld [vmem:[#allocation5 + $0x120] sm:$0xf0]  ;;  %v5359_v40 = vld [vmem:[#allocation5 + $0x108] sm:$0xf] }
  0x4d   :  { %699 = vmatpush.bf16.msra.mxu3 %v5428_v25  ;;  %v7690_v41 = vld [vmem:[#allocation5 + $0x124] sm:$0xf0]  ;;  %v7686_v42 = vld [vmem:[#allocation5 + $0x10c] sm:$0xf]  ;;  %v5352_v44 = vor.u32 %v7689_v36, %v5351_v35  ;;  %v5356_v45 = vor.u32 %v7685_v37, %v5353_v39  ;;  %v5319_v47 = vld [vmem:[#allocation5 + $0xc0] sm:$0xf] }
  0x4e   :  { %v5361_v43 = vld [vmem:[#allocation5 + $0x128] sm:$0xf0]  ;;  %v5360_v46 = vor.u32 %v7690_v41, %v5359_v40  ;;  %v7681_v48 = vld [vmem:[#allocation5 + $0xdc] sm:$0xf0]  ;;  %v7677_v49 = vld [vmem:[#allocation5 + $0xc4] sm:$0xf] }
  0x4f   :  { %658 = vmatpush.bf16.msra.mxu0 %v5384_v29  ;;  %672 = vmatpush.bf16.msra.mxu1 %v5388_v33  ;;  %v5364_v50 = vor.u32 %v7686_v42, %v5361_v43  ;;  %v5321_v51 = vld [vmem:[#allocation5 + $0xe0] sm:$0xf0]  ;;  %v5327_v52 = vld [vmem:[#allocation5 + $0xc8] sm:$0xf]  ;;  %v7678_v54 = vld [vmem:[#allocation5 + $0xcc] sm:$0xf]  ;;  %v5320_v56 = vor.u32 %v7681_v48, %v5319_v47 }
  0x50   :  { %686 = vmatpush.bf16.msra.mxu2 %v5392_v34  ;;  %v7682_v53 = vld [vmem:[#allocation5 + $0xe4] sm:$0xf0]  ;;  %v5329_v55 = vld [vmem:[#allocation5 + $0xe8] sm:$0xf0]  ;;  %v5324_v57 = vor.u32 %v7677_v49, %v5321_v51  ;;  %v5287_v59 = vld [vmem:[#allocation5 + $0x80] sm:$0xf] }
  0x51   :  { %700 = vmatpush.bf16.msra.mxu3 %v5396_v38  ;;  %v5328_v58 = vor.u32 %v7682_v53, %v5327_v52  ;;  %v7673_v60 = vld [vmem:[#allocation5 + $0x9c] sm:$0xf0]  ;;  %v7669_v61 = vld [vmem:[#allocation5 + $0x84] sm:$0xf]  ;;  %v5332_v62 = vor.u32 %v7678_v54, %v5329_v55  ;;  %v5295_v0 = vld [vmem:[#allocation5 + $0x88] sm:$0xf] }
  0x52   :  { %v5289_v63 = vld [vmem:[#allocation5 + $0xa0] sm:$0xf0]  ;;  %v7674_v1 = vld [vmem:[#allocation5 + $0xa4] sm:$0xf0]  ;;  %v7670_v2 = vld [vmem:[#allocation5 + $0x8c] sm:$0xf]  ;;  %v5288_v4 = vor.u32 %v7673_v60, %v5287_v59 }
  0x53   :  { %659 = vmatpush.bf16.msra.mxu0 %v5352_v44  ;;  %673 = vmatpush.bf16.msra.mxu1 %v5356_v45  ;;  %v5297_v3 = vld [vmem:[#allocation5 + $0xa8] sm:$0xf0]  ;;  %v5292_v5 = vor.u32 %v7669_v61, %v5289_v63  ;;  %v5296_v6 = vor.u32 %v7674_v1, %v5295_v0  ;;  %v5255_v7 = vld [vmem:[#allocation5 + $0x40] sm:$0xf]  ;;  %v7661_v9 = vld [vmem:[#allocation5 + $0x44] sm:$0xf] }
  0x54   :  { %687 = vmatpush.bf16.msra.mxu2 %v5360_v46  ;;  %v7665_v8 = vld [vmem:[#allocation5 + $0x5c] sm:$0xf0]  ;;  %v5300_v10 = vor.u32 %v7670_v2, %v5297_v3  ;;  %v5257_v11 = vld [vmem:[#allocation5 + $0x60] sm:$0xf0]  ;;  %v5263_v12 = vld [vmem:[#allocation5 + $0x48] sm:$0xf] }
  0x55   :  { %701 = vmatpush.bf16.msra.mxu3 %v5364_v50  ;;  %v7666_v13 = vld [vmem:[#allocation5 + $0x64] sm:$0xf0]  ;;  %v7662_v14 = vld [vmem:[#allocation5 + $0x4c] sm:$0xf]  ;;  %v5256_v16 = vor.u32 %v7665_v8, %v5255_v7  ;;  %v5223_v17 = vld [vmem:[#allocation5] sm:$0xf]  ;;  %v5260_v19 = vor.u32 %v7661_v9, %v5257_v11 }
  0x56   :  { %v5265_v15 = vld [vmem:[#allocation5 + $0x68] sm:$0xf0]  ;;  %v7657_v18 = vld [vmem:[#allocation5 + $0x1c] sm:$0xf0]  ;;  %v5264_v20 = vor.u32 %v7666_v13, %v5263_v12  ;;  %v7653_v21 = vld [vmem:[#allocation5 + $0x4] sm:$0xf] }
  0x57   :  { %660 = vmatpush.bf16.msra.mxu0 %v5320_v56  ;;  %674 = vmatpush.bf16.msra.mxu1 %v5324_v57  ;;  %v5225_v22 = vld [vmem:[#allocation5 + $0x20] sm:$0xf0]  ;;  %v5231_v23 = vld [vmem:[#allocation5 + $0x8] sm:$0xf]  ;;  %v5268_v24 = vor.u32 %v7662_v14, %v5265_v15  ;;  %v7654_v26 = vld [vmem:[#allocation5 + $0xc] sm:$0xf]  ;;  %v5224_v31 = vor.u32 %v7657_v18, %v5223_v17 }
  0x58   :  { %688 = vmatpush.bf16.msra.mxu2 %v5328_v58  ;;  %v7658_v25 = vld [vmem:[#allocation5 + $0x24] sm:$0xf0]  ;;  %v5233_v27 = vld [vmem:[#allocation5 + $0x28] sm:$0xf0]  ;;  %v5463_v28 = vld [vmem:[#allocation5 + $0x1d0] sm:$0xf]  ;;  %v5228_v35 = vor.u32 %v7653_v21, %v5225_v22 }
  0x59   :  { %702 = vmatpush.bf16.msra.mxu3 %v5332_v62  ;;  %v7715_v29 = vld [vmem:[#allocation5 + $0x1ec] sm:$0xf0]  ;;  %v7711_v30 = vld [vmem:[#allocation5 + $0x1d4] sm:$0xf]  ;;  %v5471_v33 = vld [vmem:[#allocation5 + $0x1d8] sm:$0xf]  ;;  %v5232_v36 = vor.u32 %v7658_v25, %v5231_v23  ;;  %v5236_v39 = vor.u32 %v7654_v26, %v5233_v27 }
  0x5a   :  { %v5465_v32 = vld [vmem:[#allocation5 + $0x1f0] sm:$0xf0]  ;;  %v7716_v34 = vld [vmem:[#allocation5 + $0x1f4] sm:$0xf0]  ;;  %v7712_v37 = vld [vmem:[#allocation5 + $0x1dc] sm:$0xf]  ;;  %v5464_v40 = vor.u32 %v7715_v29, %v5463_v28 }
  0x5b   :  { %661 = vmatpush.bf16.msra.mxu0 %v5288_v4  ;;  %675 = vmatpush.bf16.msra.mxu1 %v5292_v5  ;;  %v5473_v38 = vld [vmem:[#allocation5 + $0x1f8] sm:$0xf0]  ;;  %v5468_v41 = vor.u32 %v7711_v30, %v5465_v32  ;;  %v5472_v42 = vor.u32 %v7716_v34, %v5471_v33  ;;  %v5431_v43 = vld [vmem:[#allocation5 + $0x190] sm:$0xf]  ;;  %v7703_v45 = vld [vmem:[#allocation5 + $0x194] sm:$0xf] }
  0x5c   :  { %689 = vmatpush.bf16.msra.mxu2 %v5296_v6  ;;  %v7707_v44 = vld [vmem:[#allocation5 + $0x1ac] sm:$0xf0]  ;;  %v5476_v46 = vor.u32 %v7712_v37, %v5473_v38  ;;  %v5433_v47 = vld [vmem:[#allocation5 + $0x1b0] sm:$0xf0]  ;;  %v5439_v48 = vld [vmem:[#allocation5 + $0x198] sm:$0xf] }
  0x5d   :  { %703 = vmatpush.bf16.msra.mxu3 %v5300_v10  ;;  %v7708_v49 = vld [vmem:[#allocation5 + $0x1b4] sm:$0xf0]  ;;  %v7704_v50 = vld [vmem:[#allocation5 + $0x19c] sm:$0xf]  ;;  %v5432_v52 = vor.u32 %v7707_v44, %v5431_v43  ;;  %v5399_v53 = vld [vmem:[#allocation5 + $0x150] sm:$0xf]  ;;  %v5436_v55 = vor.u32 %v7703_v45, %v5433_v47 }
  0x5e   :  { %v5441_v51 = vld [vmem:[#allocation5 + $0x1b8] sm:$0xf0]  ;;  %v7699_v54 = vld [vmem:[#allocation5 + $0x16c] sm:$0xf0]  ;;  %v5440_v56 = vor.u32 %v7708_v49, %v5439_v48  ;;  %v7695_v57 = vld [vmem:[#allocation5 + $0x154] sm:$0xf] }
  0x5f   :  { %662 = vmatpush.bf16.msra.mxu0 %v5256_v16  ;;  %676 = vmatpush.bf16.msra.mxu1 %v5260_v19  ;;  %v5401_v58 = vld [vmem:[#allocation5 + $0x170] sm:$0xf0]  ;;  %v5444_v60 = vor.u32 %v7704_v50, %v5441_v51  ;;  %v5407_v61 = vld [vmem:[#allocation5 + $0x158] sm:$0xf]  ;;  %v7696_v0 = vld [vmem:[#allocation5 + $0x15c] sm:$0xf]  ;;  %v5400_v3 = vor.u32 %v7699_v54, %v5399_v53 }
  0x60   :  { %690 = vmatpush.bf16.msra.mxu2 %v5264_v20  ;;  %v251_v59 = vld [vmem:[#allocation2] sm:$0xff]  ;;  %v7700_v62 = vld [vmem:[#allocation5 + $0x174] sm:$0xf0]  ;;  %v5409_v1 = vld [vmem:[#allocation5 + $0x178] sm:$0xf0]  ;;  %v5404_v4 = vor.u32 %v7695_v57, %v5401_v58  ;;  %s8660_s30 = smov [#allocation23]  }
  0x61   :  { %704 = vmatpush.bf16.msra.mxu3 %v5268_v24  ;;  %v252_v63 = vld [vmem:[#allocation2 + $0x8] sm:$0xff]  ;;  %v5408_v5 = vor.u32 %v7700_v62, %v5407_v61  ;;  %v5367_v6 = vld [vmem:[#allocation5 + $0x110] sm:$0xf]  ;;  %v7687_v8 = vld [vmem:[#allocation5 + $0x114] sm:$0xf]  ;;  %v5412_v9 = vor.u32 %v7696_v0, %v5409_v1  ;;  %s5200_s17 = sshll.u32 %s8660_s30, 4  ;;  %s5201_s17 = int_to_ptr.vmem [resolvable:$true] %s5200_s17 }
  0x62   :  { %v8814_v2 = vpack.c.bf16 %v252_v63, %v251_v59  ;;  %v7691_v7 = vld [vmem:[#allocation5 + $0x12c] sm:$0xf0]  ;;  %v5369_v10 = vld [vmem:[#allocation5 + $0x130] sm:$0xf0]  ;;  %v5375_v11 = vld [vmem:[#allocation5 + $0x118] sm:$0xf] }
  0x63   :  { %663 = vmatpush.bf16.msra.mxu0 %v5224_v31  ;;  %677 = vmatpush.bf16.msra.mxu1 %v5228_v35  ;;  %v7692_v12 = vld [vmem:[#allocation5 + $0x134] sm:$0xf0]  ;;  %v7688_v13 = vld [vmem:[#allocation5 + $0x11c] sm:$0xf]  ;;  %v5368_v15 = vor.u32 %v7691_v7, %v5367_v6  ;;  %v5372_v16 = vor.u32 %v7687_v8, %v5369_v10  ;;  %v5335_v18 = vld [vmem:[#allocation5 + $0xd0] sm:$0xf] }
  0x64   :  { %691 = vmatpush.bf16.msra.mxu2 %v5232_v36  ;;  %v5377_v14 = vld [vmem:[#allocation5 + $0x138] sm:$0xf0]  ;;  %v5376_v17 = vor.u32 %v7692_v12, %v5375_v11  ;;  %v7683_v19 = vld [vmem:[#allocation5 + $0xec] sm:$0xf0]  ;;  %v7679_v20 = vld [vmem:[#allocation5 + $0xd4] sm:$0xf] }
  0x65   :  { %705 = vmatpush.bf16.msra.mxu3 %v5236_v39  ;;  %v5380_v21 = vor.u32 %v7688_v13, %v5377_v14  ;;  %v5337_v22 = vld [vmem:[#allocation5 + $0xf0] sm:$0xf0]  ;;  %v5343_v23 = vld [vmem:[#allocation5 + $0xd8] sm:$0xf]  ;;  %v7680_v25 = vld [vmem:[#allocation5 + $0xdc] sm:$0xf]  ;;  %v5336_v27 = vor.u32 %v7683_v19, %v5335_v18 }
  0x66   :  { %664 = vmatmul.bf16.vlgmr.msra.gmra.mxu0 %v8814_v2  ;;  %678 = vmatmul.bf16.vlgmr.msra.gmra.mxu1 %v8814_v2  ;;  %v7684_v24 = vld [vmem:[#allocation5 + $0xf4] sm:$0xf0]  ;;  %v5345_v26 = vld [vmem:[#allocation5 + $0xf8] sm:$0xf0]  ;;  %v5340_v28 = vor.u32 %v7679_v20, %v5337_v22  ;;  %v5303_v30 = vld [vmem:[#allocation5 + $0x90] sm:$0xf] }
  0x67   :  { %712 = vmatpush.bf16.msrb.mxu0 %v5464_v40  ;;  %726 = vmatpush.bf16.msrb.mxu1 %v5468_v41  ;;  %v5344_v29 = vor.u32 %v7684_v24, %v5343_v23  ;;  %v7675_v31 = vld [vmem:[#allocation5 + $0xac] sm:$0xf0]  ;;  %v7671_v32 = vld [vmem:[#allocation5 + $0x94] sm:$0xf]  ;;  %v5348_v33 = vor.u32 %v7680_v25, %v5345_v26  ;;  %v5311_v35 = vld [vmem:[#allocation5 + $0x98] sm:$0xf] }
  0x68   :  { %740 = vmatpush.bf16.msrb.mxu2 %v5472_v42  ;;  %706 = vmatmul.bf16.vlgmr.msra.gmra.mxu3 %v8814_v2  ;;  %v5305_v34 = vld [vmem:[#allocation5 + $0xb0] sm:$0xf0]  ;;  %v7676_v36 = vld [vmem:[#allocation5 + $0xb4] sm:$0xf0]  ;;  %v7672_v37 = vld [vmem:[#allocation5 + $0x9c] sm:$0xf]  ;;  %v5304_v39 = vor.u32 %v7675_v31, %v5303_v30 }
  0x69   :  { %754 = vmatpush.bf16.msrb.mxu3 %v5476_v46  ;;  %692 = vmatmul.bf16.vlgmr.msra.gmra.mxu2 %v8814_v2  ;;  %v5313_v38 = vld [vmem:[#allocation5 + $0xb8] sm:$0xf0]  ;;  %v5308_v40 = vor.u32 %v7671_v32, %v5305_v34  ;;  %v5312_v41 = vor.u32 %v7676_v36, %v5311_v35  ;;  %v5271_v42 = vld [vmem:[#allocation5 + $0x50] sm:$0xf]  ;;  %v7663_v44 = vld [vmem:[#allocation5 + $0x54] sm:$0xf] }
  0x6a   :  { %v7667_v43 = vld [vmem:[#allocation5 + $0x6c] sm:$0xf0]  ;;  %v5316_v45 = vor.u32 %v7672_v37, %v5313_v38  ;;  %v5273_v46 = vld [vmem:[#allocation5 + $0x70] sm:$0xf0]  ;;  %v5279_v47 = vld [vmem:[#allocation5 + $0x58] sm:$0xf] }
  0x6b   :  { %713 = vmatpush.bf16.msrb.mxu0 %v5432_v52  ;;  %727 = vmatpush.bf16.msrb.mxu1 %v5436_v55  ;;  %v7668_v48 = vld [vmem:[#allocation5 + $0x74] sm:$0xf0]  ;;  %v7664_v49 = vld [vmem:[#allocation5 + $0x5c] sm:$0xf]  ;;  %v5272_v51 = vor.u32 %v7667_v43, %v5271_v42  ;;  %v5239_v52 = vld [vmem:[#allocation5 + $0x10] sm:$0xf]  ;;  %v5276_v54 = vor.u32 %v7663_v44, %v5273_v46 }
  0x6c   :  { %741 = vmatpush.bf16.msrb.mxu2 %v5440_v56  ;;  %v5281_v50 = vld [vmem:[#allocation5 + $0x78] sm:$0xf0]  ;;  %v7659_v53 = vld [vmem:[#allocation5 + $0x2c] sm:$0xf0]  ;;  %v5280_v55 = vor.u32 %v7668_v48, %v5279_v47  ;;  %v7655_v56 = vld [vmem:[#allocation5 + $0x14] sm:$0xf] }
  0x6d   :  { %755 = vmatpush.bf16.msrb.mxu3 %v5444_v60  ;;  %v5241_v57 = vld [vmem:[#allocation5 + $0x30] sm:$0xf0]  ;;  %v5247_v58 = vld [vmem:[#allocation5 + $0x18] sm:$0xf]  ;;  %v5284_v59 = vor.u32 %v7664_v49, %v5281_v50  ;;  %v7656_v61 = vld [vmem:[#allocation5 + $0x1c] sm:$0xf] }
  0x6e   :  { %v7660_v60 = vld [vmem:[#allocation5 + $0x34] sm:$0xf0]  ;;  %v5249_v62 = vld [vmem:[#allocation5 + $0x38] sm:$0xf0]  ;;  %v5703_v63 = vld [vmem:[#allocation17 + $0x1c0] sm:$0xf]  ;;  %v5244_v7 = vor.u32 %v7655_v56, %v5241_v57 }
  0x6f   :  { %714 = vmatpush.bf16.msrb.mxu0 %v5400_v3  ;;  %728 = vmatpush.bf16.msrb.mxu1 %v5404_v4  ;;  %v7777_v0 = vld [vmem:[#allocation17 + $0x1dc] sm:$0xf0]  ;;  %v7773_v1 = vld [vmem:[#allocation17 + $0x1c4] sm:$0xf]  ;;  %v5240_v3 = vor.u32 %v7659_v53, %v5239_v52  ;;  %v7778_v6 = vld [vmem:[#allocation17 + $0x1e4] sm:$0xf0]  ;;  %v5248_v8 = vor.u32 %v7660_v60, %v5247_v58  ;;  %v5252_v11 = vor.u32 %v7656_v61, %v5249_v62 }
  0x70   :  { %742 = vmatpush.bf16.msrb.mxu2 %v5408_v5  ;;  %v5705_v4 = vld [vmem:[#allocation17 + $0x1e0] sm:$0xf0]  ;;  %v5711_v5 = vld [vmem:[#allocation17 + $0x1c8] sm:$0xf]  ;;  %v5713_v10 = vld [vmem:[#allocation17 + $0x1e8] sm:$0xf0]  ;;  %v5704_v12 = vor.u32 %v7777_v0, %v5703_v63 }
  0x71   :  { %756 = vmatpush.bf16.msrb.mxu3 %v5412_v9  ;;  %v7774_v9 = vld [vmem:[#allocation17 + $0x1cc] sm:$0xf]  ;;  %v5708_v13 = vor.u32 %v7773_v1, %v5705_v4  ;;  %v5712_v14 = vor.u32 %v7778_v6, %v5711_v5  ;;  %v5673_v19 = vld [vmem:[#allocation17 + $0x1a0] sm:$0xf0]  ;;  %v5679_v20 = vld [vmem:[#allocation17 + $0x188] sm:$0xf] }
  0x72   :  { %v5716_v18 = vor.u32 %v7774_v9, %v5713_v10  ;;  %v7766_v22 = vld [vmem:[#allocation17 + $0x18c] sm:$0xf]  ;;  %v5641_v31 = vld [vmem:[#allocation17 + $0x160] sm:$0xf0]  ;;  %v5647_v32 = vld [vmem:[#allocation17 + $0x148] sm:$0xf] }
  0x73   :  { %715 = vmatpush.bf16.msrb.mxu0 %v5368_v15  ;;  %729 = vmatpush.bf16.msrb.mxu1 %v5372_v16  ;;  %v5671_v15 = vld [vmem:[#allocation17 + $0x180] sm:$0xf]  ;;  %v5681_v23 = vld [vmem:[#allocation17 + $0x1a8] sm:$0xf0]  ;;  %v5609_v43 = vld [vmem:[#allocation17 + $0x120] sm:$0xf0] }
  0x74   :  { %743 = vmatpush.bf16.msrb.mxu2 %v5376_v17  ;;  %v7769_v16 = vld [vmem:[#allocation17 + $0x19c] sm:$0xf0]  ;;  %v7765_v17 = vld [vmem:[#allocation17 + $0x184] sm:$0xf]  ;;  %v5684_v30 = vor.u32 %v7766_v22, %v5681_v23  ;;  %v7758_v34 = vld [vmem:[#allocation17 + $0x14c] sm:$0xf] }
  0x75   :  { %757 = vmatpush.bf16.msrb.mxu3 %v5380_v21  ;;  %v7770_v21 = vld [vmem:[#allocation17 + $0x1a4] sm:$0xf0]  ;;  %v5672_v24 = vor.u32 %v7769_v16, %v5671_v15  ;;  %v5676_v25 = vor.u32 %v7765_v17, %v5673_v19  ;;  %v5649_v35 = vld [vmem:[#allocation17 + $0x168] sm:$0xf0]  ;;  %v7745_v52 = vld [vmem:[#allocation17 + $0xdc] sm:$0xf0] }
  0x76   :  { %v5680_v26 = vor.u32 %v7770_v21, %v5679_v20  ;;  %v5652_v42 = vor.u32 %v7758_v34, %v5649_v35  ;;  %v5615_v44 = vld [vmem:[#allocation17 + $0x108] sm:$0xf]  ;;  %v7750_v46 = vld [vmem:[#allocation17 + $0x10c] sm:$0xf]  ;;  %v7741_v53 = vld [vmem:[#allocation17 + $0xc4] sm:$0xf] }
  0x77   :  { %716 = vmatpush.bf16.msrb.mxu0 %v5336_v27  ;;  %730 = vmatpush.bf16.msrb.mxu1 %v5340_v28  ;;  %v5639_v27 = vld [vmem:[#allocation17 + $0x140] sm:$0xf]  ;;  %v5617_v47 = vld [vmem:[#allocation17 + $0x128] sm:$0xf0]  ;;  %v5583_v56 = vld [vmem:[#allocation17 + $0xc8] sm:$0xf] }
  0x78   :  { %744 = vmatpush.bf16.msrb.mxu2 %v5344_v29  ;;  %v7761_v28 = vld [vmem:[#allocation17 + $0x15c] sm:$0xf0]  ;;  %v7757_v29 = vld [vmem:[#allocation17 + $0x144] sm:$0xf]  ;;  %v7746_v57 = vld [vmem:[#allocation17 + $0xe4] sm:$0xf0] }
  0x79   :  { %758 = vmatpush.bf16.msrb.mxu3 %v5348_v33  ;;  %v7762_v33 = vld [vmem:[#allocation17 + $0x164] sm:$0xf0]  ;;  %v5640_v36 = vor.u32 %v7761_v28, %v5639_v27  ;;  %v5644_v37 = vor.u32 %v7757_v29, %v5641_v31  ;;  %v7742_v58 = vld [vmem:[#allocation17 + $0xcc] sm:$0xf]  ;;  %v5543_v61 = vld [vmem:[#allocation17 + $0x80] sm:$0xf]  ;;  %v5584_v0 = vor.u32 %v7746_v57, %v5583_v56 }
  0x7a   :  { %v5648_v38 = vor.u32 %v7762_v33, %v5647_v32  ;;  %v7737_v62 = vld [vmem:[#allocation17 + $0x9c] sm:$0xf0]  ;;  %v7733_v1 = vld [vmem:[#allocation17 + $0x84] sm:$0xf]  ;;  %v5551_v4 = vld [vmem:[#allocation17 + $0x88] sm:$0xf] }
  0x7b   :  { %717 = vmatpush.bf16.msrb.mxu0 %v5304_v39  ;;  %731 = vmatpush.bf16.msrb.mxu1 %v5308_v40  ;;  %v5607_v39 = vld [vmem:[#allocation17 + $0x100] sm:$0xf]  ;;  %v7738_v6 = vld [vmem:[#allocation17 + $0xa4] sm:$0xf0]  ;;  %v5544_v9 = vor.u32 %v7737_v62, %v5543_v61  ;;  %v5513_v16 = vld [vmem:[#allocation17 + $0x60] sm:$0xf0] }
  0x7c   :  { %745 = vmatpush.bf16.msrb.mxu2 %v5312_v41  ;;  %v7753_v40 = vld [vmem:[#allocation17 + $0x11c] sm:$0xf0]  ;;  %v7749_v41 = vld [vmem:[#allocation17 + $0x104] sm:$0xf]  ;;  %v5519_v17 = vld [vmem:[#allocation17 + $0x48] sm:$0xf] }
  0x7d   :  { %759 = vmatpush.bf16.msrb.mxu3 %v5316_v45  ;;  %v7754_v45 = vld [vmem:[#allocation17 + $0x124] sm:$0xf0]  ;;  %v5608_v48 = vor.u32 %v7753_v40, %v5607_v39  ;;  %v5612_v49 = vor.u32 %v7749_v41, %v5609_v43  ;;  %v7726_v19 = vld [vmem:[#allocation17 + $0x4c] sm:$0xf]  ;;  %v5479_v22 = vld [vmem:[#allocation17] sm:$0xf] }
  0x7e   :  { %v5616_v50 = vor.u32 %v7754_v45, %v5615_v44  ;;  %v5521_v20 = vld [vmem:[#allocation17 + $0x68] sm:$0xf0]  ;;  %v7721_v23 = vld [vmem:[#allocation17 + $0x1c] sm:$0xf0]  ;;  %v5481_v27 = vld [vmem:[#allocation17 + $0x20] sm:$0xf0] }
  0x7f   :  { %718 = vmatpush.bf16.msrb.mxu0 %v5272_v51  ;;  %732 = vmatpush.bf16.msrb.mxu1 %v5276_v54  ;;  %v5575_v51 = vld [vmem:[#allocation17 + $0xc0] sm:$0xf]  ;;  %v5620_v54 = vor.u32 %v7750_v46, %v5617_v47  ;;  %v5487_v28 = vld [vmem:[#allocation17 + $0x8] sm:$0xf]  ;;  %v5524_v29 = vor.u32 %v7726_v19, %v5521_v20  ;;  %v7718_v31 = vld [vmem:[#allocation17 + $0xc] sm:$0xf] }
  0x80   :  { %746 = vmatpush.bf16.msrb.mxu2 %v5280_v55  ;;  %v5577_v55 = vld [vmem:[#allocation17 + $0xe0] sm:$0xf0]  ;;  %v5576_v60 = vor.u32 %v7745_v52, %v5575_v51  ;;  %v5489_v32 = vld [vmem:[#allocation17 + $0x28] sm:$0xf0]  ;;  %v5719_v33 = vld [vmem:[#allocation17 + $0x1d0] sm:$0xf] }
  0x81   :  { %760 = vmatpush.bf16.msrb.mxu3 %v5284_v59  ;;  %v5585_v59 = vld [vmem:[#allocation17 + $0xe8] sm:$0xf0]  ;;  %v5580_v63 = vor.u32 %v7741_v53, %v5577_v55  ;;  %v7779_v34 = vld [vmem:[#allocation17 + $0x1ec] sm:$0xf0]  ;;  %v7775_v35 = vld [vmem:[#allocation17 + $0x1d4] sm:$0xf]  ;;  %v5492_v44 = vor.u32 %v7718_v31, %v5489_v32 }
  0x82   :  { %v5588_v5 = vor.u32 %v7742_v58, %v5585_v59  ;;  %v7780_v39 = vld [vmem:[#allocation17 + $0x1f4] sm:$0xf0]  ;;  %v5729_v43 = vld [vmem:[#allocation17 + $0x1f8] sm:$0xf0]  ;;  %v5720_v45 = vor.u32 %v7779_v34, %v5719_v33  ;;  %v5689_v52 = vld [vmem:[#allocation17 + $0x1b0] sm:$0xf0] }
  0x83   :  { %719 = vmatpush.bf16.msrb.mxu0 %v5240_v3  ;;  %733 = vmatpush.bf16.msrb.mxu1 %v5244_v7  ;;  %v5545_v3 = vld [vmem:[#allocation17 + $0xa0] sm:$0xf0]  ;;  %v7734_v7 = vld [vmem:[#allocation17 + $0x8c] sm:$0xf]  ;;  %v5695_v53 = vld [vmem:[#allocation17 + $0x198] sm:$0xf] }
  0x84   :  { %747 = vmatpush.bf16.msrb.mxu2 %v5248_v8  ;;  %v5553_v8 = vld [vmem:[#allocation17 + $0xa8] sm:$0xf0]  ;;  %v5548_v10 = vor.u32 %v7733_v1, %v5545_v3  ;;  %v7768_v55 = vld [vmem:[#allocation17 + $0x19c] sm:$0xf]  ;;  %v7763_v61 = vld [vmem:[#allocation17 + $0x16c] sm:$0xf0] }
  0x85   :  { %761 = vmatpush.bf16.msrb.mxu3 %v5252_v11  ;;  %v5552_v11 = vor.u32 %v7738_v6, %v5551_v4  ;;  %v5556_v15 = vor.u32 %v7734_v7, %v5553_v8  ;;  %v5697_v56 = vld [vmem:[#allocation17 + $0x1b8] sm:$0xf0]  ;;  %v7759_v62 = vld [vmem:[#allocation17 + $0x154] sm:$0xf]  ;;  %v5663_v1 = vld [vmem:[#allocation17 + $0x158] sm:$0xf] }
  0x86   :  { %720 = vmatmul.bf16.vlgmr.msrb.gmra.mxu0 %v8814_v2  ;;  %734 = vmatmul.bf16.vlgmr.msrb.gmra.mxu1 %v8814_v2  ;;  %v7764_v3 = vld [vmem:[#allocation17 + $0x174] sm:$0xf0]  ;;  %v7760_v4 = vld [vmem:[#allocation17 + $0x15c] sm:$0xf]  ;;  %v5559_v33 = vld [vmem:[#allocation17 + $0x90] sm:$0xf] }
  0x87   :  { %1186 = vmatpush.bf16.msra.mxu0 %v5704_v12  ;;  %1200 = vmatpush.bf16.msra.mxu1 %v5708_v13  ;;  %v5511_v12 = vld [vmem:[#allocation17 + $0x40] sm:$0xf]  ;;  %v5664_v8 = vor.u32 %v7764_v3, %v5663_v1  ;;  %v7739_v34 = vld [vmem:[#allocation17 + $0xac] sm:$0xf0]  ;;  %v5505_v1 = vld [vmem:[#allocation17 + $0x38] sm:$0xf0] }
  0x88   :  { %1214 = vmatpush.bf16.msra.mxu2 %v5712_v14  ;;  %762 = vmatmul.bf16.vlgmr.msrb.gmra.mxu3 %v8814_v2  ;;  %v7729_v13 = vld [vmem:[#allocation17 + $0x5c] sm:$0xf0]  ;;  %v7725_v14 = vld [vmem:[#allocation17 + $0x44] sm:$0xf]  ;;  %v5847_v3 = vld [vmem:[#allocation8 + $0xe0] sm:$0xf] }
  0x89   :  { %1228 = vmatpush.bf16.msra.mxu3 %v5716_v18  ;;  %748 = vmatmul.bf16.vlgmr.msrb.gmra.mxu2 %v8814_v2  ;;  %v7730_v18 = vld [vmem:[#allocation17 + $0x64] sm:$0xf0]  ;;  %v5512_v21 = vor.u32 %v7729_v13, %v5511_v12  ;;  %v5625_v13 = vld [vmem:[#allocation17 + $0x130] sm:$0xf0]  ;;  %s9194_s22 = sld [smem:[#allocation34_spill]] }
  0x8b   :  { %1187 = vmatpush.bf16.msra.mxu0 %v5672_v24  ;;  %1201 = vmatpush.bf16.msra.mxu1 %v5676_v25  ;;  %v5516_v24 = vor.u32 %v7725_v14, %v5513_v16  ;;  %v5520_v25 = vor.u32 %v7730_v18, %v5519_v17  ;;  %v5631_v14 = vld [vmem:[#allocation17 + $0x118] sm:$0xf]  ;;  %v7752_v16 = vld [vmem:[#allocation17 + $0x11c] sm:$0xf] }
  0x8c   :  { %1215 = vmatpush.bf16.msra.mxu2 %v5680_v26  ;;  %v7717_v26 = vld [vmem:[#allocation17 + $0x4] sm:$0xf]  ;;  %v5633_v17 = vld [vmem:[#allocation17 + $0x138] sm:$0xf0] }
  0x8d   :  { %1229 = vmatpush.bf16.msra.mxu3 %v5684_v30  ;;  %v7722_v30 = vld [vmem:[#allocation17 + $0x24] sm:$0xf0]  ;;  %v5484_v40 = vor.u32 %v7717_v26, %v5481_v27  ;;  %v5599_v26 = vld [vmem:[#allocation17 + $0xd8] sm:$0xf] }
  0x8e   :  { %v5488_v41 = vor.u32 %v7722_v30, %v5487_v28  ;;  %v7748_v27 = vld [vmem:[#allocation17 + $0xf4] sm:$0xf0]  ;;  %v7744_v28 = vld [vmem:[#allocation17 + $0xdc] sm:$0xf] }
  0x8f   :  { %1188 = vmatpush.bf16.msra.mxu0 %v5640_v36  ;;  %1202 = vmatpush.bf16.msra.mxu1 %v5644_v37  ;;  %v5480_v36 = vor.u32 %v7721_v23, %v5479_v22  ;;  %v5721_v37 = vld [vmem:[#allocation17 + $0x1f0] sm:$0xf0]  ;;  %v7747_v22 = vld [vmem:[#allocation17 + $0xec] sm:$0xf0]  ;;  %v5600_v32 = vor.u32 %v7748_v27, %v5599_v26  ;;  %v7803_v26 = vld [vmem:[#allocation8 + $0xac] sm:$0xf0] }
  0x90   :  { %1216 = vmatpush.bf16.msra.mxu2 %v5648_v38  ;;  %v5727_v38 = vld [vmem:[#allocation17 + $0x1d8] sm:$0xf]  ;;  %v5724_v46 = vor.u32 %v7775_v35, %v5721_v37  ;;  %v7743_v23 = vld [vmem:[#allocation17 + $0xd4] sm:$0xf]  ;;  %s5202_s9 = sshll.u32 %s9194_s22, 4  ;;  %s5203_s9 = int_to_ptr.hbm [resolvable:$true] %s5202_s9 }
  0x91   :  { %1230 = vmatpush.bf16.msra.mxu3 %v5652_v42  ;;  %v7776_v42 = vld [vmem:[#allocation17 + $0x1dc] sm:$0xf]  ;;  %v5728_v47 = vor.u32 %v7780_v39, %v5727_v38  ;;  %v7735_v35 = vld [vmem:[#allocation17 + $0x94] sm:$0xf]  ;;  %v5567_v38 = vld [vmem:[#allocation17 + $0x98] sm:$0xf] }
  0x92   :  { %v5732_v51 = vor.u32 %v7776_v42, %v5729_v43  ;;  %v5561_v37 = vld [vmem:[#allocation17 + $0xb0] sm:$0xf0]  ;;  %v7740_v39 = vld [vmem:[#allocation17 + $0xb4] sm:$0xf0]  ;;  %v5560_v42 = vor.u32 %v7739_v34, %v5559_v33 }
  0x93   :  { %1189 = vmatpush.bf16.msra.mxu0 %v5608_v48  ;;  %1203 = vmatpush.bf16.msra.mxu1 %v5612_v49  ;;  %v5687_v48 = vld [vmem:[#allocation17 + $0x190] sm:$0xf]  ;;  %v5564_v43 = vor.u32 %v7735_v35, %v5561_v37  ;;  %v5943_v27 = vld [vmem:[#allocation8 + $0x1a0] sm:$0xf]  ;;  %v7903_v35 = vld [vmem:[#allocation8 + $0x3cc] sm:$0xf0] }
  0x94   :  { %1217 = vmatpush.bf16.msra.mxu2 %v5616_v50  ;;  %v7771_v49 = vld [vmem:[#allocation17 + $0x1ac] sm:$0xf0]  ;;  %v7767_v50 = vld [vmem:[#allocation17 + $0x194] sm:$0xf]  ;;  %v6215_v33 = vld [vmem:[#allocation8 + $0x3c0] sm:$0xf] }
  0x95   :  { %1231 = vmatpush.bf16.msra.mxu3 %v5620_v54  ;;  %v7772_v54 = vld [vmem:[#allocation17 + $0x1b4] sm:$0xf0]  ;;  %v5688_v57 = vor.u32 %v7771_v49, %v5687_v48  ;;  %v5692_v58 = vor.u32 %v7767_v50, %v5689_v52  ;;  %v5529_v49 = vld [vmem:[#allocation17 + $0x70] sm:$0xf0]  ;;  %v7728_v52 = vld [vmem:[#allocation17 + $0x5c] sm:$0xf] }
  0x96   :  { %v5696_v59 = vor.u32 %v7772_v54, %v5695_v53  ;;  %v5535_v50 = vld [vmem:[#allocation17 + $0x58] sm:$0xf]  ;;  %v5537_v53 = vld [vmem:[#allocation17 + $0x78] sm:$0xf0]  ;;  %v7799_v37 = vld [vmem:[#allocation8 + $0x8c] sm:$0xf0] }
  0x97   :  { %1190 = vmatpush.bf16.msra.mxu0 %v5576_v60  ;;  %1204 = vmatpush.bf16.msra.mxu1 %v5580_v63  ;;  %v5655_v60 = vld [vmem:[#allocation17 + $0x150] sm:$0xf]  ;;  %v5700_v63 = vor.u32 %v7768_v55, %v5697_v56 }
  0x98   :  { %1218 = vmatpush.bf16.msra.mxu2 %v5584_v0  ;;  %v5657_v0 = vld [vmem:[#allocation17 + $0x170] sm:$0xf0]  ;;  %v5656_v6 = vor.u32 %v7763_v61, %v5655_v60  ;;  %v5495_v55 = vld [vmem:[#allocation17 + $0x10] sm:$0xf]  ;;  %v5540_v61 = vor.u32 %v7728_v52, %v5537_v53  ;;  %v7827_v52 = vld [vmem:[#allocation8 + $0x16c] sm:$0xf0] }
  0x99   :  { %1232 = vmatpush.bf16.msra.mxu3 %v5588_v5  ;;  %v5665_v5 = vld [vmem:[#allocation17 + $0x178] sm:$0xf0]  ;;  %v5660_v7 = vor.u32 %v7759_v62, %v5657_v0  ;;  %v5497_v60 = vld [vmem:[#allocation17 + $0x30] sm:$0xf0]  ;;  %v5503_v62 = vld [vmem:[#allocation17 + $0x18] sm:$0xf] }
  0x9a   :  { %v5668_v12 = vor.u32 %v7760_v4, %v5665_v5  ;;  %v7720_v0 = vld [vmem:[#allocation17 + $0x1c] sm:$0xf]  ;;  %v7811_v4 = vld [vmem:[#allocation8 + $0xec] sm:$0xf0]  ;;  %v6055_v53 = vld [vmem:[#allocation8 + $0x280] sm:$0xf] }
  0x9b   :  { %1191 = vmatpush.bf16.msra.mxu0 %v5544_v9  ;;  %1205 = vmatpush.bf16.msra.mxu1 %v5548_v10  ;;  %v5623_v9 = vld [vmem:[#allocation17 + $0x110] sm:$0xf] }
  0x9c   :  { %1219 = vmatpush.bf16.msra.mxu2 %v5552_v11  ;;  %v7755_v10 = vld [vmem:[#allocation17 + $0x12c] sm:$0xf0]  ;;  %v7751_v11 = vld [vmem:[#allocation17 + $0x114] sm:$0xf] }
  0x9d   :  { %1233 = vmatpush.bf16.msra.mxu3 %v5556_v15  ;;  %v7756_v15 = vld [vmem:[#allocation17 + $0x134] sm:$0xf0]  ;;  %v5624_v18 = vor.u32 %v7755_v10, %v5623_v9  ;;  %v5628_v19 = vor.u32 %v7751_v11, %v5625_v13  ;;  %v5508_v10 = vor.u32 %v7720_v0, %v5505_v1  ;;  %v5848_v11 = vor.u32 %v7811_v4, %v5847_v3  ;;  %v7859_v4 = vld [vmem:[#allocation8 + $0x26c] sm:$0xf0] }
  0x9e   :  { %v5632_v20 = vor.u32 %v7756_v15, %v5631_v14  ;;  %v6103_v13 = vld [vmem:[#allocation8 + $0x2e0] sm:$0xf]  ;;  %v7875_v14 = vld [vmem:[#allocation8 + $0x2ec] sm:$0xf0] }
  0x9f   :  { %1192 = vmatpush.bf16.msra.mxu0 %v5512_v21  ;;  %1206 = vmatpush.bf16.msra.mxu1 %v5516_v24  ;;  %v5591_v21 = vld [vmem:[#allocation17 + $0xd0] sm:$0xf]  ;;  %v5636_v24 = vor.u32 %v7752_v16, %v5633_v17  ;;  %v7807_v16 = vld [vmem:[#allocation8 + $0xcc] sm:$0xf0]  ;;  %v6231_v17 = vld [vmem:[#allocation8 + $0x3e0] sm:$0xf] }
  0xa0   :  { %1220 = vmatpush.bf16.msra.mxu2 %v5520_v25  ;;  %v5593_v25 = vld [vmem:[#allocation17 + $0xf0] sm:$0xf0]  ;;  %v5592_v30 = vor.u32 %v7747_v22, %v5591_v21  ;;  %v6104_v21 = vor.u32 %v7875_v14, %v6103_v13  ;;  %v6039_v3 = vld [vmem:[#allocation8 + $0x260] sm:$0xf]  ;;  %v7819_v13 = vld [vmem:[#allocation8 + $0x12c] sm:$0xf0] }
  0xa1   :  { %1234 = vmatpush.bf16.msra.mxu3 %v5524_v29  ;;  %v5601_v29 = vld [vmem:[#allocation17 + $0xf8] sm:$0xf0]  ;;  %v5596_v31 = vor.u32 %v7743_v23, %v5593_v25  ;;  %v5815_v25 = vld [vmem:[#allocation8 + $0xa0] sm:$0xf] }
  0xa3   :  { %1193 = vmatpush.bf16.msra.mxu0 %v5480_v36  ;;  %1207 = vmatpush.bf16.msra.mxu1 %v5484_v40  ;;  %v5604_v36 = vor.u32 %v7744_v28, %v5601_v29  ;;  %v7736_v40 = vld [vmem:[#allocation17 + $0x9c] sm:$0xf]  ;;  %v5816_v28 = vor.u32 %v7803_v26, %v5815_v25  ;;  %v7835_v29 = vld [vmem:[#allocation8 + $0x1ac] sm:$0xf0] }
  0xa4   :  { %1221 = vmatpush.bf16.msra.mxu2 %v5488_v41  ;;  %v5569_v41 = vld [vmem:[#allocation17 + $0xb8] sm:$0xf0] }
  0xa5   :  { %1235 = vmatpush.bf16.msra.mxu3 %v5492_v44  ;;  %v5568_v44 = vor.u32 %v7740_v39, %v5567_v38  ;;  %v5572_v48 = vor.u32 %v7736_v40, %v5569_v41  ;;  %v5927_v39 = vld [vmem:[#allocation8 + $0x180] sm:$0xf]  ;;  %v7831_v40 = vld [vmem:[#allocation8 + $0x18c] sm:$0xf0] }
  0xa6   :  { %1194 = vmatmul.bf16.vlgmr.msra.gmra.mxu0 %v8814_v2  ;;  %1208 = vmatmul.bf16.vlgmr.msra.gmra.mxu1 %v8814_v2  ;;  %v6071_v41 = vld [vmem:[#allocation8 + $0x2a0] sm:$0xf] }
  0xa7   :  { %1242 = vmatpush.bf16.msrb.mxu0 %v5720_v45  ;;  %1256 = vmatpush.bf16.msrb.mxu1 %v5724_v46  ;;  %v5527_v45 = vld [vmem:[#allocation17 + $0x50] sm:$0xf] }
  0xa8   :  { %1270 = vmatpush.bf16.msrb.mxu2 %v5728_v47  ;;  %1236 = vmatmul.bf16.vlgmr.msra.gmra.mxu3 %v8814_v2  ;;  %v7731_v46 = vld [vmem:[#allocation17 + $0x6c] sm:$0xf0]  ;;  %v7727_v47 = vld [vmem:[#allocation17 + $0x54] sm:$0xf] }
  0xa9   :  { %1284 = vmatpush.bf16.msrb.mxu3 %v5732_v51  ;;  %1222 = vmatmul.bf16.vlgmr.msra.gmra.mxu2 %v8814_v2  ;;  %v7732_v51 = vld [vmem:[#allocation17 + $0x74] sm:$0xf0]  ;;  %v5528_v54 = vor.u32 %v7731_v46, %v5527_v45  ;;  %v5532_v56 = vor.u32 %v7727_v47, %v5529_v49  ;;  %v7899_v45 = vld [vmem:[#allocation8 + $0x3ac] sm:$0xf0] }
  0xaa   :  { %v7795_v49 = vld [vmem:[#allocation8 + $0x6c] sm:$0xf0] }
  0xab   :  { %1243 = vmatpush.bf16.msrb.mxu0 %v5688_v57  ;;  %1257 = vmatpush.bf16.msrb.mxu1 %v5692_v58  ;;  %v5536_v57 = vor.u32 %v7732_v51, %v5535_v50  ;;  %v7723_v58 = vld [vmem:[#allocation17 + $0x2c] sm:$0xf0]  ;;  %v5911_v50 = vld [vmem:[#allocation8 + $0x160] sm:$0xf] }
  0xac   :  { %1271 = vmatpush.bf16.msrb.mxu2 %v5696_v59  ;;  %v7719_v59 = vld [vmem:[#allocation17 + $0x14] sm:$0xf]  ;;  %v5496_v5 = vor.u32 %v7723_v58, %v5495_v55  ;;  %v5912_v55 = vor.u32 %v7827_v52, %v5911_v50  ;;  %v7895_v58 = vld [vmem:[#allocation8 + $0x38c] sm:$0xf0] }
  0xad   :  { %1285 = vmatpush.bf16.msrb.mxu3 %v5700_v63  ;;  %v7724_v63 = vld [vmem:[#allocation17 + $0x34] sm:$0xf0]  ;;  %v8003_v50 = vld [vmem:[#allocation8 + $0x6ec] sm:$0xf0] }
  0xae   :  { %v5504_v9 = vor.u32 %v7724_v63, %v5503_v62  ;;  %v5895_v62 = vld [vmem:[#allocation8 + $0x140] sm:$0xf]  ;;  %v7823_v63 = vld [vmem:[#allocation8 + $0x14c] sm:$0xf0] }
  0xaf   :  { %1244 = vmatpush.bf16.msrb.mxu0 %v5656_v6  ;;  %1258 = vmatpush.bf16.msrb.mxu1 %v5660_v7  ;;  %v5975_v6 = vld [vmem:[#allocation8 + $0x1e0] sm:$0xf]  ;;  %v7843_v7 = vld [vmem:[#allocation8 + $0x1ec] sm:$0xf0]  ;;  %v5896_v1 = vor.u32 %v7823_v63, %v5895_v62 }
  0xb0   :  { %1272 = vmatpush.bf16.msrb.mxu2 %v5664_v8  ;;  %v5500_v8 = vor.u32 %v7719_v59, %v5497_v60  ;;  %v5976_v15 = vor.u32 %v7843_v7, %v5975_v6  ;;  %v5767_v59 = vld [vmem:[#allocation8 + $0x40] sm:$0xf]  ;;  %v6040_v6 = vor.u32 %v7859_v4, %v6039_v3  ;;  %v7891_v7 = vld [vmem:[#allocation8 + $0x36c] sm:$0xf0] }
  0xb1   :  { %1286 = vmatpush.bf16.msrb.mxu3 %v5668_v12  ;;  %v5831_v12 = vld [vmem:[#allocation8 + $0xc0] sm:$0xf]  ;;  %v7963_v62 = vld [vmem:[#allocation8 + $0x5ac] sm:$0xf0] }
  0xb2   :  { %v5832_v22 = vor.u32 %v7807_v16, %v5831_v12  ;;  %v7855_v16 = vld [vmem:[#allocation8 + $0x24c] sm:$0xf0]  ;;  %v6599_v63 = vld [vmem:[#allocation8 + $0x6c0] sm:$0xf] }
  0xb3   :  { %1245 = vmatpush.bf16.msrb.mxu0 %v5624_v18  ;;  %1259 = vmatpush.bf16.msrb.mxu1 %v5628_v19  ;;  %v7907_v18 = vld [vmem:[#allocation8 + $0x3ec] sm:$0xf0]  ;;  %v5959_v19 = vld [vmem:[#allocation8 + $0x1c0] sm:$0xf] }
  0xb4   :  { %1273 = vmatpush.bf16.msrb.mxu2 %v5632_v20  ;;  %v7839_v20 = vld [vmem:[#allocation8 + $0x1cc] sm:$0xf0]  ;;  %v6232_v23 = vor.u32 %v7907_v18, %v6231_v17  ;;  %v6151_v18 = vld [vmem:[#allocation8 + $0x340] sm:$0xf] }
  0xb5   :  { %1287 = vmatpush.bf16.msrb.mxu3 %v5636_v24  ;;  %v5960_v24 = vor.u32 %v7839_v20, %v5959_v19  ;;  %v7887_v19 = vld [vmem:[#allocation8 + $0x34c] sm:$0xf0]  ;;  %v5735_v20 = vld [vmem:[#allocation8] sm:$0xf] }
  0xb6   :  { %v6727_v3 = vld [vmem:[#allocation8 + $0x7c0] sm:$0xf]  ;;  %v8031_v4 = vld [vmem:[#allocation8 + $0x7cc] sm:$0xf0] }
  0xb7   :  { %1246 = vmatpush.bf16.msrb.mxu0 %v5592_v30  ;;  %1260 = vmatpush.bf16.msrb.mxu1 %v5596_v31  ;;  %v5944_v30 = vor.u32 %v7835_v29, %v5943_v27  ;;  %v6087_v31 = vld [vmem:[#allocation8 + $0x2c0] sm:$0xf] }
  0xb8   :  { %1274 = vmatpush.bf16.msrb.mxu2 %v5600_v32  ;;  %v7871_v32 = vld [vmem:[#allocation8 + $0x2cc] sm:$0xf0]  ;;  %v6359_v27 = vld [vmem:[#allocation8 + $0x4e0] sm:$0xf] }
  0xb9   :  { %1288 = vmatpush.bf16.msrb.mxu3 %v5604_v36  ;;  %v6088_v34 = vor.u32 %v7871_v32, %v6087_v31  ;;  %v5799_v36 = vld [vmem:[#allocation8 + $0x80] sm:$0xf]  ;;  %v7971_v31 = vld [vmem:[#allocation8 + $0x5ec] sm:$0xf0] }
  0xba   :  { %v5800_v38 = vor.u32 %v7799_v37, %v5799_v36  ;;  %v6487_v29 = vld [vmem:[#allocation8 + $0x5e0] sm:$0xf]  ;;  %v7883_v37 = vld [vmem:[#allocation8 + $0x32c] sm:$0xf0] }
  0xbb   :  { %1247 = vmatpush.bf16.msrb.mxu0 %v5560_v42  ;;  %1261 = vmatpush.bf16.msrb.mxu1 %v5564_v43  ;;  %v5928_v42 = vor.u32 %v7831_v40, %v5927_v39  ;;  %v7867_v43 = vld [vmem:[#allocation8 + $0x2ac] sm:$0xf0]  ;;  %v6007_v32 = vld [vmem:[#allocation8 + $0x220] sm:$0xf] }
  0xbc   :  { %1275 = vmatpush.bf16.msrb.mxu2 %v5568_v44  ;;  %v6199_v44 = vld [vmem:[#allocation8 + $0x3a0] sm:$0xf]  ;;  %v6072_v46 = vor.u32 %v7867_v43, %v6071_v41  ;;  %v7935_v39 = vld [vmem:[#allocation8 + $0x4cc] sm:$0xf0] }
  0xbd   :  { %1289 = vmatpush.bf16.msrb.mxu3 %v5572_v48  ;;  %v6200_v47 = vor.u32 %v7899_v45, %v6199_v44  ;;  %v5783_v48 = vld [vmem:[#allocation8 + $0x60] sm:$0xf]  ;;  %v7847_v45 = vld [vmem:[#allocation8 + $0x20c] sm:$0xf0] }
  0xbe   :  { %v5784_v51 = vor.u32 %v7795_v49, %v5783_v48  ;;  %v6471_v41 = vld [vmem:[#allocation8 + $0x5c0] sm:$0xf]  ;;  %v7879_v48 = vld [vmem:[#allocation8 + $0x30c] sm:$0xf0] }
  0xbf   :  { %1248 = vmatpush.bf16.msrb.mxu0 %v5528_v54  ;;  %1262 = vmatpush.bf16.msrb.mxu1 %v5532_v56  ;;  %v7863_v54 = vld [vmem:[#allocation8 + $0x28c] sm:$0xf0]  ;;  %v5991_v44 = vld [vmem:[#allocation8 + $0x200] sm:$0xf] }
  0xc0   :  { %1276 = vmatpush.bf16.msrb.mxu2 %v5536_v57  ;;  %v6056_v56 = vor.u32 %v7863_v54, %v6055_v53  ;;  %v6183_v57 = vld [vmem:[#allocation8 + $0x380] sm:$0xf] }
  0xc1   :  { %1290 = vmatpush.bf16.msrb.mxu3 %v5540_v61  ;;  %v6184_v60 = vor.u32 %v7895_v58, %v6183_v57  ;;  %v7791_v61 = vld [vmem:[#allocation8 + $0x4c] sm:$0xf0]  ;;  %v6615_v49 = vld [vmem:[#allocation8 + $0x6e0] sm:$0xf] }
  0xc2   :  { %v5768_v0 = vor.u32 %v7791_v61, %v5767_v59  ;;  %v6616_v53 = vor.u32 %v8003_v50, %v6615_v49  ;;  %v6743_v54 = vld [vmem:[#allocation8 + $0x7e0] sm:$0xf]  ;;  %v7931_v59 = vld [vmem:[#allocation8 + $0x4ac] sm:$0xf0] }
  0xc3   :  { %1249 = vmatpush.bf16.msrb.mxu0 %v5496_v5  ;;  %1263 = vmatpush.bf16.msrb.mxu1 %v5500_v8  ;;  %v6167_v5 = vld [vmem:[#allocation8 + $0x360] sm:$0xf] }
  0xc4   :  { %1277 = vmatpush.bf16.msrb.mxu2 %v5504_v9  ;;  %v6168_v8 = vor.u32 %v7891_v7, %v6167_v5  ;;  %v5751_v9 = vld [vmem:[#allocation8 + $0x20] sm:$0xf] }
  0xc5   :  { %1291 = vmatpush.bf16.msrb.mxu3 %v5508_v10  ;;  %v7787_v10 = vld [vmem:[#allocation8 + $0x2c] sm:$0xf0]  ;;  %v6311_v7 = vld [vmem:[#allocation8 + $0x480] sm:$0xf] }
  0xc6   :  { %1250 = vmatmul.bf16.vlgmr.msrb.gmra.mxu0 %v8814_v2  ;;  %1264 = vmatmul.bf16.vlgmr.msrb.gmra.mxu1 %v8814_v2  ;;  %v5752_v12 = vor.u32 %v7787_v10, %v5751_v9  ;;  %v6439_v9 = vld [vmem:[#allocation8 + $0x580] sm:$0xf] }
  0xc7   :  { %2892 = vmatpush.bf16.msra.mxu0 %v5848_v11  ;;  %2906 = vmatpush.bf16.msra.mxu1 %v5976_v15  ;;  %v5879_v11 = vld [vmem:[#allocation8 + $0x120] sm:$0xf] }
  0xc8   :  { %1278 = vmatmul.bf16.vlgmr.msrb.gmra.mxu2 %v8814_v2  ;;  %1292 = vmatmul.bf16.vlgmr.msrb.gmra.mxu3 %v8814_v2  ;;  %v6216_v2 = vor.u32 %v7903_v35, %v6215_v33  ;;  %v5880_v14 = vor.u32 %v7819_v13, %v5879_v11  ;;  %v6023_v15 = vld [vmem:[#allocation8 + $0x240] sm:$0xf]  ;;  %v6488_v33 = vor.u32 %v7971_v31, %v6487_v29  ;;  %v7959_v11 = vld [vmem:[#allocation8 + $0x58c] sm:$0xf0] }
  0xc9   :  { %2920 = vmatpush.bf16.msra.mxu2 %v6104_v21  ;;  %2934 = vmatpush.bf16.msra.mxu3 %v6232_v23  ;;  %v6024_v17 = vor.u32 %v7855_v16, %v6023_v15  ;;  %v6152_v21 = vor.u32 %v7887_v19, %v6151_v18  ;;  %v5863_v23 = vld [vmem:[#allocation8 + $0x100] sm:$0xf]  ;;  %v6440_v13 = vor.u32 %v7959_v11, %v6439_v9  ;;  %v7995_v15 = vld [vmem:[#allocation8 + $0x6ac] sm:$0xf0] }
  0xca   :  { %v6135_v35 = vld [vmem:[#allocation8 + $0x320] sm:$0xf]  ;;  %v8011_v11 = vld [vmem:[#allocation8 + $0x72c] sm:$0xf0] }
  0xcb   :  { %2893 = vmatpush.bf16.msra.mxu0 %v5832_v22  ;;  %2907 = vmatpush.bf16.msra.mxu1 %v5960_v24  ;;  %v7783_v22 = vld [vmem:[#allocation8 + $0xc] sm:$0xf0]  ;;  %v6711_v19 = vld [vmem:[#allocation8 + $0x7a0] sm:$0xf] }
  0xcc   :  { %v7815_v24 = vld [vmem:[#allocation8 + $0x10c] sm:$0xf0]  ;;  %v5736_v25 = vor.u32 %v7783_v22, %v5735_v20  ;;  %v6567_v29 = vld [vmem:[#allocation8 + $0x680] sm:$0xf] }
  0xcd   :  { %2921 = vmatpush.bf16.msra.mxu2 %v6088_v34  ;;  %2935 = vmatpush.bf16.msra.mxu3 %v6216_v2  ;;  %v5864_v26 = vor.u32 %v7815_v24, %v5863_v23  ;;  %v7851_v34 = vld [vmem:[#allocation8 + $0x22c] sm:$0xf0]  ;;  %v6136_v2 = vor.u32 %v7883_v37, %v6135_v35  ;;  %v6295_v23 = vld [vmem:[#allocation8 + $0x460] sm:$0xf] }
  0xce   :  { %v6008_v36 = vor.u32 %v7851_v34, %v6007_v32  ;;  %v8027_v20 = vld [vmem:[#allocation8 + $0x7ac] sm:$0xf0]  ;;  %v6695_v31 = vld [vmem:[#allocation8 + $0x780] sm:$0xf] }
  0xcf   :  { %2894 = vmatpush.bf16.msra.mxu0 %v5816_v28  ;;  %2908 = vmatpush.bf16.msra.mxu1 %v5944_v30  ;;  %v7939_v28 = vld [vmem:[#allocation8 + $0x4ec] sm:$0xf0]  ;;  %v6712_v22 = vor.u32 %v8027_v20, %v6711_v19  ;;  %v6279_v35 = vld [vmem:[#allocation8 + $0x440] sm:$0xf] }
  0xd0   :  { %v6360_v30 = vor.u32 %v7939_v28, %v6359_v27  ;;  %v7923_v24 = vld [vmem:[#allocation8 + $0x46c] sm:$0xf0]  ;;  %v6647_v9 = vld [vmem:[#allocation8 + $0x720] sm:$0xf] }
  0xd1   :  { %2922 = vmatpush.bf16.msra.mxu2 %v6072_v46  ;;  %2936 = vmatpush.bf16.msra.mxu3 %v6200_v47  ;;  %v6119_v46 = vld [vmem:[#allocation8 + $0x300] sm:$0xf]  ;;  %v5992_v47 = vor.u32 %v7847_v45, %v5991_v44  ;;  %v7955_v27 = vld [vmem:[#allocation8 + $0x56c] sm:$0xf0] }
  0xd2   :  { %v6120_v52 = vor.u32 %v7879_v48, %v6119_v46  ;;  %v8019_v44 = vld [vmem:[#allocation8 + $0x76c] sm:$0xf0] }
  0xd3   :  { %2895 = vmatpush.bf16.msra.mxu0 %v5800_v38  ;;  %2909 = vmatpush.bf16.msra.mxu1 %v5928_v42  ;;  %v6343_v38 = vld [vmem:[#allocation8 + $0x4c0] sm:$0xf]  ;;  %v7967_v42 = vld [vmem:[#allocation8 + $0x5cc] sm:$0xf0] }
  0xd4   :  { %v6344_v40 = vor.u32 %v7935_v39, %v6343_v38  ;;  %v6472_v43 = vor.u32 %v7967_v42, %v6471_v41  ;;  %v7951_v38 = vld [vmem:[#allocation8 + $0x54c] sm:$0xf0]  ;;  %v6679_v42 = vld [vmem:[#allocation8 + $0x760] sm:$0xf] }
  0xd5   :  { %2923 = vmatpush.bf16.msra.mxu2 %v6056_v56  ;;  %2937 = vmatpush.bf16.msra.mxu3 %v6184_v60  ;;  %v6327_v56 = vld [vmem:[#allocation8 + $0x4a0] sm:$0xf]  ;;  %v7987_v41 = vld [vmem:[#allocation8 + $0x66c] sm:$0xf0]  ;;  %v6680_v46 = vor.u32 %v8019_v44, %v6679_v42 }
  0xd6   :  { %v6455_v60 = vld [vmem:[#allocation8 + $0x5a0] sm:$0xf]  ;;  %v6328_v61 = vor.u32 %v7931_v59, %v6327_v56  ;;  %v7915_v48 = vld [vmem:[#allocation8 + $0x42c] sm:$0xf0] }
  0xd7   :  { %2896 = vmatpush.bf16.msra.mxu0 %v5784_v51  ;;  %2910 = vmatpush.bf16.msra.mxu1 %v5912_v55  ;;  %v8035_v55 = vld [vmem:[#allocation8 + $0x7ec] sm:$0xf0] }
  0xd8   :  { %v6744_v58 = vor.u32 %v8035_v55, %v6743_v54  ;;  %v7947_v54 = vld [vmem:[#allocation8 + $0x52c] sm:$0xf0] }
  0xd9   :  { %2924 = vmatpush.bf16.msra.mxu2 %v6040_v6  ;;  %2938 = vmatpush.bf16.msra.mxu3 %v6168_v8  ;;  %v6728_v6 = vor.u32 %v8031_v4, %v6727_v3  ;;  %v7927_v8 = vld [vmem:[#allocation8 + $0x48c] sm:$0xf0]  ;;  %v6375_v4 = vld [vmem:[#allocation8 + $0x500] sm:$0xf] }
  0xda   :  { %v6312_v10 = vor.u32 %v7927_v8, %v6311_v7  ;;  %v7983_v59 = vld [vmem:[#allocation8 + $0x64c] sm:$0xf0]  ;;  %v6519_v7 = vld [vmem:[#allocation8 + $0x620] sm:$0xf] }
  0xdb   :  { %2897 = vmatpush.bf16.msra.mxu0 %v5768_v0  ;;  %2911 = vmatpush.bf16.msra.mxu1 %v5896_v1  ;;  %v6456_v0 = vor.u32 %v7963_v62, %v6455_v60  ;;  %v7999_v1 = vld [vmem:[#allocation8 + $0x6cc] sm:$0xf0]  ;;  %v6663_v60 = vld [vmem:[#allocation8 + $0x740] sm:$0xf] }
  0xdc   :  { %v6600_v5 = vor.u32 %v7999_v1, %v6599_v63  ;;  %v8015_v62 = vld [vmem:[#allocation8 + $0x74c] sm:$0xf0] }
  0xdd   :  { %2925 = vmatpush.bf16.msra.mxu2 %v6024_v17  ;;  %2939 = vmatpush.bf16.msra.mxu3 %v6152_v21  ;;  %v6664_v63 = vor.u32 %v8015_v62, %v6663_v60  ;;  %v7911_v1 = vld [vmem:[#allocation8 + $0x40c] sm:$0xf0] }
  0xde   :  { %v7979_v8 = vld [vmem:[#allocation8 + $0x62c] sm:$0xf0] }
  0xdf   :  { %2898 = vmatpush.bf16.msra.mxu0 %v5752_v12  ;;  %2912 = vmatpush.bf16.msra.mxu1 %v5880_v14  ;;  %v6583_v14 = vld [vmem:[#allocation8 + $0x6a0] sm:$0xf]  ;;  %v7975_v20 = vld [vmem:[#allocation8 + $0x60c] sm:$0xf0] }
  0xe0   :  { %v6584_v18 = vor.u32 %v7995_v15, %v6583_v14  ;;  %v6503_v15 = vld [vmem:[#allocation8 + $0x600] sm:$0xf] }
  0xe1   :  { %2926 = vmatpush.bf16.msra.mxu2 %v6008_v36  ;;  %2940 = vmatpush.bf16.msra.mxu3 %v6136_v2  ;;  %v7919_v36 = vld [vmem:[#allocation8 + $0x44c] sm:$0xf0]  ;;  %v6407_v2 = vld [vmem:[#allocation8 + $0x540] sm:$0xf] }
  0xe2   :  { %v6280_v37 = vor.u32 %v7919_v36, %v6279_v35  ;;  %v6408_v39 = vor.u32 %v7951_v38, %v6407_v2 }
  0xe3   :  { %2899 = vmatpush.bf16.msra.mxu0 %v5736_v25  ;;  %2913 = vmatpush.bf16.msra.mxu1 %v5864_v26  ;;  %v8832_v51 = vpop.f32.mrf.mxu0  ;;  %v8834_v57 = vpop.f32.mrf.mxu1  ;;  %v6423_v25 = vld [vmem:[#allocation8 + $0x560] sm:$0xf]  ;;  %v6296_v26 = vor.u32 %v7923_v24, %v6295_v23  ;;  %v8007_v23 = vld [vmem:[#allocation8 + $0x70c] sm:$0xf0] }
  0xe4   :  { %v6424_v28 = vor.u32 %v7955_v27, %v6423_v25  ;;  %v6504_v25 = vor.u32 %v7975_v20, %v6503_v15  ;;  %v8863_v27 = vld [vmem:[%s9181_s10] sm:$0xff] }
  0xe5   :  { %2927 = vmatpush.bf16.msra.mxu2 %v5992_v47  ;;  %2941 = vmatpush.bf16.msra.mxu3 %v6120_v52  ;;  %v6263_v47 = vld [vmem:[#allocation8 + $0x420] sm:$0xf]  ;;  %v851_v36 = vperm.slane %v8863_v27, 1 }
  0xe6   :  { %v6264_v52 = vor.u32 %v7915_v48, %v6263_v47 }
  0xe7   :  { %2948 = vmatpush.bf16.msrb.mxu0 %v6360_v30  ;;  %2962 = vmatpush.bf16.msrb.mxu1 %v6488_v33  ;;  %v7991_v30 = vld [vmem:[#allocation8 + $0x68c] sm:$0xf0] }
  0xe8   :  { %v6568_v32 = vor.u32 %v7991_v30, %v6567_v29  ;;  %v8023_v33 = vld [vmem:[#allocation8 + $0x78c] sm:$0xf0] }
  0xe9   :  { %2976 = vmatpush.bf16.msrb.mxu2 %v6616_v53  ;;  %2990 = vmatpush.bf16.msrb.mxu3 %v6744_v58  ;;  %v6696_v34 = vor.u32 %v8023_v33, %v6695_v31  ;;  %v6391_v53 = vld [vmem:[#allocation8 + $0x520] sm:$0xf]  ;;  %v8869_v31 = vld [vmem:[#allocation7] sm:$0xff] }
  0xea   :  { %v6392_v56 = vor.u32 %v7947_v54, %v6391_v53  ;;  %v6535_v58 = vld [vmem:[#allocation8 + $0x640] sm:$0xf]  ;;  %v321_v35 = vperm.slane %v8869_v31, 1  ;;  %v853_v53 = vperm.slane %v8863_v27, 3 }
  0xeb   :  { %2949 = vmatpush.bf16.msrb.mxu0 %v6344_v40  ;;  %2963 = vmatpush.bf16.msrb.mxu1 %v6472_v43  ;;  %v8838_v16 = vpop.f32.mrf.mxu3  ;;  %v8840_v17 = vpop.f32.mrf.mxu0  ;;  %v6551_v40 = vld [vmem:[#allocation8 + $0x660] sm:$0xf] }
  0xec   :  { %v8836_v12 = vpop.f32.mrf.mxu2  ;;  %v8842_v21 = vpop.f32.mrf.mxu1  ;;  %v6552_v43 = vor.u32 %v7987_v41, %v6551_v40  ;;  %v680_v38 = vadd.f32 %v8834_v57, %v321_v35  ;;  %v322_v40 = vperm.slane %v8869_v31, 2  ;;  %v323_v41 = vperm.slane %v8869_v31, 3 }
  0xed   :  { %2977 = vmatpush.bf16.msrb.mxu2 %v6600_v5  ;;  %2991 = vmatpush.bf16.msrb.mxu3 %v6728_v6  ;;  %v7943_v5 = vld [vmem:[#allocation8 + $0x50c] sm:$0xf0]  ;;  %v682_v44 = vadd.f32 %v8842_v21, %v321_v35  ;;  %v7809_v21 = vld [vmem:[#allocation8 + $0xe4] sm:$0xf] }
  0xee   :  { %v6376_v6 = vor.u32 %v7943_v5, %v6375_v4  ;;  %v694_v60 = vadd.f32 %v8836_v12, %v322_v40  ;;  %v7841_v5 = vld [vmem:[#allocation8 + $0x1e4] sm:$0xf] }
  0xef   :  { %2950 = vmatpush.bf16.msrb.mxu0 %v6328_v61  ;;  %2964 = vmatpush.bf16.msrb.mxu1 %v6456_v0  ;;  %v6536_v61 = vor.u32 %v7983_v59, %v6535_v58  ;;  %v6247_v0 = vld [vmem:[#allocation8 + $0x400] sm:$0xf]  ;;  %v7837_v35 = vld [vmem:[#allocation8 + $0x1c4] sm:$0xf] }
  0xf0   :  { %v6248_v3 = vor.u32 %v7911_v1, %v6247_v0  ;;  %v777_v1 = vmax.f32 %v682_v44, 0.0  ;;  %v6233_v44 = vld [vmem:[#allocation8 + $0x3f0] sm:$0xf0] }
  0xf1   :  { %2978 = vmatpush.bf16.msrb.mxu2 %v6584_v18  ;;  %2992 = vmatpush.bf16.msrb.mxu3 %v6712_v22  ;;  %v6631_v22 = vld [vmem:[#allocation8 + $0x700] sm:$0xf] }
  0xf3   :  { %2951 = vmatpush.bf16.msrb.mxu0 %v6312_v10  ;;  %2965 = vmatpush.bf16.msrb.mxu1 %v6440_v13  ;;  %v8846_v49 = vpop.f32.mrf.mxu3  ;;  %v6520_v10 = vor.u32 %v7979_v8, %v6519_v7  ;;  %v6648_v13 = vor.u32 %v8011_v11, %v6647_v9 }
  0xf4   :  { %v8844_v45 = vpop.f32.mrf.mxu2  ;;  %v710_v15 = vadd.f32 %v8846_v49, %v323_v41  ;;  %v7873_v49 = vld [vmem:[#allocation8 + $0x2e4] sm:$0xf] }
  0xf5   :  { %2979 = vmatpush.bf16.msrb.mxu2 %v6568_v32  ;;  %2993 = vmatpush.bf16.msrb.mxu3 %v6696_v34  ;;  %v850_v32 = vperm.slane %v8863_v27, 0  ;;  %v320_v34 = vperm.slane %v8869_v31, 0  ;;  %v696_v0 = vadd.f32 %v8844_v45, %v322_v40 }
  0xf7   :  { %2952 = vmatpush.bf16.msrb.mxu0 %v6296_v26  ;;  %2966 = vmatpush.bf16.msrb.mxu1 %v6424_v28  ;;  %v6632_v26 = vor.u32 %v8007_v23, %v6631_v22  ;;  %v666_v2 = vadd.f32 %v8832_v51, %v320_v34  ;;  %v668_v42 = vadd.f32 %v8840_v17, %v320_v34  ;;  %v7805_v23 = vld [vmem:[#allocation8 + $0xc4] sm:$0xf]  ;;  %v778_v40 = vmax.f32 %v696_v0, 0.0 }
  0xf8   :  { %v708_v17 = vadd.f32 %v8838_v16, %v323_v41 }
  0xf9   :  { %2980 = vmatpush.bf16.msrb.mxu2 %v6552_v43  ;;  %2994 = vmatpush.bf16.msrb.mxu3 %v6680_v46  ;;  %v852_v46 = vperm.slane %v8863_v27, 2  ;;  %v768_v57 = vmax.f32 %v666_v2, 0.0 }
  0xfb   :  { %2953 = vmatpush.bf16.msrb.mxu0 %v6280_v37  ;;  %2967 = vmatpush.bf16.msrb.mxu1 %v6408_v39 }
  0xfd   :  { %2981 = vmatpush.bf16.msrb.mxu2 %v6536_v61  ;;  %2995 = vmatpush.bf16.msrb.mxu3 %v6664_v63  ;;  %v776_v61 = vmax.f32 %v668_v42, 0.0  ;;  %v5849_v63 = vld [vmem:[#allocation8 + $0xf0] sm:$0xf0] }
  0xfe   :  { %v5852_v16 = vor.u32 %v7809_v21, %v5849_v63 }
  0xff   :  { %2954 = vmatpush.bf16.msrb.mxu0 %v6264_v52  ;;  %2968 = vmatpush.bf16.msrb.mxu1 %v6392_v56  ;;  %v769_v56 = vmax.f32 %v680_v38, 0.0 }
 0x101   :  { %2982 = vmatpush.bf16.msrb.mxu2 %v6520_v10  ;;  %2996 = vmatpush.bf16.msrb.mxu3 %v6648_v13 }
 0x103   :  { %v8848_v50 = vpop.f32.mrf.mxu0  ;;  %v8850_v55 = vpop.f32.mrf.mxu1  ;;  %2955 = vmatpush.bf16.msrb.mxu0 %v6248_v3  ;;  %2969 = vmatpush.bf16.msrb.mxu1 %v6376_v6  ;;  %v5977_v6 = vld [vmem:[#allocation8 + $0x1f0] sm:$0xf0] }
 0x104   :  { %v5980_v22 = vor.u32 %v7841_v5, %v5977_v6 }
 0x105   :  { %2983 = vmatpush.bf16.msrb.mxu2 %v6504_v25  ;;  %2997 = vmatpush.bf16.msrb.mxu3 %v6632_v26  ;;  %v5833_v25 = vld [vmem:[#allocation8 + $0xd0] sm:$0xf0]  ;;  %v770_v26 = vmax.f32 %v694_v60, 0.0 }
 0x106   :  { %v5836_v42 = vor.u32 %v7805_v23, %v5833_v25 }
 0x10b   :  { %v8854_v18 = vpop.f32.mrf.mxu3  ;;  %v8856_v19 = vpop.f32.mrf.mxu0 }
 0x10c   :  { %v8852_v14 = vpop.f32.mrf.mxu2  ;;  %v8858_v24 = vpop.f32.mrf.mxu1 }
 0x113   :  { %v8867_v29 = vpop.f32.mrf.mxu3 }
 0x114   :  { %v8865_v28 = vpop.f32.mrf.mxu2 }
 0x123   :  { %v1195_v30 = vpop.f32.mrf.mxu0  ;;  %v1209_v33 = vpop.f32.mrf.mxu1 }
 0x124   :  { %v1196_v37 = vadd.f32 %v1195_v30, %v850_v32  ;;  %v1210_v39 = vadd.f32 %v1209_v33, %v851_v36 }
 0x126   :  { %v1298_v52 = vmax.f32 %v1196_v37, 0.0  ;;  %v1299_v58 = vmax.f32 %v1210_v39, 0.0  ;;  %v771_v37 = vmax.f32 %v708_v17, 0.0  ;;  %v6105_v39 = vld [vmem:[#allocation8 + $0x2f0] sm:$0xf0] }
 0x128   :  { %v1314_v7 = vadd.f32 %v1298_v52, %v768_v57  ;;  %v1315_v11 = vadd.f32 %v1299_v58, %v769_v56 }
 0x12b   :  { %v1237_v47 = vpop.f32.mrf.mxu3  ;;  %v1197_v48 = vpop.f32.mrf.mxu0 }
 0x12c   :  { %v1223_v43 = vpop.f32.mrf.mxu2  ;;  %v1198_v51 = vadd.f32 %v1197_v48, %v850_v32  ;;  %v1211_v54 = vpop.f32.mrf.mxu1  ;;  %v1238_v8 = vadd.f32 %v1237_v47, %v853_v53  ;;  %v779_v47 = vmax.f32 %v710_v15, 0.0  ;;  %v7829_v15 = vld [vmem:[#allocation8 + $0x184] sm:$0xf] }
 0x12d   :  { %v1212_v59 = vadd.f32 %v1211_v54, %v851_v36  ;;  %v1224_v3 = vadd.f32 %v1223_v43, %v852_v46  ;;  %v5961_v36 = vld [vmem:[#allocation8 + $0x1d0] sm:$0xf0]  ;;  %v7905_v43 = vld [vmem:[#allocation8 + $0x3e4] sm:$0xf] }
 0x12e   :  { %v1306_v62 = vmax.f32 %v1198_v51, 0.0  ;;  %v1301_v2 = vmax.f32 %v1238_v8, 0.0  ;;  %v5964_v48 = vor.u32 %v7837_v35, %v5961_v36  ;;  %v5817_v51 = vld [vmem:[#allocation8 + $0xb0] sm:$0xf0]  ;;  %v6236_v63 = vor.u32 %v7905_v43, %v6233_v44  ;;  %v7797_v8 = vld [vmem:[#allocation8 + $0x84] sm:$0xf] }
 0x12f   :  { %v1307_v4 = vmax.f32 %v1212_v59, 0.0  ;;  %v1300_v30 = vmax.f32 %v1224_v3, 0.0  ;;  %v5945_v59 = vld [vmem:[#allocation8 + $0x1b0] sm:$0xf0]  ;;  %v7793_v36 = vld [vmem:[#allocation8 + $0x64] sm:$0xf] }
 0x130   :  { %v1322_v9 = vadd.f32 %v1306_v62, %v776_v61  ;;  %v8886_v10 = vpack.c.bf16 %v1306_v62, %v1298_v52  ;;  %v7801_v52 = vld [vmem:[#allocation8 + $0xa4] sm:$0xf]  ;;  %v1317_v60 = vadd.f32 %v1301_v2, %v771_v37  ;;  %v6108_v62 = vor.u32 %v7873_v49, %v6105_v39  ;;  %v6089_v3 = vld [vmem:[#allocation8 + $0x2d0] sm:$0xf0] }
 0x131   :  { %v1323_v12 = vadd.f32 %v1307_v4, %v777_v1  ;;  %v8888_v13 = vpack.c.bf16 %v1307_v4, %v1299_v58  ;;  %v1316_v54 = vadd.f32 %v1300_v30, %v770_v26  ;;  %v7833_v58 = vld [vmem:[#allocation8 + $0x1a4] sm:$0xf]  ;;  %v5820_v0 = vor.u32 %v7801_v52, %v5817_v51  ;;  %v6201_v35 = vld [vmem:[#allocation8 + $0x3b0] sm:$0xf0] }
 0x132   :  { %v8891_v20 = vpack.c.bf16 %v1322_v9, %v1314_v7  ;;  %v7869_v1 = vld [vmem:[#allocation8 + $0x2c4] sm:$0xf]  ;;  %v5948_v6 = vor.u32 %v7833_v58, %v5945_v59  ;;  %v6217_v7 = vld [vmem:[#allocation8 + $0x3d0] sm:$0xf0]  ;;  %v854_v43 = vperm.slane %v8863_v27, 4 }
 0x133   :  { %v8893_v32 = vpack.c.bf16 %v1323_v12, %v1315_v11  ;;  %v1239_v34 = vpop.f32.mrf.mxu3  ;;  %v7901_v4 = vld [vmem:[#allocation8 + $0x3c4] sm:$0xf]  ;;  %v5801_v9 = vld [vmem:[#allocation8 + $0x90] sm:$0xf0]  ;;  %v326_v11 = vperm.slane %v8869_v31, 6  ;;  %v6092_v23 = vor.u32 %v7869_v1, %v6089_v3 }
 0x134   :  { %v1225_v45 = vpop.f32.mrf.mxu2  ;;  %v1240_v38 = vadd.f32 %v1239_v34, %v853_v53  ;;  %2900 = vmatmul.bf16.vlgmr.msra.gmra.mxu0 %v8891_v20  ;;  %v324_v53 = vperm.slane %v8869_v31, 4  ;;  %v6220_v25 = vor.u32 %v7901_v4, %v6217_v7  ;;  %v5804_v26 = vor.u32 %v7797_v8, %v5801_v9  ;;  %v5785_v37 = vld [vmem:[#allocation8 + $0x70] sm:$0xf0]  ;;  %v7861_v52 = vld [vmem:[#allocation8 + $0x284] sm:$0xf] }
 0x135   :  { %v1226_v33 = vadd.f32 %v1225_v45, %v852_v46  ;;  %2914 = vmatmul.bf16.vlgmr.msra.gmra.mxu1 %v8893_v32  ;;  %3004 = vmatpush.bf16.msra.mxu0 %v5852_v16  ;;  %v325_v16 = vperm.slane %v8869_v31, 5  ;;  %v5929_v45 = vld [vmem:[#allocation8 + $0x190] sm:$0xf0]  ;;  %v7893_v51 = vld [vmem:[#allocation8 + $0x384] sm:$0xf] }
 0x136   :  { %v1309_v46 = vmax.f32 %v1240_v38, 0.0  ;;  %3018 = vmatpush.bf16.msra.mxu1 %v5980_v22  ;;  %v8908_v12 = vadd.f32 %v8848_v50, %v324_v53  ;;  %v327_v22 = vperm.slane %v8869_v31, 7  ;;  %v7897_v50 = vld [vmem:[#allocation8 + $0x3a4] sm:$0xf]  ;;  %v5932_v34 = vor.u32 %v7829_v15, %v5929_v45  ;;  %v6041_v7 = vld [vmem:[#allocation8 + $0x270] sm:$0xf0] }
 0x137   :  { %v1308_v41 = vmax.f32 %v1226_v33, 0.0  ;;  %v6073_v33 = vld [vmem:[#allocation8 + $0x2b0] sm:$0xf0]  ;;  %v8921_v49 = vadd.f32 %v8850_v55, %v325_v16  ;;  %v8924_v39 = vadd.f32 %v8856_v19, %v324_v53  ;;  %v6204_v55 = vor.u32 %v7897_v50, %v6201_v35  ;;  %v7857_v3 = vld [vmem:[#allocation8 + $0x264] sm:$0xf] }
 0x138   :  { %v1325_v17 = vadd.f32 %v1309_v46, %v779_v47  ;;  %v8900_v61 = vpack.c.bf16 %v1309_v46, %v1301_v2  ;;  %v8917_v2 = vadd.f32 %v8852_v14, %v326_v11  ;;  %v772_v38 = vmax.f32 %v8908_v12, 0.0  ;;  %v6057_v19 = vld [vmem:[#allocation8 + $0x290] sm:$0xf0]  ;;  %v7889_v8 = vld [vmem:[#allocation8 + $0x364] sm:$0xf] }
 0x139   :  { %v1324_v57 = vadd.f32 %v1308_v41, %v778_v40  ;;  %v8898_v56 = vpack.c.bf16 %v1308_v41, %v1300_v30  ;;  %3005 = vmatpush.bf16.msra.mxu0 %v5836_v42  ;;  %v7865_v30 = vld [vmem:[#allocation8 + $0x2a4] sm:$0xf]  ;;  %v5913_v41 = vld [vmem:[#allocation8 + $0x170] sm:$0xf0]  ;;  %v8927_v42 = vadd.f32 %v8858_v24, %v325_v16  ;;  %v855_v14 = vperm.slane %v8863_v27, 5 }
 0x13a   :  { %v8904_v5 = vpack.c.bf16 %v1325_v17, %v1317_v60  ;;  %3019 = vmatpush.bf16.msra.mxu1 %v5964_v48  ;;  %v7825_v40 = vld [vmem:[#allocation8 + $0x164] sm:$0xf]  ;;  %v6076_v47 = vor.u32 %v7865_v30, %v6073_v33  ;;  %v5788_v48 = vor.u32 %v7793_v36, %v5785_v37  ;;  %v774_v58 = vmax.f32 %v8917_v2, 0.0  ;;  %v5897_v17 = vld [vmem:[#allocation8 + $0x150] sm:$0xf0] }
 0x13b   :  { %v8902_v21 = vpack.c.bf16 %v1324_v57, %v1316_v54  ;;  %v5916_v53 = vor.u32 %v7825_v40, %v5913_v41  ;;  %v6185_v54 = vld [vmem:[#allocation8 + $0x390] sm:$0xf0]  ;;  %v7789_v24 = vld [vmem:[#allocation8 + $0x44] sm:$0xf]  ;;  %v773_v59 = vmax.f32 %v8921_v49, 0.0  ;;  %v6060_v1 = vor.u32 %v7861_v52, %v6057_v19 }
 0x13c   :  { %2942 = vmatmul.bf16.vlgmr.msra.gmra.mxu3 %v8904_v5  ;;  %v5769_v57 = vld [vmem:[#allocation8 + $0x50] sm:$0xf0]  ;;  %v7821_v60 = vld [vmem:[#allocation8 + $0x144] sm:$0xf]  ;;  %v6188_v4 = vor.u32 %v7893_v51, %v6185_v54  ;;  %v856_v36 = vperm.slane %v8863_v27, 6  ;;  %v6044_v41 = vor.u32 %v7857_v3, %v6041_v7 }
 0x13d   :  { %2928 = vmatmul.bf16.vlgmr.msra.gmra.mxu2 %v8902_v21  ;;  %3046 = vmatpush.bf16.msra.mxu3 %v6236_v63  ;;  %v781_v63 = vmax.f32 %v8927_v42, 0.0  ;;  %v6169_v9 = vld [vmem:[#allocation8 + $0x370] sm:$0xf0]  ;;  %v5900_v15 = vor.u32 %v7821_v60, %v5897_v17  ;;  %v7785_v45 = vld [vmem:[#allocation8 + $0x24] sm:$0xf] }
 0x13e   :  { %3032 = vmatpush.bf16.msra.mxu2 %v6108_v62  ;;  %3006 = vmatpush.bf16.msra.mxu0 %v5820_v0  ;;  %v780_v62 = vmax.f32 %v8924_v39, 0.0  ;;  %v5881_v30 = vld [vmem:[#allocation8 + $0x130] sm:$0xf0]  ;;  %v8937_v33 = vld [vmem:[#allocation8 + $0x244] sm:$0xf] }
 0x13f   :  { %3020 = vmatpush.bf16.msra.mxu1 %v5948_v6  ;;  %v5772_v6 = vor.u32 %v7789_v24, %v5769_v57  ;;  %v8939_v50 = vld [vmem:[#allocation8 + $0x250] sm:$0xf0]  ;;  %v7781_v19 = vld [vmem:[#allocation8 + $0x4] sm:$0xf] }
 0x140   :  { %v5737_v51 = vld [vmem:[#allocation8 + $0x10] sm:$0xf0]  ;;  %v7813_v60 = vld [vmem:[#allocation8 + $0x104] sm:$0xf] }
 0x141   :  { %3047 = vmatpush.bf16.msra.mxu3 %v6220_v25  ;;  %v7817_v25 = vld [vmem:[#allocation8 + $0x124] sm:$0xf]  ;;  %v5865_v17 = vld [vmem:[#allocation8 + $0x110] sm:$0xf0] }
 0x142   :  { %3033 = vmatpush.bf16.msra.mxu2 %v6092_v23  ;;  %3007 = vmatpush.bf16.msra.mxu0 %v5804_v26  ;;  %v5753_v23 = vld [vmem:[#allocation8 + $0x30] sm:$0xf0]  ;;  %v5884_v57 = vor.u32 %v7817_v25, %v5881_v30  ;;  %v7969_v31 = vld [vmem:[#allocation8 + $0x5e4] sm:$0xf] }
 0x143   :  { %v1251_v44 = vpop.f32.mrf.mxu0  ;;  %v1265_v46 = vpop.f32.mrf.mxu1  ;;  %3021 = vmatpush.bf16.msra.mxu1 %v5932_v34  ;;  %v8944_v34 = vadd.f32 %v8854_v18, %v327_v22  ;;  %v6172_v18 = vor.u32 %v7889_v8, %v6169_v9  ;;  %v5756_v52 = vor.u32 %v7785_v45, %v5753_v23  ;;  %v6489_v7 = vld [vmem:[#allocation8 + $0x5f0] sm:$0xf0]  ;;  %v5868_v23 = vor.u32 %v7813_v60, %v5865_v17  ;;  %v7881_v25 = vld [vmem:[#allocation8 + $0x324] sm:$0xf] }
 0x144   :  { %v8935_v0 = vadd.f32 %v1251_v44, %v854_v43  ;;  %v1266_v16 = vadd.f32 %v1265_v46, %v855_v14  ;;  %v8948_v44 = vld [vmem:[#allocation8 + $0x344] sm:$0xf]  ;;  %v857_v46 = vperm.slane %v8863_v27, 7  ;;  %v8961_v27 = vadd.f32 %v8867_v29, %v327_v22 }
 0x145   :  { %3048 = vmatpush.bf16.msra.mxu3 %v6204_v55  ;;  %v775_v29 = vmax.f32 %v8944_v34, 0.0  ;;  %v7933_v39 = vld [vmem:[#allocation8 + $0x4c4] sm:$0xf]  ;;  %v6345_v34 = vld [vmem:[#allocation8 + $0x4d0] sm:$0xf0] }
 0x146   :  { %3034 = vmatpush.bf16.msra.mxu2 %v6076_v47  ;;  %3008 = vmatpush.bf16.msra.mxu0 %v5788_v48  ;;  %v1302_v35 = vmax.f32 %v8935_v0, 0.0  ;;  %v8950_v47 = vld [vmem:[#allocation8 + $0x350] sm:$0xf0]  ;;  %v1303_v54 = vmax.f32 %v1266_v16, 0.0  ;;  %v6028_v0 = vor.u32 %v8937_v33, %v8939_v50  ;;  %v7849_v16 = vld [vmem:[#allocation8 + $0x224] sm:$0xf]  ;;  %v6492_v50 = vor.u32 %v7969_v31, %v6489_v7 }
 0x147   :  { %3022 = vmatpush.bf16.msra.mxu1 %v5916_v53  ;;  %v8956_v53 = vadd.f32 %v8865_v28, %v326_v11  ;;  %v7937_v28 = vld [vmem:[#allocation8 + $0x4e4] sm:$0xf]  ;;  %v6361_v11 = vld [vmem:[#allocation8 + $0x4f0] sm:$0xf0] }
 0x148   :  { %v1319_v12 = vadd.f32 %v1303_v54, %v773_v59  ;;  %v6364_v33 = vor.u32 %v7937_v28, %v6361_v11  ;;  %v8033_v17 = vld [vmem:[#allocation8 + $0x7e4] sm:$0xf]  ;;  %v6329_v11 = vld [vmem:[#allocation8 + $0x4b0] sm:$0xf0] }
 0x149   :  { %3049 = vmatpush.bf16.msra.mxu3 %v6188_v4  ;;  %v7929_v28 = vld [vmem:[#allocation8 + $0x4a4] sm:$0xf]  ;;  %v6457_v7 = vld [vmem:[#allocation8 + $0x5b0] sm:$0xf0] }
 0x14a   :  { %3035 = vmatpush.bf16.msra.mxu2 %v6060_v1  ;;  %3009 = vmatpush.bf16.msra.mxu0 %v5772_v6  ;;  %v6156_v1 = vor.u32 %v8948_v44, %v8950_v47  ;;  %v5740_v6 = vor.u32 %v7781_v19, %v5737_v51  ;;  %v5993_v44 = vld [vmem:[#allocation8 + $0x210] sm:$0xf0]  ;;  %v782_v47 = vmax.f32 %v8956_v53, 0.0  ;;  %v783_v19 = vmax.f32 %v8961_v27, 0.0  ;;  %v7961_v31 = vld [vmem:[#allocation8 + $0x5a4] sm:$0xf] }
 0x14b   :  { %v1279_v26 = vpop.f32.mrf.mxu2  ;;  %v1293_v37 = vpop.f32.mrf.mxu3  ;;  %3023 = vmatpush.bf16.msra.mxu1 %v5900_v15  ;;  %v6009_v15 = vld [vmem:[#allocation8 + $0x230] sm:$0xf0] }
 0x14c   :  { %v1253_v40 = vpop.f32.mrf.mxu0  ;;  %v1267_v48 = vpop.f32.mrf.mxu1  ;;  %v1280_v3 = vadd.f32 %v1279_v26, %v856_v36  ;;  %v1294_v22 = vadd.f32 %v1293_v37, %v857_v46  ;;  %v6137_v26 = vld [vmem:[#allocation8 + $0x330] sm:$0xf0] }
 0x14d   :  { %v1254_v55 = vadd.f32 %v1253_v40, %v854_v43  ;;  %v1268_v24 = vadd.f32 %v1267_v48, %v855_v14  ;;  %v1318_v14 = vadd.f32 %v1302_v35, %v772_v38  ;;  %3050 = vmatpush.bf16.msra.mxu3 %v6172_v18  ;;  %v6473_v37 = vld [vmem:[#allocation8 + $0x5d0] sm:$0xf0]  ;;  %v6012_v40 = vor.u32 %v7849_v16, %v6009_v15  ;;  %v7997_v15 = vld [vmem:[#allocation8 + $0x6c4] sm:$0xf] }
 0x14e   :  { %3036 = vmatpush.bf16.msra.mxu2 %v6044_v41  ;;  %3010 = vmatpush.bf16.msra.mxu0 %v5756_v52  ;;  %v1304_v49 = vmax.f32 %v1280_v3, 0.0  ;;  %v7845_v41 = vld [vmem:[#allocation8 + $0x204] sm:$0xf]  ;;  %v6140_v18 = vor.u32 %v7881_v25, %v6137_v26  ;;  %v6332_v16 = vor.u32 %v7929_v28, %v6329_v11  ;;  %v6313_v26 = vld [vmem:[#allocation8 + $0x490] sm:$0xf0] }
 0x14f   :  { %v1310_v43 = vmax.f32 %v1254_v55, 0.0  ;;  %v1311_v4 = vmax.f32 %v1268_v24, 0.0  ;;  %3024 = vmatpush.bf16.msra.mxu1 %v5884_v57  ;;  %v1305_v55 = vmax.f32 %v1294_v22, 0.0  ;;  %v7877_v52 = vld [vmem:[#allocation8 + $0x304] sm:$0xf]  ;;  %v6348_v57 = vor.u32 %v7933_v39, %v6345_v34 }
 0x150   :  { %v5996_v60 = vor.u32 %v7845_v41, %v5993_v44  ;;  %v7925_v25 = vld [vmem:[#allocation8 + $0x484] sm:$0xf]  ;;  %v6297_v41 = vld [vmem:[#allocation8 + $0x470] sm:$0xf0] }
 0x151   :  { %v1326_v8 = vadd.f32 %v1310_v43, %v780_v62  ;;  %v8972_v9 = vpack.c.bf16 %v1310_v43, %v1302_v35  ;;  %v1327_v38 = vadd.f32 %v1311_v4, %v781_v63  ;;  %v8978_v45 = vpack.c.bf16 %v1311_v4, %v1303_v54  ;;  %v7965_v35 = vld [vmem:[#allocation8 + $0x5c4] sm:$0xf]  ;;  %3051 = vmatpush.bf16.msra.mxu3 %v6156_v1  ;;  %v6745_v1 = vld [vmem:[#allocation8 + $0x7f0] sm:$0xf0] }
 0x152   :  { %3037 = vmatpush.bf16.msra.mxu2 %v6028_v0  ;;  %3011 = vmatpush.bf16.msra.mxu0 %v5740_v6  ;;  %v8001_v54 = vld [vmem:[#allocation8 + $0x6e4] sm:$0xf]  ;;  %v6476_v53 = vor.u32 %v7965_v35, %v6473_v37  ;;  %v1320_v43 = vadd.f32 %v1304_v49, %v774_v58  ;;  %v6316_v34 = vor.u32 %v7925_v25, %v6313_v26  ;;  %v6585_v37 = vld [vmem:[#allocation8 + $0x6b0] sm:$0xf0] }
 0x153   :  { %v8980_v62 = vpack.c.bf16 %v1326_v8, %v1318_v14  ;;  %v1281_v30 = vpop.f32.mrf.mxu2  ;;  %v8982_v59 = vpack.c.bf16 %v1327_v38, %v1319_v12  ;;  %v1295_v63 = vpop.f32.mrf.mxu3  ;;  %3025 = vmatpush.bf16.msra.mxu1 %v5868_v23  ;;  %v1321_v14 = vadd.f32 %v1305_v55, %v775_v29  ;;  %v6748_v8 = vor.u32 %v8033_v17, %v6745_v1  ;;  %v6601_v12 = vld [vmem:[#allocation8 + $0x6d0] sm:$0xf0]  ;;  %v8029_v38 = vld [vmem:[#allocation8 + $0x7c4] sm:$0xf] }
 0x154   :  { %v1282_v42 = vadd.f32 %v1281_v30, %v856_v36  ;;  %v1296_v48 = vadd.f32 %v1295_v63, %v857_v46  ;;  %v6121_v36 = vld [vmem:[#allocation8 + $0x310] sm:$0xf0]  ;;  %v6460_v29 = vor.u32 %v7961_v31, %v6457_v7  ;;  %v7957_v39 = vld [vmem:[#allocation8 + $0x584] sm:$0xf] }
 0x155   :  { %2956 = vmatmul.bf16.vlgmr.msrb.gmra.mxu0 %v8980_v62  ;;  %2970 = vmatmul.bf16.vlgmr.msrb.gmra.mxu1 %v8982_v59  ;;  %v6617_v46 = vld [vmem:[#allocation8 + $0x6f0] sm:$0xf0]  ;;  %v6124_v6 = vor.u32 %v7877_v52, %v6121_v36  ;;  %v7993_v35 = vld [vmem:[#allocation8 + $0x6a4] sm:$0xf] }
 0x156   :  { %v1312_v51 = vmax.f32 %v1282_v42, 0.0  ;;  %v1313_v24 = vmax.f32 %v1296_v48, 0.0  ;;  %3060 = vmatpush.bf16.msrb.mxu0 %v6364_v33  ;;  %3038 = vmatpush.bf16.msra.mxu2 %v6012_v40  ;;  %v6620_v2 = vor.u32 %v8001_v54, %v6617_v46  ;;  %v6729_v23 = vld [vmem:[#allocation8 + $0x7d0] sm:$0xf0]  ;;  %v6604_v33 = vor.u32 %v7997_v15, %v6601_v12  ;;  %v8025_v42 = vld [vmem:[#allocation8 + $0x7a4] sm:$0xf] }
 0x157   :  { %3074 = vmatpush.bf16.msrb.mxu1 %v6492_v50  ;;  %3052 = vmatpush.bf16.msra.mxu3 %v6140_v18  ;;  %v6441_v30 = vld [vmem:[#allocation8 + $0x590] sm:$0xf0]  ;;  %v6732_v50 = vor.u32 %v8029_v38, %v6729_v23  ;;  %v7921_v40 = vld [vmem:[#allocation8 + $0x464] sm:$0xf] }
 0x158   :  { %v1328_v0 = vadd.f32 %v1312_v51, %v782_v47  ;;  %v8990_v27 = vpack.c.bf16 %v1312_v51, %v1304_v49  ;;  %v1329_v3 = vadd.f32 %v1313_v24, %v783_v19  ;;  %v8992_v4 = vpack.c.bf16 %v1313_v24, %v1305_v55  ;;  %v6713_v63 = vld [vmem:[#allocation8 + $0x7b0] sm:$0xf0]  ;;  %v7953_v44 = vld [vmem:[#allocation8 + $0x564] sm:$0xf] }
 0x159   :  { %v6444_v49 = vor.u32 %v7957_v39, %v6441_v30  ;;  %v6425_v47 = vld [vmem:[#allocation8 + $0x570] sm:$0xf0]  ;;  %v6588_v55 = vor.u32 %v7993_v35, %v6585_v37  ;;  %v6716_v48 = vor.u32 %v8025_v42, %v6713_v63  ;;  %v7989_v18 = vld [vmem:[#allocation8 + $0x684] sm:$0xf]  ;;  %v6300_v19 = vor.u32 %v7921_v40, %v6297_v41  ;;  %v5983_v35 = vld [vmem:[#allocation8 + $0x1e8] sm:$0xf] }
 0x15a   :  { %v8994_v22 = vpack.c.bf16 %v1328_v0, %v1320_v43  ;;  %v8996_v58 = vpack.c.bf16 %v1329_v3, %v1321_v14  ;;  %3061 = vmatpush.bf16.msrb.mxu0 %v6348_v57  ;;  %3039 = vmatpush.bf16.msra.mxu2 %v5996_v60  ;;  %v6569_v52 = vld [vmem:[#allocation8 + $0x690] sm:$0xf0]  ;;  %v6428_v51 = vor.u32 %v7953_v44, %v6425_v47  ;;  %v8021_v36 = vld [vmem:[#allocation8 + $0x784] sm:$0xf]  ;;  %v7844_v37 = vld [vmem:[#allocation8 + $0x1f4] sm:$0xf0] }
 0x15b   :  { %3075 = vmatpush.bf16.msrb.mxu1 %v6476_v53  ;;  %3053 = vmatpush.bf16.msra.mxu3 %v6124_v6  ;;  %v6697_v54 = vld [vmem:[#allocation8 + $0x790] sm:$0xf0]  ;;  %v7917_v24 = vld [vmem:[#allocation8 + $0x444] sm:$0xf]  ;;  %v6572_v46 = vor.u32 %v7989_v18, %v6569_v52  ;;  %v5839_v18 = vld [vmem:[#allocation8 + $0xc8] sm:$0xf] }
 0x15c   :  { %2984 = vmatmul.bf16.vlgmr.msrb.gmra.mxu2 %v8994_v22  ;;  %2998 = vmatmul.bf16.vlgmr.msrb.gmra.mxu3 %v8996_v58  ;;  %v6281_v57 = vld [vmem:[#allocation8 + $0x450] sm:$0xf0]  ;;  %v7949_v53 = vld [vmem:[#allocation8 + $0x544] sm:$0xf]  ;;  %v6700_v17 = vor.u32 %v8021_v36, %v6697_v54  ;;  %v7840_v36 = vld [vmem:[#allocation8 + $0x1d4] sm:$0xf0] }
 0x15d   :  { %v6409_v60 = vld [vmem:[#allocation8 + $0x550] sm:$0xf0]  ;;  %v7985_v43 = vld [vmem:[#allocation8 + $0x664] sm:$0xf]  ;;  %v6284_v1 = vor.u32 %v7917_v24, %v6281_v57 }
 0x15e   :  { %3088 = vmatpush.bf16.msrb.mxu2 %v6620_v2  ;;  %3062 = vmatpush.bf16.msrb.mxu0 %v6332_v16  ;;  %v6553_v0 = vld [vmem:[#allocation8 + $0x670] sm:$0xf0]  ;;  %v6412_v28 = vor.u32 %v7949_v53, %v6409_v60  ;;  %v8017_v11 = vld [vmem:[#allocation8 + $0x764] sm:$0xf] }
 0x15f   :  { %3102 = vmatpush.bf16.msrb.mxu3 %v6748_v8  ;;  %3076 = vmatpush.bf16.msrb.mxu1 %v6460_v29  ;;  %v6681_v14 = vld [vmem:[#allocation8 + $0x770] sm:$0xf0]  ;;  %v7913_v3 = vld [vmem:[#allocation8 + $0x424] sm:$0xf]  ;;  %v6556_v2 = vor.u32 %v7985_v43, %v6553_v0 }
 0x160   :  { %v6265_v6 = vld [vmem:[#allocation8 + $0x430] sm:$0xf0]  ;;  %v7945_v31 = vld [vmem:[#allocation8 + $0x524] sm:$0xf]  ;;  %v6684_v8 = vor.u32 %v8017_v11, %v6681_v14  ;;  %v5823_v11 = vld [vmem:[#allocation8 + $0xa8] sm:$0xf] }
 0x161   :  { %v6393_v7 = vld [vmem:[#allocation8 + $0x530] sm:$0xf0]  ;;  %v7981_v16 = vld [vmem:[#allocation8 + $0x644] sm:$0xf]  ;;  %v6268_v38 = vor.u32 %v7913_v3, %v6265_v6  ;;  %v7804_v3 = vld [vmem:[#allocation8 + $0xb4] sm:$0xf0] }
 0x162   :  { %3089 = vmatpush.bf16.msrb.mxu2 %v6604_v33  ;;  %3063 = vmatpush.bf16.msrb.mxu0 %v6316_v34  ;;  %v6537_v15 = vld [vmem:[#allocation8 + $0x650] sm:$0xf0]  ;;  %v8013_v12 = vld [vmem:[#allocation8 + $0x744] sm:$0xf]  ;;  %v6396_v29 = vor.u32 %v7945_v31, %v6393_v7  ;;  %v5855_v33 = vld [vmem:[#allocation8 + $0xe8] sm:$0xf] }
 0x163   :  { %3103 = vmatpush.bf16.msrb.mxu3 %v6732_v50  ;;  %3077 = vmatpush.bf16.msrb.mxu1 %v6444_v49  ;;  %v6665_v23 = vld [vmem:[#allocation8 + $0x750] sm:$0xf0]  ;;  %v7909_v25 = vld [vmem:[#allocation8 + $0x404] sm:$0xf]  ;;  %v6540_v50 = vor.u32 %v7981_v16, %v6537_v15  ;;  %v7812_v34 = vld [vmem:[#allocation8 + $0xf4] sm:$0xf0] }
 0x164   :  { %v6249_v26 = vld [vmem:[#allocation8 + $0x410] sm:$0xf0]  ;;  %v7941_v39 = vld [vmem:[#allocation8 + $0x504] sm:$0xf]  ;;  %v6668_v49 = vor.u32 %v8013_v12, %v6665_v23  ;;  %v5951_v6 = vld [vmem:[#allocation8 + $0x1a8] sm:$0xf]  ;;  %v5824_v12 = vor.u32 %v7804_v3, %v5823_v11 }
 0x165   :  { %3012 = vmatmul.bf16.vlgmr.msra.gmra.mxu0 %v8891_v20  ;;  %3026 = vmatmul.bf16.vlgmr.msra.gmra.mxu1 %v8893_v32  ;;  %v6377_v30 = vld [vmem:[#allocation8 + $0x510] sm:$0xf0]  ;;  %v7977_v42 = vld [vmem:[#allocation8 + $0x624] sm:$0xf]  ;;  %v6252_v40 = vor.u32 %v7909_v25, %v6249_v26  ;;  %v7836_v31 = vld [vmem:[#allocation8 + $0x1b4] sm:$0xf0] }
 0x166   :  { %3090 = vmatpush.bf16.msrb.mxu2 %v6588_v55  ;;  %3064 = vmatpush.bf16.msrb.mxu0 %v6300_v19  ;;  %v6521_v63 = vld [vmem:[#allocation8 + $0x630] sm:$0xf0]  ;;  %v6380_v41 = vor.u32 %v7941_v39, %v6377_v30  ;;  %v8009_v44 = vld [vmem:[#allocation8 + $0x724] sm:$0xf]  ;;  %v5856_v55 = vor.u32 %v7812_v34, %v5855_v33  ;;  %v7808_v19 = vld [vmem:[#allocation8 + $0xd4] sm:$0xf0] }
 0x167   :  { %3104 = vmatpush.bf16.msrb.mxu3 %v6716_v48  ;;  %3078 = vmatpush.bf16.msrb.mxu1 %v6428_v51  ;;  %v6649_v47 = vld [vmem:[#allocation8 + $0x730] sm:$0xf0]  ;;  %v5984_v48 = vor.u32 %v7844_v37, %v5983_v35  ;;  %v6524_v52 = vor.u32 %v7977_v42, %v6521_v63  ;;  %v5967_v51 = vld [vmem:[#allocation8 + $0x1c8] sm:$0xf]  ;;  %v7973_v24 = vld [vmem:[#allocation8 + $0x604] sm:$0xf]  ;;  %v5840_v43 = vor.u32 %v7808_v19, %v5839_v18 }
 0x168   :  { %v6652_v54 = vor.u32 %v8009_v44, %v6649_v47  ;;  %v6505_v57 = vld [vmem:[#allocation8 + $0x610] sm:$0xf0]  ;;  %v8005_v53 = vld [vmem:[#allocation8 + $0x704] sm:$0xf]  ;;  %v5968_v0 = vor.u32 %v7840_v36, %v5967_v51  ;;  %v6095_v16 = vld [vmem:[#allocation8 + $0x2c8] sm:$0xf] }
 0x169   :  { %v6633_v60 = vld [vmem:[#allocation8 + $0x710] sm:$0xf0]  ;;  %v6508_v14 = vor.u32 %v7973_v24, %v6505_v57  ;;  %v7872_v15 = vld [vmem:[#allocation8 + $0x2d4] sm:$0xf0]  ;;  %v5807_v25 = vld [vmem:[#allocation8 + $0x88] sm:$0xf] }
 0x16a   :  { %3091 = vmatpush.bf16.msrb.mxu2 %v6572_v46  ;;  %3065 = vmatpush.bf16.msrb.mxu0 %v6284_v1  ;;  %v6111_v46 = vld [vmem:[#allocation8 + $0x2e8] sm:$0xf]  ;;  %v6636_v7 = vor.u32 %v8005_v53, %v6633_v60  ;;  %v7904_v23 = vld [vmem:[#allocation8 + $0x3d4] sm:$0xf0]  ;;  %v6096_v33 = vor.u32 %v7872_v15, %v6095_v16 }
 0x16b   :  { %3105 = vmatpush.bf16.msrb.mxu3 %v6700_v17  ;;  %3079 = vmatpush.bf16.msrb.mxu1 %v6412_v28  ;;  %v7876_v17 = vld [vmem:[#allocation8 + $0x2f4] sm:$0xf0]  ;;  %v6239_v1 = vld [vmem:[#allocation8 + $0x3e8] sm:$0xf] }
 0x16c   :  { %3040 = vmatmul.bf16.vlgmr.msra.gmra.mxu2 %v8902_v21  ;;  %3054 = vmatmul.bf16.vlgmr.msra.gmra.mxu3 %v8904_v5  ;;  %v7908_v28 = vld [vmem:[#allocation8 + $0x3f4] sm:$0xf0]  ;;  %v5935_v39 = vld [vmem:[#allocation8 + $0x188] sm:$0xf] }
 0x16d   :  { %v7800_v26 = vld [vmem:[#allocation8 + $0x94] sm:$0xf0]  ;;  %v6079_v34 = vld [vmem:[#allocation8 + $0x2a8] sm:$0xf] }
 0x16e   :  { %3092 = vmatpush.bf16.msrb.mxu2 %v6556_v2  ;;  %3066 = vmatpush.bf16.msrb.mxu0 %v6268_v38  ;;  %v6112_v2 = vor.u32 %v7876_v17, %v6111_v46  ;;  %v5952_v38 = vor.u32 %v7836_v31, %v5951_v6  ;;  %v7832_v30 = vld [vmem:[#allocation8 + $0x194] sm:$0xf0]  ;;  %v5808_v37 = vor.u32 %v7800_v26, %v5807_v25  ;;  %v6207_v42 = vld [vmem:[#allocation8 + $0x3a8] sm:$0xf] }
 0x16f   :  { %3106 = vmatpush.bf16.msrb.mxu3 %v6684_v8  ;;  %3080 = vmatpush.bf16.msrb.mxu1 %v6396_v29  ;;  %v6240_v8 = vor.u32 %v7908_v28, %v6239_v1  ;;  %v6223_v29 = vld [vmem:[#allocation8 + $0x3c8] sm:$0xf]  ;;  %v7868_v35 = vld [vmem:[#allocation8 + $0x2b4] sm:$0xf0] }
 0x170   :  { %v7900_v63 = vld [vmem:[#allocation8 + $0x3b4] sm:$0xf0]  ;;  %v5919_v44 = vld [vmem:[#allocation8 + $0x168] sm:$0xf] }
 0x171   :  { %v7828_v47 = vld [vmem:[#allocation8 + $0x174] sm:$0xf0]  ;;  %v6063_v18 = vld [vmem:[#allocation8 + $0x288] sm:$0xf] }
 0x172   :  { %3093 = vmatpush.bf16.msrb.mxu2 %v6540_v50  ;;  %3067 = vmatpush.bf16.msrb.mxu0 %v6252_v40  ;;  %v6224_v50 = vor.u32 %v7904_v23, %v6223_v29  ;;  %v5791_v40 = vld [vmem:[#allocation8 + $0x68] sm:$0xf]  ;;  %v5920_v51 = vor.u32 %v7828_v47, %v5919_v44  ;;  %v7792_v57 = vld [vmem:[#allocation8 + $0x54] sm:$0xf0] }
 0x173   :  { %3107 = vmatpush.bf16.msrb.mxu3 %v6668_v49  ;;  %3081 = vmatpush.bf16.msrb.mxu1 %v6380_v41  ;;  %v5936_v49 = vor.u32 %v7832_v30, %v5935_v39  ;;  %v7796_v41 = vld [vmem:[#allocation8 + $0x74] sm:$0xf0]  ;;  %v6191_v36 = vld [vmem:[#allocation8 + $0x388] sm:$0xf] }
 0x174   :  { %v5792_v19 = vor.u32 %v7796_v41, %v5791_v40  ;;  %v5775_v24 = vld [vmem:[#allocation8 + $0x48] sm:$0xf]  ;;  %v7824_v60 = vld [vmem:[#allocation8 + $0x154] sm:$0xf0] }
 0x175   :  { %3068 = vmatmul.bf16.vlgmr.msrb.gmra.mxu0 %v8980_v62  ;;  %v5903_v53 = vld [vmem:[#allocation8 + $0x148] sm:$0xf]  ;;  %v5776_v1 = vor.u32 %v7792_v57, %v5775_v24  ;;  %v7788_v6 = vld [vmem:[#allocation8 + $0x34] sm:$0xf0] }
 0x176   :  { %3116 = vmatpush.bf16.msra.mxu0 %v5856_v55  ;;  %3094 = vmatpush.bf16.msrb.mxu2 %v6524_v52  ;;  %v6080_v55 = vor.u32 %v7868_v35, %v6079_v34  ;;  %v7864_v52 = vld [vmem:[#allocation8 + $0x294] sm:$0xf0]  ;;  %v5904_v28 = vor.u32 %v7824_v60, %v5903_v53  ;;  %v6175_v11 = vld [vmem:[#allocation8 + $0x368] sm:$0xf] }
 0x177   :  { %3130 = vmatpush.bf16.msra.mxu1 %v5984_v48  ;;  %3108 = vmatpush.bf16.msrb.mxu3 %v6652_v54  ;;  %v6208_v48 = vor.u32 %v7900_v63, %v6207_v42  ;;  %v7896_v54 = vld [vmem:[#allocation8 + $0x394] sm:$0xf0]  ;;  %v6064_v46 = vor.u32 %v7864_v52, %v6063_v18  ;;  %v5759_v3 = vld [vmem:[#allocation8 + $0x28] sm:$0xf] }
 0x178   :  { %3082 = vmatmul.bf16.vlgmr.msrb.gmra.mxu1 %v8982_v59  ;;  %v6192_v17 = vor.u32 %v7896_v54, %v6191_v36  ;;  %v5887_v31 = vld [vmem:[#allocation8 + $0x128] sm:$0xf]  ;;  %v7856_v15 = vld [vmem:[#allocation8 + $0x254] sm:$0xf0] }
 0x179   :  { %v6031_v16 = vld [vmem:[#allocation8 + $0x248] sm:$0xf]  ;;  %v7888_v23 = vld [vmem:[#allocation8 + $0x354] sm:$0xf0] }
 0x17a   :  { %3117 = vmatpush.bf16.msra.mxu0 %v5840_v43  ;;  %3095 = vmatpush.bf16.msrb.mxu2 %v6508_v14  ;;  %v6047_v43 = vld [vmem:[#allocation8 + $0x268] sm:$0xf]  ;;  %v7892_v14 = vld [vmem:[#allocation8 + $0x374] sm:$0xf0] }
 0x17b   :  { %3131 = vmatpush.bf16.msra.mxu1 %v5968_v0  ;;  %3109 = vmatpush.bf16.msrb.mxu3 %v6636_v7  ;;  %v7860_v0 = vld [vmem:[#allocation8 + $0x274] sm:$0xf0]  ;;  %v5743_v25 = vld [vmem:[#allocation8 + $0x8] sm:$0xf] }
 0x17c   :  { %v7820_v7 = vld [vmem:[#allocation8 + $0x134] sm:$0xf0]  ;;  %v5871_v39 = vld [vmem:[#allocation8 + $0x108] sm:$0xf] }
 0x17d   :  { %3096 = vmatmul.bf16.vlgmr.msrb.gmra.mxu2 %v8994_v22  ;;  %v5888_v29 = vor.u32 %v7820_v7, %v5887_v31  ;;  %v7784_v26 = vld [vmem:[#allocation8 + $0x14] sm:$0xf0]  ;;  %v6495_v35 = vld [vmem:[#allocation8 + $0x5e8] sm:$0xf] }
 0x17e   :  { %3144 = vmatpush.bf16.msra.mxu2 %v6112_v2  ;;  %3118 = vmatpush.bf16.msra.mxu0 %v5824_v12  ;;  %v6048_v2 = vor.u32 %v7860_v0, %v6047_v43  ;;  %v6159_v12 = vld [vmem:[#allocation8 + $0x348] sm:$0xf]  ;;  %v7816_v30 = vld [vmem:[#allocation8 + $0x114] sm:$0xf0]  ;;  %v5744_v40 = vor.u32 %v7784_v26, %v5743_v25 }
 0x17f   :  { %3158 = vmatpush.bf16.msra.mxu3 %v6240_v8  ;;  %3132 = vmatpush.bf16.msra.mxu1 %v5952_v38  ;;  %v6176_v8 = vor.u32 %v7892_v14, %v6175_v11  ;;  %v5760_v38 = vor.u32 %v7788_v6, %v5759_v3  ;;  %v7940_v34 = vld [vmem:[#allocation8 + $0x4f4] sm:$0xf0]  ;;  %v6015_v42 = vld [vmem:[#allocation8 + $0x228] sm:$0xf]  ;;  %v5872_v41 = vor.u32 %v7816_v30, %v5871_v39 }
 0x180   :  { %3110 = vmatmul.bf16.vlgmr.msrb.gmra.mxu3 %v8996_v58  ;;  %v7852_v63 = vld [vmem:[#allocation8 + $0x234] sm:$0xf0]  ;;  %v6143_v44 = vld [vmem:[#allocation8 + $0x328] sm:$0xf] }
 0x181   :  { %v7884_v47 = vld [vmem:[#allocation8 + $0x334] sm:$0xf0]  ;;  %v6351_v18 = vld [vmem:[#allocation8 + $0x4c8] sm:$0xf]  ;;  %v6016_v52 = vor.u32 %v7852_v63, %v6015_v42 }
 0x182   :  { %3145 = vmatpush.bf16.msra.mxu2 %v6096_v33  ;;  %3119 = vmatpush.bf16.msra.mxu0 %v5808_v37  ;;  %v6367_v33 = vld [vmem:[#allocation8 + $0x4e8] sm:$0xf]  ;;  %v7972_v37 = vld [vmem:[#allocation8 + $0x5f4] sm:$0xf0]  ;;  %v6144_v54 = vor.u32 %v7884_v47, %v6143_v44 }
 0x183   :  { %3159 = vmatpush.bf16.msra.mxu3 %v6224_v50  ;;  %3133 = vmatpush.bf16.msra.mxu1 %v5936_v49  ;;  %v6032_v50 = vor.u32 %v7856_v15, %v6031_v16  ;;  %v6160_v49 = vor.u32 %v7888_v23, %v6159_v12  ;;  %v7968_v36 = vld [vmem:[#allocation8 + $0x5d4] sm:$0xf0]  ;;  %v5999_v24 = vld [vmem:[#allocation8 + $0x208] sm:$0xf] }
 0x184   :  { %v7848_v57 = vld [vmem:[#allocation8 + $0x214] sm:$0xf0]  ;;  %v6127_v53 = vld [vmem:[#allocation8 + $0x308] sm:$0xf] }
 0x185   :  { %v7880_v60 = vld [vmem:[#allocation8 + $0x314] sm:$0xf0]  ;;  %v6000_v11 = vor.u32 %v7848_v57, %v5999_v24  ;;  %v6335_v14 = vld [vmem:[#allocation8 + $0x4a8] sm:$0xf] }
 0x186   :  { %3146 = vmatpush.bf16.msra.mxu2 %v6080_v55  ;;  %3120 = vmatpush.bf16.msra.mxu0 %v5792_v19  ;;  %v6368_v55 = vor.u32 %v7940_v34, %v6367_v33  ;;  %v7936_v19 = vld [vmem:[#allocation8 + $0x4d4] sm:$0xf0]  ;;  %v6128_v6 = vor.u32 %v7880_v60, %v6127_v53  ;;  %v6463_v7 = vld [vmem:[#allocation8 + $0x5a8] sm:$0xf] }
 0x187   :  { %3160 = vmatpush.bf16.msra.mxu3 %v6208_v48  ;;  %3134 = vmatpush.bf16.msra.mxu1 %v5920_v51  ;;  %v6496_v48 = vor.u32 %v7972_v37, %v6495_v35  ;;  %v6479_v51 = vld [vmem:[#allocation8 + $0x5c8] sm:$0xf]  ;;  %v6352_v43 = vor.u32 %v7936_v19, %v6351_v18  ;;  %v7932_v3 = vld [vmem:[#allocation8 + $0x4b4] sm:$0xf0] }
 0x188   :  { %v6480_v0 = vor.u32 %v7968_v36, %v6479_v51  ;;  %v6607_v16 = vld [vmem:[#allocation8 + $0x6c8] sm:$0xf]  ;;  %v8000_v15 = vld [vmem:[#allocation8 + $0x6d4] sm:$0xf0]  ;;  %v6336_v12 = vor.u32 %v7932_v3, %v6335_v14 }
 0x189   :  { %v6319_v25 = vld [vmem:[#allocation8 + $0x488] sm:$0xf]  ;;  %v7928_v26 = vld [vmem:[#allocation8 + $0x494] sm:$0xf0]  ;;  %v6608_v39 = vor.u32 %v8000_v15, %v6607_v16 }
 0x18a   :  { %3147 = vmatpush.bf16.msra.mxu2 %v6064_v46  ;;  %3121 = vmatpush.bf16.msra.mxu0 %v5776_v1  ;;  %v6623_v46 = vld [vmem:[#allocation8 + $0x6e8] sm:$0xf]  ;;  %v7960_v33 = vld [vmem:[#allocation8 + $0x594] sm:$0xf0]  ;;  %v6320_v37 = vor.u32 %v7928_v26, %v6319_v25 }
 0x18b   :  { %3161 = vmatpush.bf16.msra.mxu3 %v6192_v17  ;;  %3135 = vmatpush.bf16.msra.mxu1 %v5904_v28  ;;  %v8004_v17 = vld [vmem:[#allocation8 + $0x6f4] sm:$0xf0]  ;;  %v6751_v1 = vld [vmem:[#allocation8 + $0x7e8] sm:$0xf] }
 0x18c   :  { %v8036_v28 = vld [vmem:[#allocation8 + $0x7f4] sm:$0xf0]  ;;  %v6624_v31 = vor.u32 %v8004_v17, %v6623_v46  ;;  %v6447_v30 = vld [vmem:[#allocation8 + $0x588] sm:$0xf] }
 0x18d   :  { %v6591_v34 = vld [vmem:[#allocation8 + $0x6a8] sm:$0xf]  ;;  %v7996_v35 = vld [vmem:[#allocation8 + $0x6b4] sm:$0xf0]  ;;  %v6448_v63 = vor.u32 %v7960_v33, %v6447_v30 }
 0x18e   :  { %3148 = vmatpush.bf16.msra.mxu2 %v6048_v2  ;;  %3122 = vmatpush.bf16.msra.mxu0 %v5760_v38  ;;  %v7964_v2 = vld [vmem:[#allocation8 + $0x5b4] sm:$0xf0]  ;;  %v6735_v38 = vld [vmem:[#allocation8 + $0x7c8] sm:$0xf]  ;;  %v6592_v44 = vor.u32 %v7996_v35, %v6591_v34  ;;  %v5857_v34 = vld [vmem:[#allocation8 + $0xf8] sm:$0xf0] }
 0x18f   :  { %3162 = vmatpush.bf16.msra.mxu3 %v6176_v8  ;;  %3136 = vmatpush.bf16.msra.mxu1 %v5888_v29  ;;  %v6752_v8 = vor.u32 %v8036_v28, %v6751_v1  ;;  %v8032_v29 = vld [vmem:[#allocation8 + $0x7d4] sm:$0xf0]  ;;  %v6464_v23 = vor.u32 %v7964_v2, %v6463_v7  ;;  %v6431_v47 = vld [vmem:[#allocation8 + $0x568] sm:$0xf]  ;;  %v7842_v35 = vld [vmem:[#allocation8 + $0x1ec] sm:$0xf] }
 0x190   :  { %v8028_v42 = vld [vmem:[#allocation8 + $0x7b4] sm:$0xf0]  ;;  %v6575_v18 = vld [vmem:[#allocation8 + $0x688] sm:$0xf] }
 0x191   :  { %v6703_v51 = vld [vmem:[#allocation8 + $0x788] sm:$0xf]  ;;  %v8024_v36 = vld [vmem:[#allocation8 + $0x794] sm:$0xf0] }
 0x192   :  { %3149 = vmatpush.bf16.msra.mxu2 %v6032_v50  ;;  %3123 = vmatpush.bf16.msra.mxu0 %v5744_v40  ;;  %v6736_v50 = vor.u32 %v8032_v29, %v6735_v38  ;;  %v6303_v40 = vld [vmem:[#allocation8 + $0x468] sm:$0xf]  ;;  %v7920_v57 = vld [vmem:[#allocation8 + $0x454] sm:$0xf0]  ;;  %v6704_v17 = vor.u32 %v8024_v36, %v6703_v51  ;;  %v7838_v51 = vld [vmem:[#allocation8 + $0x1cc] sm:$0xf] }
 0x193   :  { %3163 = vmatpush.bf16.msra.mxu3 %v6160_v49  ;;  %3137 = vmatpush.bf16.msra.mxu1 %v5872_v41  ;;  %v6719_v49 = vld [vmem:[#allocation8 + $0x7a8] sm:$0xf]  ;;  %v7924_v41 = vld [vmem:[#allocation8 + $0x474] sm:$0xf0]  ;;  %v5969_v36 = vld [vmem:[#allocation8 + $0x1d8] sm:$0xf0] }
 0x194   :  { %v6304_v19 = vor.u32 %v7924_v41, %v6303_v40  ;;  %v6287_v24 = vld [vmem:[#allocation8 + $0x448] sm:$0xf]  ;;  %v7952_v46 = vld [vmem:[#allocation8 + $0x554] sm:$0xf0] }
 0x195   :  { %3124 = vmatmul.bf16.vlgmr.msra.gmra.mxu0 %v8891_v20  ;;  %v6415_v60 = vld [vmem:[#allocation8 + $0x548] sm:$0xf]  ;;  %v6288_v1 = vor.u32 %v7920_v57, %v6287_v24  ;;  %v7948_v2 = vld [vmem:[#allocation8 + $0x534] sm:$0xf0] }
 0x196   :  { %3172 = vmatpush.bf16.msrb.mxu0 %v6368_v55  ;;  %3150 = vmatpush.bf16.msra.mxu2 %v6016_v52  ;;  %v7956_v55 = vld [vmem:[#allocation8 + $0x574] sm:$0xf0]  ;;  %v6687_v28 = vld [vmem:[#allocation8 + $0x768] sm:$0xf]  ;;  %v6416_v14 = vor.u32 %v7952_v46, %v6415_v60  ;;  %v7874_v46 = vld [vmem:[#allocation8 + $0x2ec] sm:$0xf] }
 0x197   :  { %3186 = vmatpush.bf16.msrb.mxu1 %v6496_v48  ;;  %3164 = vmatpush.bf16.msra.mxu3 %v6144_v54  ;;  %v6720_v48 = vor.u32 %v8028_v42, %v6719_v49  ;;  %v7992_v52 = vld [vmem:[#allocation8 + $0x694] sm:$0xf0]  ;;  %v6432_v54 = vor.u32 %v7956_v55, %v6431_v47  ;;  %v6271_v3 = vld [vmem:[#allocation8 + $0x428] sm:$0xf]  ;;  %v5985_v49 = vld [vmem:[#allocation8 + $0x1f8] sm:$0xf0] }
 0x198   :  { %3138 = vmatmul.bf16.vlgmr.msra.gmra.mxu1 %v8893_v32  ;;  %v6576_v53 = vor.u32 %v7992_v52, %v6575_v18  ;;  %v6399_v7 = vld [vmem:[#allocation8 + $0x528] sm:$0xf]  ;;  %v7984_v15 = vld [vmem:[#allocation8 + $0x654] sm:$0xf0]  ;;  %v5988_v18 = vor.u32 %v7842_v35, %v5985_v49  ;;  %v6081_v35 = vld [vmem:[#allocation8 + $0x2b8] sm:$0xf0] }
 0x199   :  { %v6543_v16 = vld [vmem:[#allocation8 + $0x648] sm:$0xf]  ;;  %v8016_v29 = vld [vmem:[#allocation8 + $0x754] sm:$0xf0]  ;;  %v6400_v25 = vor.u32 %v7948_v2, %v6399_v7  ;;  %v7834_v7 = vld [vmem:[#allocation8 + $0x1ac] sm:$0xf] }
 0x19a   :  { %3173 = vmatpush.bf16.msrb.mxu0 %v6352_v43  ;;  %3151 = vmatpush.bf16.msra.mxu2 %v6000_v11  ;;  %v6559_v43 = vld [vmem:[#allocation8 + $0x668] sm:$0xf]  ;;  %v8020_v11 = vld [vmem:[#allocation8 + $0x774] sm:$0xf0]  ;;  %v6544_v33 = vor.u32 %v7984_v15, %v6543_v16  ;;  %v5953_v2 = vld [vmem:[#allocation8 + $0x1b8] sm:$0xf0] }
 0x19b   :  { %3187 = vmatpush.bf16.msrb.mxu1 %v6480_v0  ;;  %3165 = vmatpush.bf16.msra.mxu3 %v6128_v6  ;;  %v7988_v0 = vld [vmem:[#allocation8 + $0x674] sm:$0xf0]  ;;  %v6671_v38 = vld [vmem:[#allocation8 + $0x748] sm:$0xf]  ;;  %v7870_v16 = vld [vmem:[#allocation8 + $0x2cc] sm:$0xf] }
 0x19c   :  { %v7916_v6 = vld [vmem:[#allocation8 + $0x434] sm:$0xf0]  ;;  %v6527_v42 = vld [vmem:[#allocation8 + $0x628] sm:$0xf]  ;;  %v6097_v15 = vld [vmem:[#allocation8 + $0x2d8] sm:$0xf0] }
 0x19d   :  { %3152 = vmatmul.bf16.vlgmr.msra.gmra.mxu2 %v8902_v21  ;;  %v7912_v26 = vld [vmem:[#allocation8 + $0x414] sm:$0xf0]  ;;  %v6655_v41 = vld [vmem:[#allocation8 + $0x728] sm:$0xf]  ;;  %v7898_v49 = vld [vmem:[#allocation8 + $0x3ac] sm:$0xf] }
 0x19e   :  { %3200 = vmatpush.bf16.msrb.mxu2 %v6624_v31  ;;  %3174 = vmatpush.bf16.msrb.mxu0 %v6336_v12  ;;  %v6560_v31 = vor.u32 %v7988_v0, %v6559_v43  ;;  %v6272_v12 = vor.u32 %v7916_v6, %v6271_v3  ;;  %v7944_v30 = vld [vmem:[#allocation8 + $0x514] sm:$0xf0]  ;;  %v6511_v24 = vld [vmem:[#allocation8 + $0x608] sm:$0xf]  ;;  %v7906_v0 = vld [vmem:[#allocation8 + $0x3ec] sm:$0xf] }
 0x19f   :  { %3214 = vmatpush.bf16.msrb.mxu3 %v6752_v8  ;;  %3188 = vmatpush.bf16.msrb.mxu1 %v6464_v23  ;;  %v6688_v8 = vor.u32 %v8020_v11, %v6687_v28  ;;  %v6255_v23 = vld [vmem:[#allocation8 + $0x408] sm:$0xf]  ;;  %v7976_v57 = vld [vmem:[#allocation8 + $0x614] sm:$0xf0]  ;;  %v5972_v28 = vor.u32 %v7838_v51, %v5969_v36  ;;  %v5825_v3 = vld [vmem:[#allocation8 + $0xb8] sm:$0xf0] }
 0x1a0   :  { %3166 = vmatmul.bf16.vlgmr.msra.gmra.mxu3 %v8904_v5  ;;  %v6256_v40 = vor.u32 %v7912_v26, %v6255_v23  ;;  %v8008_v60 = vld [vmem:[#allocation8 + $0x714] sm:$0xf0]  ;;  %v6512_v11 = vor.u32 %v7976_v57, %v6511_v24  ;;  %v5956_v23 = vor.u32 %v7834_v7, %v5953_v2  ;;  %v5809_v26 = vld [vmem:[#allocation8 + $0x98] sm:$0xf0]  ;;  %v7894_v51 = vld [vmem:[#allocation8 + $0x38c] sm:$0xf] }
 0x1a1   :  { %v6193_v36 = vld [vmem:[#allocation8 + $0x398] sm:$0xf0]  ;;  %v7790_v24 = vld [vmem:[#allocation8 + $0x4c] sm:$0xf] }
 0x1a2   :  { %3201 = vmatpush.bf16.msrb.mxu2 %v6608_v39  ;;  %3175 = vmatpush.bf16.msrb.mxu0 %v6320_v37  ;;  %v6383_v39 = vld [vmem:[#allocation8 + $0x508] sm:$0xf]  ;;  %v6672_v37 = vor.u32 %v8016_v29, %v6671_v38  ;;  %v7902_v38 = vld [vmem:[#allocation8 + $0x3cc] sm:$0xf]  ;;  %v6225_v29 = vld [vmem:[#allocation8 + $0x3d8] sm:$0xf0] }
 0x1a3   :  { %3215 = vmatpush.bf16.msrb.mxu3 %v6736_v50  ;;  %3189 = vmatpush.bf16.msrb.mxu1 %v6448_v63  ;;  %v7810_v50 = vld [vmem:[#allocation8 + $0xec] sm:$0xf]  ;;  %v7980_v63 = vld [vmem:[#allocation8 + $0x634] sm:$0xf0]  ;;  %v6384_v47 = vor.u32 %v7944_v30, %v6383_v39  ;;  %v6100_v39 = vor.u32 %v7870_v16, %v6097_v15  ;;  %v5777_v57 = vld [vmem:[#allocation8 + $0x58] sm:$0xf0] }
 0x1a4   :  { %v5860_v55 = vor.u32 %v7810_v50, %v5857_v34  ;;  %v6528_v52 = vor.u32 %v7980_v63, %v6527_v42  ;;  %v7830_v30 = vld [vmem:[#allocation8 + $0x18c] sm:$0xf]  ;;  %v6228_v50 = vor.u32 %v7902_v38, %v6225_v29  ;;  %v6209_v42 = vld [vmem:[#allocation8 + $0x3b8] sm:$0xf0] }
 0x1a5   :  { %v7866_v34 = vld [vmem:[#allocation8 + $0x2ac] sm:$0xf] }
 0x1a6   :  { %3202 = vmatpush.bf16.msrb.mxu2 %v6592_v44  ;;  %3176 = vmatpush.bf16.msrb.mxu0 %v6304_v19  ;;  %v8012_v44 = vld [vmem:[#allocation8 + $0x734] sm:$0xf0]  ;;  %v5841_v19 = vld [vmem:[#allocation8 + $0xd8] sm:$0xf0]  ;;  %v7818_v2 = vld [vmem:[#allocation8 + $0x12c] sm:$0xf] }
 0x1a7   :  { %3216 = vmatpush.bf16.msrb.mxu3 %v6720_v48  ;;  %3190 = vmatpush.bf16.msrb.mxu1 %v6432_v54  ;;  %v7806_v48 = vld [vmem:[#allocation8 + $0xcc] sm:$0xf]  ;;  %v6656_v54 = vor.u32 %v8012_v44, %v6655_v41  ;;  %v5793_v41 = vld [vmem:[#allocation8 + $0x78] sm:$0xf0]  ;;  %v6084_v44 = vor.u32 %v7866_v34, %v6081_v35 }
 0x1a8   :  { %v5844_v43 = vor.u32 %v7806_v48, %v5841_v19  ;;  %v6212_v48 = vor.u32 %v7898_v49, %v6209_v42  ;;  %v7854_v15 = vld [vmem:[#allocation8 + $0x24c] sm:$0xf] }
 0x1a9   :  { %v7938_v35 = vld [vmem:[#allocation8 + $0x4ec] sm:$0xf] }
 0x1aa   :  { %3203 = vmatpush.bf16.msrb.mxu2 %v6576_v53  ;;  %3177 = vmatpush.bf16.msrb.mxu0 %v6288_v1  ;;  %v6639_v53 = vld [vmem:[#allocation8 + $0x708] sm:$0xf]  ;;  %v6241_v1 = vld [vmem:[#allocation8 + $0x3f8] sm:$0xf0]  ;;  %v7970_v49 = vld [vmem:[#allocation8 + $0x5ec] sm:$0xf] }
 0x1ab   :  { %3217 = vmatpush.bf16.msrb.mxu3 %v6704_v17  ;;  %3191 = vmatpush.bf16.msrb.mxu1 %v6416_v14  ;;  %v6113_v17 = vld [vmem:[#allocation8 + $0x2f8] sm:$0xf0]  ;;  %v7802_v14 = vld [vmem:[#allocation8 + $0xac] sm:$0xf]  ;;  %v6640_v6 = vor.u32 %v8008_v60, %v6639_v53 }
 0x1ac   :  { %v7822_v60 = vld [vmem:[#allocation8 + $0x14c] sm:$0xf] }
 0x1ae   :  { %3204 = vmatpush.bf16.msrb.mxu2 %v6560_v31  ;;  %3178 = vmatpush.bf16.msrb.mxu0 %v6272_v12  ;;  %v6116_v31 = vor.u32 %v7874_v46, %v6113_v17  ;;  %v5828_v12 = vor.u32 %v7802_v14, %v5825_v3  ;;  %v5905_v46 = vld [vmem:[#allocation8 + $0x158] sm:$0xf0]  ;;  %v6196_v17 = vor.u32 %v7894_v51, %v6193_v36  ;;  %v7786_v3 = vld [vmem:[#allocation8 + $0x2c] sm:$0xf] }
 0x1af   :  { %3218 = vmatpush.bf16.msrb.mxu3 %v6688_v8  ;;  %3192 = vmatpush.bf16.msrb.mxu1 %v6400_v25  ;;  %v6244_v8 = vor.u32 %v7906_v0, %v6241_v1  ;;  %v7798_v25 = vld [vmem:[#allocation8 + $0x8c] sm:$0xf]  ;;  %v6049_v0 = vld [vmem:[#allocation8 + $0x278] sm:$0xf0]  ;;  %v5780_v1 = vor.u32 %v7790_v24, %v5777_v57  ;;  %v5908_v14 = vor.u32 %v7822_v60, %v5905_v46 }
 0x1b0   :  { %v6353_v36 = vld [vmem:[#allocation8 + $0x4d8] sm:$0xf0]  ;;  %v7878_v46 = vld [vmem:[#allocation8 + $0x30c] sm:$0xf] }
 0x1b1   :  { %v6481_v24 = vld [vmem:[#allocation8 + $0x5d8] sm:$0xf0] }
 0x1b2   :  { %3205 = vmatpush.bf16.msrb.mxu2 %v6544_v33  ;;  %3179 = vmatpush.bf16.msrb.mxu0 %v6256_v40  ;;  %v5937_v33 = vld [vmem:[#allocation8 + $0x198] sm:$0xf0]  ;;  %v7794_v40 = vld [vmem:[#allocation8 + $0x6c] sm:$0xf]  ;;  %v9018_v38 = vpop.f32.mrf.mxu1 }
 0x1b3   :  { %3219 = vmatpush.bf16.msrb.mxu3 %v6672_v37  ;;  %3193 = vmatpush.bf16.msrb.mxu1 %v6384_v47  ;;  %v5812_v37 = vor.u32 %v7798_v25, %v5809_v26  ;;  %v5940_v63 = vor.u32 %v7830_v30, %v5937_v33  ;;  %v7826_v47 = vld [vmem:[#allocation8 + $0x16c] sm:$0xf]  ;;  %v5796_v19 = vor.u32 %v7794_v40, %v5793_v41  ;;  %v6161_v25 = vld [vmem:[#allocation8 + $0x358] sm:$0xf0] }
 0x1b4   :  { %v7782_v26 = vld [vmem:[#allocation8 + $0xc] sm:$0xf]  ;;  %v5745_v30 = vld [vmem:[#allocation8 + $0x18] sm:$0xf0] }
 0x1b5   :  { %3180 = vmatmul.bf16.vlgmr.msrb.gmra.mxu0 %v8980_v62  ;;  %v7814_v33 = vld [vmem:[#allocation8 + $0x10c] sm:$0xf]  ;;  %v6017_v41 = vld [vmem:[#allocation8 + $0x238] sm:$0xf0] }
 0x1b6   :  { %3228 = vmatpush.bf16.msra.mxu0 %v5860_v55  ;;  %3206 = vmatpush.bf16.msrb.mxu2 %v6528_v52  ;;  %v5921_v55 = vld [vmem:[#allocation8 + $0x178] sm:$0xf0]  ;;  %v7850_v40 = vld [vmem:[#allocation8 + $0x22c] sm:$0xf] }
 0x1b7   :  { %3242 = vmatpush.bf16.msra.mxu1 %v5988_v18  ;;  %3220 = vmatpush.bf16.msrb.mxu3 %v6656_v54  ;;  %v7862_v18 = vld [vmem:[#allocation8 + $0x28c] sm:$0xf]  ;;  %v6065_v52 = vld [vmem:[#allocation8 + $0x298] sm:$0xf0]  ;;  %v5924_v54 = vor.u32 %v7826_v47, %v5921_v55  ;;  %v6020_v51 = vor.u32 %v7850_v40, %v6017_v41 }
 0x1b8   :  { %3194 = vmatmul.bf16.vlgmr.msrb.gmra.mxu1 %v8982_v59  ;;  %v6068_v53 = vor.u32 %v7862_v18, %v6065_v52  ;;  %v7882_v47 = vld [vmem:[#allocation8 + $0x32c] sm:$0xf]  ;;  %v6145_v55 = vld [vmem:[#allocation8 + $0x338] sm:$0xf0] }
 0x1b9   :  { %v7934_v52 = vld [vmem:[#allocation8 + $0x4cc] sm:$0xf]  ;;  %v6148_v57 = vor.u32 %v7882_v47, %v6145_v55  ;;  %v6001_v60 = vld [vmem:[#allocation8 + $0x218] sm:$0xf0] }
 0x1ba   :  { %3229 = vmatpush.bf16.msra.mxu0 %v5844_v43  ;;  %3207 = vmatpush.bf16.msrb.mxu2 %v6512_v11  ;;  %v7858_v43 = vld [vmem:[#allocation8 + $0x26c] sm:$0xf]  ;;  %v6177_v11 = vld [vmem:[#allocation8 + $0x378] sm:$0xf0] }
 0x1bb   :  { %3243 = vmatpush.bf16.msra.mxu1 %v5972_v28  ;;  %3221 = vmatpush.bf16.msrb.mxu3 %v6640_v6  ;;  %v7890_v28 = vld [vmem:[#allocation8 + $0x36c] sm:$0xf]  ;;  %v5761_v6 = vld [vmem:[#allocation8 + $0x38] sm:$0xf0]  ;;  %v6052_v7 = vor.u32 %v7858_v43, %v6049_v0 }
 0x1bc   :  { %v6180_v16 = vor.u32 %v7890_v28, %v6177_v11  ;;  %v5764_v29 = vor.u32 %v7786_v3, %v5761_v6  ;;  %v6129_v43 = vld [vmem:[#allocation8 + $0x318] sm:$0xf0]  ;;  %v8002_v0 = vld [vmem:[#allocation8 + $0x6ec] sm:$0xf]  ;;  %v6356_v28 = vor.u32 %v7934_v52, %v6353_v36  ;;  %v9022_v3 = vpop.f32.mrf.mxu1 }
 0x1bd   :  { %3208 = vmatmul.bf16.vlgmr.msrb.gmra.mxu2 %v8994_v22  ;;  %v8034_v11 = vld [vmem:[#allocation8 + $0x7ec] sm:$0xf] }
 0x1be   :  { %3256 = vmatpush.bf16.msra.mxu2 %v6116_v31  ;;  %3230 = vmatpush.bf16.msra.mxu0 %v5828_v12  ;;  %v9016_v31 = vpop.f32.mrf.mxu0  ;;  %v6033_v12 = vld [vmem:[#allocation8 + $0x258] sm:$0xf0]  ;;  %v7994_v41 = vld [vmem:[#allocation8 + $0x6ac] sm:$0xf] }
 0x1bf   :  { %3270 = vmatpush.bf16.msra.mxu3 %v6244_v8  ;;  %3244 = vmatpush.bf16.msra.mxu1 %v5956_v23  ;;  %v5889_v8 = vld [vmem:[#allocation8 + $0x138] sm:$0xf0]  ;;  %v7886_v23 = vld [vmem:[#allocation8 + $0x34c] sm:$0xf]  ;;  %v6036_v34 = vor.u32 %v7854_v15, %v6033_v12  ;;  %v6132_v15 = vor.u32 %v7878_v46, %v6129_v43 }
 0x1c0   :  { %3222 = vmatmul.bf16.vlgmr.msrb.gmra.mxu3 %v8996_v58  ;;  %v6164_v42 = vor.u32 %v7886_v23, %v6161_v25  ;;  %v6465_v23 = vld [vmem:[#allocation8 + $0x5b8] sm:$0xf0]  ;;  %v9027_v25 = vpop.f32.mrf.mxu3  ;;  %v8026_v55 = vld [vmem:[#allocation8 + $0x7ac] sm:$0xf] }
 0x1c1   :  { %v8022_v43 = vld [vmem:[#allocation8 + $0x78c] sm:$0xf] }
 0x1c2   :  { %3257 = vmatpush.bf16.msra.mxu2 %v6100_v39  ;;  %3231 = vmatpush.bf16.msra.mxu0 %v5812_v37  ;;  %v5892_v39 = vor.u32 %v7818_v2, %v5889_v8  ;;  %v6369_v37 = vld [vmem:[#allocation8 + $0x4f8] sm:$0xf0]  ;;  %v7930_v2 = vld [vmem:[#allocation8 + $0x4ac] sm:$0xf] }
 0x1c3   :  { %3271 = vmatpush.bf16.msra.mxu3 %v6228_v50  ;;  %3245 = vmatpush.bf16.msra.mxu1 %v5940_v63  ;;  %v5873_v50 = vld [vmem:[#allocation8 + $0x118] sm:$0xf0]  ;;  %v6372_v18 = vor.u32 %v7938_v35, %v6369_v37  ;;  %v7926_v37 = vld [vmem:[#allocation8 + $0x48c] sm:$0xf] }
 0x1c4   :  { %v6497_v63 = vld [vmem:[#allocation8 + $0x5f8] sm:$0xf0] }
 0x1c5   :  { %v6337_v8 = vld [vmem:[#allocation8 + $0x4b8] sm:$0xf0] }
 0x1c6   :  { %3258 = vmatpush.bf16.msra.mxu2 %v6084_v44  ;;  %3232 = vmatpush.bf16.msra.mxu0 %v5796_v19  ;;  %v5748_v44 = vor.u32 %v7782_v26, %v5745_v30  ;;  %v6500_v19 = vor.u32 %v7970_v49, %v6497_v63  ;;  %v6609_v30 = vld [vmem:[#allocation8 + $0x6d8] sm:$0xf0] }
 0x1c7   :  { %3272 = vmatpush.bf16.msra.mxu3 %v6212_v48  ;;  %3246 = vmatpush.bf16.msra.mxu1 %v5924_v54  ;;  %v5876_v48 = vor.u32 %v7814_v33, %v5873_v50  ;;  %v7966_v54 = vld [vmem:[#allocation8 + $0x5cc] sm:$0xf]  ;;  %v6340_v33 = vor.u32 %v7930_v2, %v6337_v8  ;;  %v6449_v63 = vld [vmem:[#allocation8 + $0x598] sm:$0xf0] }
 0x1c8   :  { %v6484_v6 = vor.u32 %v7966_v54, %v6481_v24  ;;  %v8030_v50 = vld [vmem:[#allocation8 + $0x7cc] sm:$0xf]  ;;  %v6433_v24 = vld [vmem:[#allocation8 + $0x578] sm:$0xf0] }
 0x1c9   :  { %v7954_v54 = vld [vmem:[#allocation8 + $0x56c] sm:$0xf] }
 0x1ca   :  { %3259 = vmatpush.bf16.msra.mxu2 %v6068_v53  ;;  %3233 = vmatpush.bf16.msra.mxu0 %v5780_v1  ;;  %v7846_v53 = vld [vmem:[#allocation8 + $0x20c] sm:$0xf]  ;;  %v6625_v1 = vld [vmem:[#allocation8 + $0x6f8] sm:$0xf0] }
 0x1cb   :  { %3273 = vmatpush.bf16.msra.mxu3 %v6196_v17  ;;  %3247 = vmatpush.bf16.msra.mxu1 %v5908_v14  ;;  %v9020_v17 = vpop.f32.mrf.mxu0  ;;  %v6753_v14 = vld [vmem:[#allocation8 + $0x7f8] sm:$0xf0]  ;;  %v6628_v12 = vor.u32 %v8002_v0, %v6625_v1  ;;  %v9038_v0 = vpop.f32.mrf.mxu3  ;;  %v6436_v1 = vor.u32 %v7954_v54, %v6433_v24  ;;  %v6815_v24 = vld [vmem:[#allocation11 + $0x70] sm:$0xf] }
 0x1cc   :  { %v6756_v26 = vor.u32 %v8034_v11, %v6753_v14  ;;  %v6289_v11 = vld [vmem:[#allocation8 + $0x458] sm:$0xf0] }
 0x1ce   :  { %3260 = vmatpush.bf16.msra.mxu2 %v6052_v7  ;;  %3234 = vmatpush.bf16.msra.mxu0 %v5764_v29  ;;  %v6004_v7 = vor.u32 %v7846_v53, %v6001_v60  ;;  %v7962_v29 = vld [vmem:[#allocation8 + $0x5ac] sm:$0xf] }
 0x1cf   :  { %3274 = vmatpush.bf16.msra.mxu3 %v6180_v16  ;;  %3248 = vmatpush.bf16.msra.mxu1 %v5892_v39  ;;  %v9024_v16 = vpop.f32.mrf.mxu2  ;;  %v7998_v39 = vld [vmem:[#allocation8 + $0x6cc] sm:$0xf]  ;;  %v6468_v35 = vor.u32 %v7962_v29, %v6465_v23 }
 0x1d0   :  { %v6612_v49 = vor.u32 %v7998_v39, %v6609_v30  ;;  %v7990_v53 = vld [vmem:[#allocation8 + $0x68c] sm:$0xf] }
 0x1d1   :  { %v8018_v23 = vld [vmem:[#allocation8 + $0x76c] sm:$0xf] }
 0x1d2   :  { %3261 = vmatpush.bf16.msra.mxu2 %v6036_v34  ;;  %3235 = vmatpush.bf16.msra.mxu0 %v5748_v44  ;;  %v6737_v34 = vld [vmem:[#allocation8 + $0x7d8] sm:$0xf0]  ;;  %v7914_v30 = vld [vmem:[#allocation8 + $0x42c] sm:$0xf] }
 0x1d3   :  { %3275 = vmatpush.bf16.msra.mxu3 %v6164_v42  ;;  %3249 = vmatpush.bf16.msra.mxu1 %v5876_v48  ;;  %v7958_v42 = vld [vmem:[#allocation8 + $0x58c] sm:$0xf]  ;;  %v9030_v40 = vpop.f32.mrf.mxu0  ;;  %v6593_v44 = vld [vmem:[#allocation8 + $0x6b8] sm:$0xf0] }
 0x1d4   :  { %v6721_v48 = vld [vmem:[#allocation8 + $0x7b8] sm:$0xf0]  ;;  %v6452_v52 = vor.u32 %v7958_v42, %v6449_v63  ;;  %v6596_v36 = vor.u32 %v7994_v41, %v6593_v44  ;;  %v9044_v63 = vld [vmem:[#allocation10] sm:$0xf]  ;;  %v8014_v44 = vld [vmem:[#allocation8 + $0x74c] sm:$0xf] }
 0x1d5   :  { %3236 = vmatmul.bf16.vlgmr.msra.gmra.mxu0 %v8891_v20  ;;  %v6321_v20 = vld [vmem:[#allocation8 + $0x498] sm:$0xf0] }
 0x1d6   :  { %3284 = vmatpush.bf16.msrb.mxu0 %v6372_v18  ;;  %3262 = vmatpush.bf16.msra.mxu2 %v6020_v51  ;;  %v6324_v47 = vor.u32 %v7926_v37, %v6321_v20  ;;  %v9034_v18 = vpop.f32.mrf.mxu1  ;;  %v6305_v51 = vld [vmem:[#allocation8 + $0x478] sm:$0xf0] }
 0x1d7   :  { %3298 = vmatpush.bf16.msrb.mxu1 %v6500_v19  ;;  %3276 = vmatpush.bf16.msra.mxu3 %v6148_v57  ;;  %v7922_v19 = vld [vmem:[#allocation8 + $0x46c] sm:$0xf]  ;;  %v6724_v57 = vor.u32 %v8026_v55, %v6721_v48  ;;  %v9036_v60 = vpop.f32.mrf.mxu2  ;;  %v6545_v42 = vld [vmem:[#allocation8 + $0x658] sm:$0xf0] }
 0x1d8   :  { %3250 = vmatmul.bf16.vlgmr.msra.gmra.mxu1 %v8893_v32  ;;  %v6740_v32 = vor.u32 %v8030_v50, %v6737_v34  ;;  %v6308_v46 = vor.u32 %v7922_v19, %v6305_v51  ;;  %v7946_v34 = vld [vmem:[#allocation8 + $0x52c] sm:$0xf]  ;;  %v6257_v19 = vld [vmem:[#allocation8 + $0x418] sm:$0xf0] }
 0x1d9   :  { %v7910_v55 = vld [vmem:[#allocation8 + $0x40c] sm:$0xf] }
 0x1da   :  { %3285 = vmatpush.bf16.msrb.mxu0 %v6356_v28  ;;  %3263 = vmatpush.bf16.msra.mxu2 %v6004_v7  ;;  %v7918_v28 = vld [vmem:[#allocation8 + $0x44c] sm:$0xf]  ;;  %v6417_v7 = vld [vmem:[#allocation8 + $0x558] sm:$0xf0] }
 0x1db   :  { %3299 = vmatpush.bf16.msrb.mxu1 %v6484_v6  ;;  %3277 = vmatpush.bf16.msra.mxu3 %v6132_v15  ;;  %v7950_v6 = vld [vmem:[#allocation8 + $0x54c] sm:$0xf]  ;;  %v9040_v2 = vpop.f32.mrf.mxu0  ;;  %v6292_v29 = vor.u32 %v7918_v28, %v6289_v11  ;;  %v6260_v28 = vor.u32 %v7910_v55, %v6257_v19  ;;  %v6799_v19 = vld [vmem:[#allocation11 + $0x50] sm:$0xf] }
 0x1dc   :  { %v7986_v15 = vld [vmem:[#allocation8 + $0x66c] sm:$0xf]  ;;  %v6420_v39 = vor.u32 %v7950_v6, %v6417_v7  ;;  %v1604_v6 = vperm.slane %v9044_v63, 0 }
 0x1dd   :  { %3264 = vmatmul.bf16.vlgmr.msra.gmra.mxu2 %v8902_v21  ;;  %v6577_v21 = vld [vmem:[#allocation8 + $0x698] sm:$0xf0]  ;;  %v7942_v51 = vld [vmem:[#allocation8 + $0x50c] sm:$0xf] }
 0x1de   :  { %3312 = vmatpush.bf16.msrb.mxu2 %v6628_v12  ;;  %3286 = vmatpush.bf16.msrb.mxu0 %v6340_v33  ;;  %v6580_v14 = vor.u32 %v7990_v53, %v6577_v21  ;;  %v6561_v12 = vld [vmem:[#allocation8 + $0x678] sm:$0xf0]  ;;  %v9042_v37 = vpop.f32.mrf.mxu1  ;;  %v6879_v53 = vld [vmem:[#allocation11 + $0xf0] sm:$0xf]  ;;  %v8010_v11 = vld [vmem:[#allocation8 + $0x72c] sm:$0xf] }
 0x1df   :  { %3326 = vmatpush.bf16.msrb.mxu3 %v6756_v26  ;;  %3300 = vmatpush.bf16.msrb.mxu1 %v6468_v35  ;;  %v6689_v26 = vld [vmem:[#allocation8 + $0x778] sm:$0xf0]  ;;  %v6564_v50 = vor.u32 %v7986_v15, %v6561_v12  ;;  %v9048_v48 = vpop.f32.mrf.mxu3 }
 0x1e0   :  { %3278 = vmatmul.bf16.vlgmr.msra.gmra.mxu3 %v8904_v5  ;;  %v6705_v5 = vld [vmem:[#allocation8 + $0x798] sm:$0xf0]  ;;  %v6692_v20 = vor.u32 %v8018_v23, %v6689_v26  ;;  %v8050_v23 = vld [vmem:[#allocation11 + $0x64] sm:$0xf0]  ;;  %v6871_v26 = vld [vmem:[#allocation11 + $0xe0] sm:$0xf] }
 0x1e1   :  { %v6708_v8 = vor.u32 %v8022_v43, %v6705_v5  ;;  %v6273_v33 = vld [vmem:[#allocation8 + $0x438] sm:$0xf0]  ;;  %v7978_v5 = vld [vmem:[#allocation8 + $0x62c] sm:$0xf] }
 0x1e2   :  { %3313 = vmatpush.bf16.msrb.mxu2 %v6612_v49  ;;  %3287 = vmatpush.bf16.msrb.mxu0 %v6324_v47  ;;  %v6401_v35 = vld [vmem:[#allocation8 + $0x538] sm:$0xf0]  ;;  %v7982_v49 = vld [vmem:[#allocation8 + $0x64c] sm:$0xf]  ;;  %v6276_v41 = vor.u32 %v7914_v30, %v6273_v33 }
 0x1e3   :  { %3327 = vmatpush.bf16.msrb.mxu3 %v6740_v32  ;;  %3301 = vmatpush.bf16.msrb.mxu1 %v6452_v52  ;;  %v9046_v32 = vpop.f32.mrf.mxu2  ;;  %v6673_v47 = vld [vmem:[#allocation8 + $0x758] sm:$0xf0]  ;;  %v6404_v52 = vor.u32 %v7946_v34, %v6401_v35  ;;  %v6548_v54 = vor.u32 %v7982_v49, %v6545_v42  ;;  %v9050_v21 = vpop.f32.mrf.mxu0  ;;  %v8066_v30 = vld [vmem:[#allocation11 + $0xe4] sm:$0xf0]  ;;  %v2904_v34 = vadd.f32 %v9020_v17, %v1604_v6 }
 0x1e4   :  { %v8068_v43 = vld [vmem:[#allocation11 + $0xf4] sm:$0xf0]  ;;  %v7974_v33 = vld [vmem:[#allocation8 + $0x60c] sm:$0xf]  ;;  %v6872_v55 = vor.u32 %v8066_v30, %v6871_v26  ;;  %v6847_v26 = vld [vmem:[#allocation11 + $0xb0] sm:$0xf] }
 0x1e5   :  { %v6880_v15 = vor.u32 %v8068_v43, %v6879_v53  ;;  %v6641_v49 = vld [vmem:[#allocation8 + $0x718] sm:$0xf0]  ;;  %v1605_v53 = vperm.slane %v9044_v63, 1  ;;  %v6935_v30 = vld [vmem:[#allocation11 + $0x160] sm:$0xf] }
 0x1e6   :  { %3314 = vmatpush.bf16.msrb.mxu2 %v6596_v36  ;;  %3288 = vmatpush.bf16.msrb.mxu0 %v6308_v46  ;;  %v6385_v36 = vld [vmem:[#allocation8 + $0x518] sm:$0xf0]  ;;  %v6676_v46 = vor.u32 %v8014_v44, %v6673_v47  ;;  %v3027_v42 = vpop.f32.mrf.mxu1  ;;  %v2902_v47 = vadd.f32 %v9016_v31, %v1604_v6 }
 0x1e7   :  { %3328 = vmatpush.bf16.msrb.mxu3 %v6724_v57  ;;  %3302 = vmatpush.bf16.msrb.mxu1 %v6436_v1  ;;  %v8052_v57 = vld [vmem:[#allocation11 + $0x74] sm:$0xf0]  ;;  %v6388_v7 = vor.u32 %v7942_v51, %v6385_v36  ;;  %v6863_v36 = vld [vmem:[#allocation11 + $0xd0] sm:$0xf] }
 0x1e8   :  { %v6529_v1 = vld [vmem:[#allocation8 + $0x638] sm:$0xf0] }
 0x1e9   :  { %v6532_v12 = vor.u32 %v7978_v5, %v6529_v1  ;;  %v8048_v51 = vld [vmem:[#allocation11 + $0x54] sm:$0xf0]  ;;  %v8046_v1 = vld [vmem:[#allocation11 + $0x44] sm:$0xf0] }
 0x1ea   :  { %3315 = vmatpush.bf16.msrb.mxu2 %v6580_v14  ;;  %3289 = vmatpush.bf16.msrb.mxu0 %v6292_v29  ;;  %v6657_v14 = vld [vmem:[#allocation8 + $0x738] sm:$0xf0]  ;;  %v6807_v29 = vld [vmem:[#allocation11 + $0x60] sm:$0xf]  ;;  %v6800_v31 = vor.u32 %v8048_v51, %v6799_v19  ;;  %v8058_v19 = vld [vmem:[#allocation11 + $0xa4] sm:$0xf0] }
 0x1eb   :  { %3329 = vmatpush.bf16.msrb.mxu3 %v6708_v8  ;;  %3303 = vmatpush.bf16.msrb.mxu1 %v6420_v39  ;;  %v6816_v8 = vor.u32 %v8052_v57, %v6815_v24  ;;  %v6660_v39 = vor.u32 %v8010_v11, %v6657_v14  ;;  %v9054_v35 = vpop.f32.mrf.mxu2  ;;  %v6808_v44 = vor.u32 %v8050_v23, %v6807_v29  ;;  %v3015_v57 = vpop.f32.mrf.mxu0  ;;  %v8062_v11 = vld [vmem:[#allocation11 + $0xc4] sm:$0xf0]  ;;  %v8084_v14 = vld [vmem:[#allocation11 + $0x174] sm:$0xf0]  ;;  %v6783_v29 = vld [vmem:[#allocation11 + $0x30] sm:$0xf] }
 0x1ec   :  { %v2918_v24 = vadd.f32 %v9022_v3, %v2904_v34  ;;  %v6943_v3 = vld [vmem:[#allocation11 + $0x170] sm:$0xf]  ;;  %v8044_v23 = vld [vmem:[#allocation11 + $0x34] sm:$0xf0] }
 0x1ed   :  { %v6927_v51 = vld [vmem:[#allocation11 + $0x150] sm:$0xf] }
 0x1ee   :  { %3316 = vmatpush.bf16.msrb.mxu2 %v6564_v50  ;;  %3290 = vmatpush.bf16.msrb.mxu0 %v6276_v41  ;;  %v6513_v50 = vld [vmem:[#allocation8 + $0x618] sm:$0xf0]  ;;  %v9056_v41 = vpop.f32.mrf.mxu3  ;;  %v2932_v43 = vadd.f32 %v9036_v60, %v2918_v24 }
 0x1ef   :  { %3330 = vmatpush.bf16.msrb.mxu3 %v6692_v20  ;;  %3304 = vmatpush.bf16.msrb.mxu1 %v6404_v52  ;;  %v8006_v20 = vld [vmem:[#allocation8 + $0x70c] sm:$0xf]  ;;  %v6516_v52 = vor.u32 %v7974_v33, %v6513_v50 }
 0x1f0   :  { %v6644_v17 = vor.u32 %v8006_v20, %v6641_v49  ;;  %v2946_v60 = vadd.f32 %v9038_v0, %v2932_v43  ;;  %v8082_v33 = vld [vmem:[#allocation11 + $0x164] sm:$0xf0]  ;;  %v6784_v0 = vor.u32 %v8044_v23, %v6783_v29  ;;  %v3016_v20 = vadd.f32 %v3015_v57, %v1605_v53  ;;  %v8040_v43 = vld [vmem:[#allocation11 + $0x14] sm:$0xf0]  ;;  %v6817_v29 = vld [vmem:[#allocation11 + $0x78] sm:$0xf0] }
 0x1f1   :  { %v6936_v34 = vor.u32 %v8082_v33, %v6935_v30  ;;  %v6911_v23 = vld [vmem:[#allocation11 + $0x130] sm:$0xf]  ;;  %v8067_v30 = vld [vmem:[#allocation11 + $0xf4] sm:$0xf]  ;;  %v6881_v33 = vld [vmem:[#allocation11 + $0xf8] sm:$0xf0] }
 0x1f2   :  { %3317 = vmatpush.bf16.msrb.mxu2 %v6548_v54  ;;  %3291 = vmatpush.bf16.msrb.mxu0 %v6260_v28  ;;  %v8064_v54 = vld [vmem:[#allocation11 + $0xd4] sm:$0xf0]  ;;  %v6855_v28 = vld [vmem:[#allocation11 + $0xc0] sm:$0xf]  ;;  %v2960_v50 = vadd.f32 %v9040_v2, %v2946_v60 }
 0x1f3   :  { %3331 = vmatpush.bf16.msrb.mxu3 %v6676_v46  ;;  %3305 = vmatpush.bf16.msrb.mxu1 %v6388_v7  ;;  %v2916_v46 = vadd.f32 %v9018_v38, %v2902_v47  ;;  %v6864_v5 = vor.u32 %v8064_v54, %v6863_v36  ;;  %v3041_v6 = vpop.f32.mrf.mxu2  ;;  %v6944_v7 = vor.u32 %v8084_v14, %v6943_v3  ;;  %v3069_v49 = vpop.f32.mrf.mxu0  ;;  %v6775_v47 = vld [vmem:[#allocation11 + $0x20] sm:$0xf] }
 0x1f4   :  { %v6823_v60 = vld [vmem:[#allocation11 + $0x80] sm:$0xf] }
 0x1f5   :  { %3292 = vmatmul.bf16.vlgmr.msrb.gmra.mxu0 %v8980_v62  ;;  %v6791_v62 = vld [vmem:[#allocation11 + $0x40] sm:$0xf] }
 0x1f6   :  { %3742 = vmatpush.bf16.msra.mxu0 %v6816_v8  ;;  %3318 = vmatpush.bf16.msrb.mxu2 %v6532_v12  ;;  %v3055_v8 = vpop.f32.mrf.mxu3  ;;  %v6792_v38 = vor.u32 %v8046_v1, %v6791_v62  ;;  %v6856_v12 = vor.u32 %v8062_v11, %v6855_v28  ;;  %v8056_v62 = vld [vmem:[#allocation11 + $0x94] sm:$0xf0]  ;;  %v6919_v1 = vld [vmem:[#allocation11 + $0x140] sm:$0xf] }
 0x1f7   :  { %3756 = vmatpush.bf16.msra.mxu1 %v6880_v15  ;;  %3332 = vmatpush.bf16.msrb.mxu3 %v6660_v39  ;;  %v3014_v15 = vadd.f32 %v9050_v21, %v1605_v53  ;;  %v3029_v39 = vpop.f32.mrf.mxu1 }
 0x1f8   :  { %3306 = vmatmul.bf16.vlgmr.msrb.gmra.mxu1 %v8982_v59  ;;  %v2930_v59 = vadd.f32 %v9024_v16, %v2916_v46  ;;  %v8060_v16 = vld [vmem:[#allocation11 + $0xb4] sm:$0xf0]  ;;  %v3030_v53 = vadd.f32 %v3029_v39, %v3016_v20  ;;  %v6767_v46 = vld [vmem:[#allocation11 + $0x10] sm:$0xf]  ;;  %v8049_v20 = vld [vmem:[#allocation11 + $0x64] sm:$0xf] }
 0x1fa   :  { %3743 = vmatpush.bf16.msra.mxu0 %v6808_v44  ;;  %3319 = vmatpush.bf16.msrb.mxu2 %v6516_v52  ;;  %v6848_v44 = vor.u32 %v8060_v16, %v6847_v26  ;;  %v6839_v52 = vld [vmem:[#allocation11 + $0xa0] sm:$0xf]  ;;  %v8076_v26 = vld [vmem:[#allocation11 + $0x134] sm:$0xf0] }
 0x1fb   :  { %3757 = vmatpush.bf16.msra.mxu1 %v6872_v55  ;;  %3333 = vmatpush.bf16.msrb.mxu3 %v6644_v17  ;;  %v8042_v55 = vld [vmem:[#allocation11 + $0x24] sm:$0xf0]  ;;  %v8080_v17 = vld [vmem:[#allocation11 + $0x154] sm:$0xf0]  ;;  %v3043_v36 = vpop.f32.mrf.mxu2  ;;  %v3071_v16 = vpop.f32.mrf.mxu0 }
 0x1fc   :  { %v6928_v54 = vor.u32 %v8080_v17, %v6927_v51  ;;  %v3044_v3 = vadd.f32 %v3043_v36, %v3030_v53  ;;  %v8065_v51 = vld [vmem:[#allocation11 + $0xe4] sm:$0xf]  ;;  %v6873_v17 = vld [vmem:[#allocation11 + $0xe8] sm:$0xf0]  ;;  %v6895_v53 = vld [vmem:[#allocation11 + $0x110] sm:$0xf] }
 0x1fd   :  { %3320 = vmatmul.bf16.vlgmr.msrb.gmra.mxu2 %v8994_v22  ;;  %v2944_v22 = vadd.f32 %v9027_v25, %v2930_v59  ;;  %v2974_v25 = vadd.f32 %v9042_v37, %v2960_v50  ;;  %v8078_v37 = vld [vmem:[#allocation11 + $0x144] sm:$0xf0] }
 0x1fe   :  { %3744 = vmatpush.bf16.msra.mxu0 %v6800_v31  ;;  %3334 = vmatmul.bf16.vlgmr.msrb.gmra.mxu3 %v8996_v58  ;;  %v3028_v58 = vadd.f32 %v3027_v42, %v3014_v15  ;;  %v3057_v24 = vpop.f32.mrf.mxu3  ;;  %v6840_v31 = vor.u32 %v8058_v19, %v6839_v52  ;;  %v6920_v14 = vor.u32 %v8078_v37, %v6919_v1  ;;  %v8054_v15 = vld [vmem:[#allocation11 + $0x84] sm:$0xf0] }
 0x1ff   :  { %3758 = vmatpush.bf16.msra.mxu1 %v6864_v5  ;;  %3770 = vmatpush.bf16.msra.mxu2 %v6944_v7  ;;  %v2958_v21 = vadd.f32 %v9030_v40, %v2944_v22  ;;  %v6776_v40 = vor.u32 %v8042_v55, %v6775_v47  ;;  %v2988_v57 = vadd.f32 %v9054_v35, %v2974_v25  ;;  %v6831_v5 = vld [vmem:[#allocation11 + $0x90] sm:$0xf]  ;;  %v3083_v59 = vpop.f32.mrf.mxu1  ;;  %v8038_v35 = vld [vmem:[#allocation11 + $0x4] sm:$0xf0]  ;;  %v6809_v47 = vld [vmem:[#allocation11 + $0x68] sm:$0xf0] }
 0x200   :  { %v3042_v2 = vadd.f32 %v3041_v6, %v3028_v58  ;;  %v6759_v6 = vld [vmem:[#allocation11] sm:$0xf]  ;;  %v3058_v39 = vadd.f32 %v3057_v24, %v3044_v3  ;;  %v6912_v22 = vor.u32 %v8076_v26, %v6911_v23  ;;  %v8047_v24 = vld [vmem:[#allocation11 + $0x54] sm:$0xf]  ;;  %v8045_v3 = vld [vmem:[#allocation11 + $0x44] sm:$0xf] }
 0x201   :  { %v2972_v42 = vadd.f32 %v9034_v18, %v2958_v21  ;;  %v6768_v18 = vor.u32 %v8040_v43, %v6767_v46  ;;  %v3002_v7 = vadd.f32 %v9056_v41, %v2988_v57  ;;  %v6760_v41 = vor.u32 %v8038_v35, %v6759_v6  ;;  %v6903_v55 = vld [vmem:[#allocation11 + $0x120] sm:$0xf]  ;;  %v6801_v57 = vld [vmem:[#allocation11 + $0x58] sm:$0xf0]  ;;  %v8063_v43 = vld [vmem:[#allocation11 + $0xd4] sm:$0xf] }
 0x202   :  { %3745 = vmatpush.bf16.msra.mxu0 %v6792_v38  ;;  %v3056_v11 = vadd.f32 %v3055_v8, %v3042_v2  ;;  %v6832_v38 = vor.u32 %v8056_v62, %v6831_v5  ;;  %v6824_v21 = vor.u32 %v8054_v15, %v6823_v60  ;;  %v3072_v19 = vadd.f32 %v3071_v16, %v3058_v39  ;;  %v6865_v5 = vld [vmem:[#allocation11 + $0xd8] sm:$0xf0]  ;;  %v8061_v6 = vld [vmem:[#allocation11 + $0xc4] sm:$0xf]  ;;  %v6887_v35 = vld [vmem:[#allocation11 + $0x100] sm:$0xf] }
 0x203   :  { %3759 = vmatpush.bf16.msra.mxu1 %v6856_v12  ;;  %3771 = vmatpush.bf16.msra.mxu2 %v6936_v34  ;;  %v2986_v28 = vadd.f32 %v9046_v32, %v2972_v42  ;;  %v8051_v12 = vld [vmem:[#allocation11 + $0x74] sm:$0xf]  ;;  %v3097_v50 = vpop.f32.mrf.mxu2  ;;  %v6876_v42 = vor.u32 %v8065_v51, %v6873_v17  ;;  %v6857_v60 = vld [vmem:[#allocation11 + $0xc8] sm:$0xf0] }
 0x204   :  { %v3070_v8 = vadd.f32 %v3069_v49, %v3056_v11  ;;  %v6820_v58 = vor.u32 %v8051_v12, %v6817_v29  ;;  %v6804_v11 = vor.u32 %v8047_v24, %v6801_v57  ;;  %v8083_v12 = vld [vmem:[#allocation11 + $0x174] sm:$0xf]  ;;  %v6945_v29 = vld [vmem:[#allocation11 + $0x178] sm:$0xf0]  ;;  %v6860_v39 = vor.u32 %v8061_v6, %v6857_v60  ;;  %v8077_v24 = vld [vmem:[#allocation11 + $0x144] sm:$0xf] }
 0x205   :  { %v3000_v32 = vadd.f32 %v9048_v48, %v2986_v28  ;;  %v8074_v48 = vld [vmem:[#allocation11 + $0x124] sm:$0xf0]  ;;  %v6948_v23 = vor.u32 %v8083_v12, %v6945_v29  ;;  %v8043_v16 = vld [vmem:[#allocation11 + $0x34] sm:$0xf]  ;;  %v8114_v60 = vld [vmem:[#allocation19 + $0x64] sm:$0xf0] }
 0x206   :  { %3746 = vmatpush.bf16.msra.mxu0 %v6784_v0  ;;  %v3111_v34 = vpop.f32.mrf.mxu3  ;;  %v3344_v0 = vmax.f32 %v3002_v7, 0.0  ;;  %v3084_v52 = vadd.f32 %v3083_v59, %v3070_v8  ;;  %v6904_v25 = vor.u32 %v8074_v48, %v6903_v55  ;;  %v8070_v7 = vld [vmem:[#allocation11 + $0x104] sm:$0xf0]  ;;  %v6841_v55 = vld [vmem:[#allocation11 + $0xa8] sm:$0xf0] }
 0x207   :  { %3760 = vmatpush.bf16.msra.mxu1 %v6848_v44  ;;  %3772 = vmatpush.bf16.msra.mxu2 %v6928_v54  ;;  %v6884_v44 = vor.u32 %v8067_v30, %v6881_v33  ;;  %v3340_v49 = vmax.f32 %v3000_v32, 0.0  ;;  %v6812_v54 = vor.u32 %v8049_v20, %v6809_v47  ;;  %v6888_v15 = vor.u32 %v8070_v7, %v6887_v35  ;;  %v6785_v30 = vld [vmem:[#allocation11 + $0x38] sm:$0xf0]  ;;  %v8059_v33 = vld [vmem:[#allocation11 + $0xb4] sm:$0xf] }
 0x208   :  { %v3098_v36 = vadd.f32 %v3097_v50, %v3084_v52  ;;  %v6849_v50 = vld [vmem:[#allocation11 + $0xb8] sm:$0xf0]  ;;  %v8041_v20 = vld [vmem:[#allocation11 + $0x24] sm:$0xf]  ;;  %v8079_v48 = vld [vmem:[#allocation11 + $0x154] sm:$0xf] }
 0x209   :  { %v9079_v2 = vpack.c.bf16 %v3344_v0, %v3340_v49  ;;  %v8057_v47 = vld [vmem:[#allocation11 + $0xa4] sm:$0xf]  ;;  %v6929_v49 = vld [vmem:[#allocation11 + $0x158] sm:$0xf0]  ;;  %v8039_v17 = vld [vmem:[#allocation11 + $0x14] sm:$0xf] }
 0x20a   :  { %3747 = vmatpush.bf16.msra.mxu0 %v6776_v40  ;;  %v3085_v40 = vpop.f32.mrf.mxu1  ;;  %v3112_v37 = vadd.f32 %v3111_v34, %v3098_v36  ;;  %v8081_v34 = vld [vmem:[#allocation11 + $0x164] sm:$0xf]  ;;  %v6932_v52 = vor.u32 %v8079_v48, %v6929_v49  ;;  %v6844_v51 = vor.u32 %v8057_v47, %v6841_v55  ;;  %v8055_v36 = vld [vmem:[#allocation11 + $0x94] sm:$0xf]  ;;  %v6905_v12 = vld [vmem:[#allocation11 + $0x128] sm:$0xf0] }
 0x20b   :  { %3761 = vmatpush.bf16.msra.mxu1 %v6840_v31  ;;  %3773 = vmatpush.bf16.msra.mxu2 %v6920_v14  ;;  %v8072_v31 = vld [vmem:[#allocation11 + $0x114] sm:$0xf0]  ;;  %v3086_v46 = vadd.f32 %v3085_v40, %v3072_v19  ;;  %v3099_v1 = vpop.f32.mrf.mxu2  ;;  %v6793_v14 = vld [vmem:[#allocation11 + $0x48] sm:$0xf0]  ;;  %v7063_v7 = vld [vmem:[#allocation19 + $0x60] sm:$0xf] }
 0x20c   :  { %v6896_v62 = vor.u32 %v8072_v31, %v6895_v53  ;;  %v3341_v26 = vmax.f32 %v3112_v37, 0.0  ;;  %v6796_v8 = vor.u32 %v8045_v3, %v6793_v14  ;;  %v6921_v40 = vld [vmem:[#allocation11 + $0x148] sm:$0xf0]  ;;  %v8037_v53 = vld [vmem:[#allocation11 + $0x4] sm:$0xf] }
 0x20d   :  { %v3100_v28 = vadd.f32 %v3099_v1, %v3086_v46  ;;  %v6761_v31 = vld [vmem:[#allocation11 + $0x8] sm:$0xf0]  ;;  %v8116_v1 = vld [vmem:[#allocation19 + $0x74] sm:$0xf0]  ;;  %v8075_v37 = vld [vmem:[#allocation11 + $0x134] sm:$0xf] }
 0x20e   :  { %3748 = vmatpush.bf16.msra.mxu0 %v6768_v18  ;;  %v3113_v59 = vpop.f32.mrf.mxu3  ;;  %v6868_v18 = vor.u32 %v8063_v43, %v6865_v5  ;;  %v8053_v43 = vld [vmem:[#allocation11 + $0x84] sm:$0xf]  ;;  %v6825_v5 = vld [vmem:[#allocation11 + $0x88] sm:$0xf0]  ;;  %v8132_v3 = vld [vmem:[#allocation19 + $0xf4] sm:$0xf0] }
 0x20f   :  { %3762 = vmatpush.bf16.msra.mxu1 %v6832_v38  ;;  %3774 = vmatpush.bf16.msra.mxu2 %v6912_v22  ;;  %v3114_v38 = vadd.f32 %v3113_v59, %v3100_v28  ;;  %v6913_v28 = vld [vmem:[#allocation11 + $0x138] sm:$0xf0]  ;;  %v6828_v6 = vor.u32 %v8053_v43, %v6825_v5  ;;  %v7127_v29 = vld [vmem:[#allocation19 + $0xe0] sm:$0xf] }
 0x210   :  { %v6916_v14 = vor.u32 %v8075_v37, %v6913_v28  ;;  %v7111_v49 = vld [vmem:[#allocation19 + $0xc0] sm:$0xf] }
 0x211   :  { %v3345_v32 = vmax.f32 %v3114_v38, 0.0  ;;  %v7031_v28 = vld [vmem:[#allocation19 + $0x20] sm:$0xf] }
 0x212   :  { %3749 = vmatpush.bf16.msra.mxu0 %v6760_v41  ;;  %v6937_v41 = vld [vmem:[#allocation11 + $0x168] sm:$0xf0]  ;;  %v3125_v59 = vpop.f32.mrf.mxu0 }
 0x213   :  { %3763 = vmatpush.bf16.msra.mxu1 %v6824_v21  ;;  %3775 = vmatpush.bf16.msra.mxu2 %v6904_v25  ;;  %v9082_v22 = vpack.c.bf16 %v3345_v32, %v3341_v26  ;;  %v6940_v0 = vor.u32 %v8081_v34, %v6937_v41  ;;  %v6788_v21 = vor.u32 %v8043_v16, %v6785_v30  ;;  %v6769_v25 = vld [vmem:[#allocation11 + $0x18] sm:$0xf0]  ;;  %v7119_v34 = vld [vmem:[#allocation19 + $0xd0] sm:$0xf] }
 0x214   :  { %v6772_v57 = vor.u32 %v8039_v17, %v6769_v25  ;;  %v7064_v32 = vor.u32 %v8114_v60, %v7063_v7  ;;  %v8112_v30 = vld [vmem:[#allocation19 + $0x54] sm:$0xf0]  ;;  %v7007_v25 = vld [vmem:[#allocation11 + $0x1f0] sm:$0xf] }
 0x215   :  { %3750 = vmatmul.bf16.vlgmr.msra.gmra.mxu0 %v9079_v2  ;;  %v8128_v41 = vld [vmem:[#allocation19 + $0xd4] sm:$0xf0] }
 0x216   :  { %3798 = vmatpush.bf16.msrb.mxu0 %v6820_v58  ;;  %3764 = vmatmul.bf16.vlgmr.msra.gmra.mxu1 %v9082_v22  ;;  %v6852_v58 = vor.u32 %v8059_v33, %v6849_v50  ;;  %v8071_v33 = vld [vmem:[#allocation11 + $0x114] sm:$0xf]  ;;  %v6897_v50 = vld [vmem:[#allocation11 + $0x118] sm:$0xf0]  ;;  %v7120_v48 = vor.u32 %v8128_v41, %v7119_v34 }
 0x217   :  { %3812 = vmatpush.bf16.msrb.mxu1 %v6884_v44  ;;  %3776 = vmatpush.bf16.msra.mxu2 %v6896_v62  ;;  %v6777_v44 = vld [vmem:[#allocation11 + $0x28] sm:$0xf0]  ;;  %v7071_v62 = vld [vmem:[#allocation19 + $0x70] sm:$0xf] }
 0x218   :  { %v6780_v19 = vor.u32 %v8041_v20, %v6777_v44  ;;  %v7072_v35 = vor.u32 %v8116_v1, %v7071_v62  ;;  %v7047_v20 = vld [vmem:[#allocation19 + $0x40] sm:$0xf]  ;;  %v8110_v44 = vld [vmem:[#allocation19 + $0x44] sm:$0xf0] }
 0x21a   :  { %3799 = vmatpush.bf16.msrb.mxu0 %v6812_v54  ;;  %v6833_v54 = vld [vmem:[#allocation11 + $0x98] sm:$0xf0]  ;;  %v3127_v47 = vpop.f32.mrf.mxu0 }
 0x21b   :  { %3813 = vmatpush.bf16.msrb.mxu1 %v6876_v42  ;;  %3777 = vmatpush.bf16.msra.mxu2 %v6888_v15  ;;  %v6924_v42 = vor.u32 %v8077_v24, %v6921_v40  ;;  %v6836_v46 = vor.u32 %v8055_v36, %v6833_v54  ;;  %v8073_v15 = vld [vmem:[#allocation11 + $0x124] sm:$0xf]  ;;  %v8100_v36 = vld [vmem:[#allocation11 + $0x1f4] sm:$0xf0]  ;;  %v7039_v24 = vld [vmem:[#allocation19 + $0x30] sm:$0xf] }
 0x21c   :  { %v6908_v26 = vor.u32 %v8073_v15, %v6905_v12  ;;  %v8108_v40 = vld [vmem:[#allocation19 + $0x34] sm:$0xf0] }
 0x21d   :  { %v7040_v62 = vor.u32 %v8108_v40, %v7039_v24 }
 0x21e   :  { %3800 = vmatpush.bf16.msrb.mxu0 %v6804_v11  ;;  %v7135_v11 = vld [vmem:[#allocation19 + $0xf0] sm:$0xf] }
 0x21f   :  { %3814 = vmatpush.bf16.msrb.mxu1 %v6868_v18  ;;  %3826 = vmatpush.bf16.msrb.mxu2 %v6948_v23  ;;  %v6764_v18 = vor.u32 %v8037_v53, %v6761_v31  ;;  %v7136_v38 = vor.u32 %v8132_v3, %v7135_v11  ;;  %v8130_v23 = vld [vmem:[#allocation19 + $0xe4] sm:$0xf0]  ;;  %v8124_v53 = vld [vmem:[#allocation19 + $0xb4] sm:$0xf0]  ;;  %v6999_v31 = vld [vmem:[#allocation11 + $0x1e0] sm:$0xf] }
 0x220   :  { %v7128_v16 = vor.u32 %v8130_v23, %v7127_v29  ;;  %v3153_v55 = vpop.f32.mrf.mxu2  ;;  %v8106_v11 = vld [vmem:[#allocation19 + $0x24] sm:$0xf0]  ;;  %v7095_v3 = vld [vmem:[#allocation19 + $0xa0] sm:$0xf]  ;;  %v7023_v23 = vld [vmem:[#allocation19 + $0x10] sm:$0xf] }
 0x221   :  { %v7032_v12 = vor.u32 %v8106_v11, %v7031_v28 }
 0x222   :  { %3801 = vmatpush.bf16.msrb.mxu0 %v6796_v8  ;;  %v7055_v8 = vld [vmem:[#allocation19 + $0x50] sm:$0xf] }
 0x223   :  { %3815 = vmatpush.bf16.msrb.mxu1 %v6860_v39  ;;  %3827 = vmatpush.bf16.msrb.mxu2 %v6940_v0  ;;  %v3139_v39 = vpop.f32.mrf.mxu1  ;;  %v6900_v0 = vor.u32 %v8071_v33, %v6897_v50 }
 0x226   :  { %3802 = vmatpush.bf16.msrb.mxu0 %v6788_v21  ;;  %v1606_v21 = vperm.slane %v9044_v63, 2  ;;  %v7048_v63 = vor.u32 %v8110_v44, %v7047_v20  ;;  %v7079_v44 = vld [vmem:[#allocation19 + $0x80] sm:$0xf] }
 0x227   :  { %3816 = vmatpush.bf16.msrb.mxu1 %v6852_v58  ;;  %3828 = vmatpush.bf16.msrb.mxu2 %v6932_v52  ;;  %v7056_v58 = vor.u32 %v8112_v30, %v7055_v8  ;;  %v8069_v52 = vld [vmem:[#allocation11 + $0x104] sm:$0xf]  ;;  %v8094_v30 = vld [vmem:[#allocation11 + $0x1c4] sm:$0xf0] }
 0x228   :  { %v3155_v7 = vpop.f32.mrf.mxu2 }
 0x22a   :  { %3803 = vmatpush.bf16.msrb.mxu0 %v6780_v19  ;;  %v6889_v19 = vld [vmem:[#allocation11 + $0x108] sm:$0xf0] }
 0x22b   :  { %3817 = vmatpush.bf16.msrb.mxu1 %v6844_v51  ;;  %3829 = vmatpush.bf16.msrb.mxu2 %v6924_v42  ;;  %v8126_v51 = vld [vmem:[#allocation19 + $0xc4] sm:$0xf0]  ;;  %v6892_v17 = vor.u32 %v8069_v52, %v6889_v19  ;;  %v7103_v42 = vld [vmem:[#allocation19 + $0xb0] sm:$0xf]  ;;  %v3141_v43 = vpop.f32.mrf.mxu1  ;;  %v6975_v52 = vld [vmem:[#allocation11 + $0x1b0] sm:$0xf] }
 0x22c   :  { %v7112_v54 = vor.u32 %v8126_v51, %v7111_v49  ;;  %v7104_v37 = vor.u32 %v8124_v53, %v7103_v42  ;;  %v8180_v49 = vld [vmem:[#allocation19 + $0x274] sm:$0xf0]  ;;  %v8092_v19 = vld [vmem:[#allocation11 + $0x1b4] sm:$0xf0]  ;;  %v7319_v42 = vld [vmem:[#allocation19 + $0x260] sm:$0xf] }
 0x22e   :  { %3804 = vmatpush.bf16.msrb.mxu0 %v6772_v57  ;;  %v3126_v57 = vadd.f32 %v3125_v59, %v1606_v21  ;;  %v8096_v59 = vld [vmem:[#allocation11 + $0x1d4] sm:$0xf0] }
 0x22f   :  { %3818 = vmatpush.bf16.msrb.mxu1 %v6836_v46  ;;  %3830 = vmatpush.bf16.msrb.mxu2 %v6916_v14  ;;  %v8098_v46 = vld [vmem:[#allocation11 + $0x1e4] sm:$0xf0] }
 0x230   :  { %v7000_v5 = vor.u32 %v8098_v46, %v6999_v31  ;;  %v3140_v14 = vadd.f32 %v3139_v39, %v3126_v57  ;;  %v6983_v39 = vld [vmem:[#allocation11 + $0x1c0] sm:$0xf]  ;;  %v8178_v46 = vld [vmem:[#allocation19 + $0x264] sm:$0xf0] }
 0x231   :  { %v6984_v50 = vor.u32 %v8094_v30, %v6983_v39  ;;  %v7303_v39 = vld [vmem:[#allocation19 + $0x240] sm:$0xf]  ;;  %v8174_v30 = vld [vmem:[#allocation19 + $0x244] sm:$0xf0] }
 0x232   :  { %3805 = vmatpush.bf16.msrb.mxu0 %v6764_v18  ;;  %v3181_v1 = vpop.f32.mrf.mxu0  ;;  %v3128_v18 = vadd.f32 %v3127_v47, %v1606_v21  ;;  %v3154_v60 = vadd.f32 %v3153_v55, %v3140_v14  ;;  %v7015_v21 = vld [vmem:[#allocation19] sm:$0xf]  ;;  %v8118_v47 = vld [vmem:[#allocation19 + $0x84] sm:$0xf0]  ;;  %v7327_v55 = vld [vmem:[#allocation19 + $0x270] sm:$0xf] }
 0x233   :  { %3819 = vmatpush.bf16.msrb.mxu1 %v6828_v6  ;;  %3831 = vmatpush.bf16.msrb.mxu2 %v6908_v26  ;;  %v8122_v6 = vld [vmem:[#allocation19 + $0xa4] sm:$0xf0]  ;;  %v8104_v26 = vld [vmem:[#allocation19 + $0x14] sm:$0xf0]  ;;  %v7080_v24 = vor.u32 %v8118_v47, %v7079_v44  ;;  %v7328_v40 = vor.u32 %v8180_v49, %v7327_v55  ;;  %v7311_v14 = vld [vmem:[#allocation19 + $0x250] sm:$0xf] }
 0x234   :  { %v7096_v29 = vor.u32 %v8122_v6, %v7095_v3  ;;  %v3142_v8 = vadd.f32 %v3141_v43, %v3128_v18  ;;  %v6967_v43 = vld [vmem:[#allocation11 + $0x1a0] sm:$0xf]  ;;  %v7320_v3 = vor.u32 %v8178_v46, %v7319_v42  ;;  %v7009_v44 = vld [vmem:[#allocation11 + $0x1f8] sm:$0xf0] }
 0x235   :  { %3806 = vmatmul.bf16.vlgmr.msrb.gmra.mxu0 %v9079_v2  ;;  %v3167_v2 = vpop.f32.mrf.mxu3  ;;  %v3195_v33 = vpop.f32.mrf.mxu1 }
 0x236   :  { %4632 = vmatpush.bf16.msra.mxu0 %v7072_v35  ;;  %3820 = vmatmul.bf16.vlgmr.msrb.gmra.mxu1 %v9082_v22  ;;  %v7008_v22 = vor.u32 %v8100_v36, %v7007_v25  ;;  %v6991_v35 = vld [vmem:[#allocation11 + $0x1d0] sm:$0xf]  ;;  %v3168_v34 = vadd.f32 %v3167_v2, %v3154_v60  ;;  %v3156_v41 = vadd.f32 %v3155_v7, %v3142_v8  ;;  %v7391_v25 = vld [vmem:[#allocation19 + $0x2f0] sm:$0xf]  ;;  %v8196_v36 = vld [vmem:[#allocation19 + $0x2f4] sm:$0xf0] }
 0x237   :  { %4646 = vmatpush.bf16.msra.mxu1 %v7136_v38  ;;  %3832 = vmatpush.bf16.msrb.mxu2 %v6900_v0  ;;  %v6992_v38 = vor.u32 %v8096_v59, %v6991_v35  ;;  %v7024_v0 = vor.u32 %v8104_v26, %v7023_v23  ;;  %v6976_v2 = vor.u32 %v8092_v19, %v6975_v52  ;;  %v8176_v35 = vld [vmem:[#allocation19 + $0x254] sm:$0xf0]  ;;  %v6959_v59 = vld [vmem:[#allocation11 + $0x190] sm:$0xf]  ;;  %v8088_v7 = vld [vmem:[#allocation11 + $0x194] sm:$0xf0] }
 0x238   :  { %3784 = vmatpush.bf16.msra.mxu3 %v7008_v22  ;;  %v7392_v31 = vor.u32 %v8196_v36, %v7391_v25  ;;  %v7375_v60 = vld [vmem:[#allocation19 + $0x2d0] sm:$0xf]  ;;  %v7312_v8 = vor.u32 %v8176_v35, %v7311_v14  ;;  %v7304_v52 = vor.u32 %v8174_v30, %v7303_v39  ;;  %v7191_v19 = vld [vmem:[#allocation19 + $0x160] sm:$0xf]  ;;  %v8166_v39 = vld [vmem:[#allocation19 + $0x204] sm:$0xf0] }
 0x239   :  { %v7199_v26 = vld [vmem:[#allocation19 + $0x170] sm:$0xf] }
 0x23a   :  { %4633 = vmatpush.bf16.msra.mxu0 %v7064_v32  ;;  %v7087_v32 = vld [vmem:[#allocation19 + $0x90] sm:$0xf]  ;;  %v3183_v51 = vpop.f32.mrf.mxu0 }
 0x23b   :  { %4647 = vmatpush.bf16.msra.mxu1 %v7128_v16  ;;  %3833 = vmatpush.bf16.msrb.mxu2 %v6892_v17  ;;  %v8120_v16 = vld [vmem:[#allocation19 + $0x94] sm:$0xf0]  ;;  %v7295_v36 = vld [vmem:[#allocation19 + $0x230] sm:$0xf] }
 0x23c   :  { %3785 = vmatpush.bf16.msra.mxu3 %v7000_v5  ;;  %v7088_v20 = vor.u32 %v8120_v16, %v7087_v32  ;;  %v8090_v5 = vld [vmem:[#allocation11 + $0x1a4] sm:$0xf0]  ;;  %v8148_v16 = vld [vmem:[#allocation19 + $0x174] sm:$0xf0] }
 0x23d   :  { %v3169_v15 = vpop.f32.mrf.mxu3  ;;  %v3197_v11 = vpop.f32.mrf.mxu1  ;;  %v7200_v49 = vor.u32 %v8148_v16, %v7199_v26  ;;  %v7271_v16 = vld [vmem:[#allocation19 + $0x200] sm:$0xf] }
 0x23e   :  { %4634 = vmatpush.bf16.msra.mxu0 %v7056_v58  ;;  %v8102_v58 = vld [vmem:[#allocation19 + $0x4] sm:$0xf0]  ;;  %v3170_v22 = vadd.f32 %v3169_v15, %v3156_v41  ;;  %v8192_v15 = vld [vmem:[#allocation19 + $0x2d4] sm:$0xf0]  ;;  %v6951_v41 = vld [vmem:[#allocation11 + $0x180] sm:$0xf] }
 0x23f   :  { %4648 = vmatpush.bf16.msra.mxu1 %v7120_v48  ;;  %v3182_v48 = vadd.f32 %v3181_v1, %v3168_v34  ;;  %v8194_v1 = vld [vmem:[#allocation19 + $0x2e4] sm:$0xf0]  ;;  %v7367_v34 = vld [vmem:[#allocation19 + $0x2c0] sm:$0xf] }
 0x240   :  { %3786 = vmatpush.bf16.msra.mxu3 %v6992_v38  ;;  %v3209_v17 = vpop.f32.mrf.mxu2  ;;  %v3184_v53 = vadd.f32 %v3183_v51, %v3170_v22  ;;  %v8146_v51 = vld [vmem:[#allocation19 + $0x164] sm:$0xf0]  ;;  %v7359_v22 = vld [vmem:[#allocation19 + $0x2b0] sm:$0xf] }
 0x241   :  { %v3196_v57 = vadd.f32 %v3195_v33, %v3182_v48  ;;  %v7192_v42 = vor.u32 %v8146_v51, %v7191_v19  ;;  %v7159_v19 = vld [vmem:[#allocation19 + $0x120] sm:$0xf]  ;;  %v8138_v51 = vld [vmem:[#allocation19 + $0x124] sm:$0xf0] }
 0x242   :  { %4635 = vmatpush.bf16.msra.mxu0 %v7048_v63  ;;  %v3198_v18 = vadd.f32 %v3197_v11, %v3184_v53  ;;  %v7183_v53 = vld [vmem:[#allocation19 + $0x150] sm:$0xf] }
 0x243   :  { %4649 = vmatpush.bf16.msra.mxu1 %v7112_v54  ;;  %v7016_v54 = vor.u32 %v8102_v58, %v7015_v21  ;;  %v3210_v28 = vadd.f32 %v3209_v17, %v3196_v57  ;;  %v8190_v21 = vld [vmem:[#allocation19 + $0x2c4] sm:$0xf0] }
 0x244   :  { %3787 = vmatpush.bf16.msra.mxu3 %v6984_v50  ;;  %v7376_v50 = vor.u32 %v8192_v15, %v7375_v60  ;;  %v7368_v25 = vor.u32 %v8190_v21, %v7367_v34  ;;  %v8184_v60 = vld [vmem:[#allocation19 + $0x294] sm:$0xf0]  ;;  %v8093_v15 = vld [vmem:[#allocation11 + $0x1c4] sm:$0xf]  ;;  %v8115_v34 = vld [vmem:[#allocation19 + $0x74] sm:$0xf] }
 0x245   :  { %v3223_v63 = vpop.f32.mrf.mxu3  ;;  %v6977_v21 = vld [vmem:[#allocation11 + $0x1b8] sm:$0xf0] }
 0x246   :  { %4636 = vmatpush.bf16.msra.mxu0 %v7040_v62  ;;  %v7383_v62 = vld [vmem:[#allocation19 + $0x2e0] sm:$0xf] }
 0x247   :  { %4650 = vmatpush.bf16.msra.mxu1 %v7104_v37  ;;  %v6968_v37 = vor.u32 %v8090_v5, %v6967_v43  ;;  %v7384_v6 = vor.u32 %v8194_v1, %v7383_v62  ;;  %v7287_v43 = vld [vmem:[#allocation19 + $0x220] sm:$0xf]  ;;  %v8170_v5 = vld [vmem:[#allocation19 + $0x224] sm:$0xf0] }
 0x248   :  { %3788 = vmatpush.bf16.msra.mxu3 %v6976_v2  ;;  %v3211_v38 = vpop.f32.mrf.mxu2  ;;  %v8172_v2 = vld [vmem:[#allocation19 + $0x234] sm:$0xf0]  ;;  %v7351_v62 = vld [vmem:[#allocation19 + $0x2a0] sm:$0xf]  ;;  %v8186_v1 = vld [vmem:[#allocation19 + $0x2a4] sm:$0xf0]  ;;  %v7288_v14 = vor.u32 %v8170_v5, %v7287_v43 }
 0x249   :  { %v3212_v23 = vadd.f32 %v3211_v38, %v3198_v18  ;;  %v7296_v57 = vor.u32 %v8172_v2, %v7295_v36  ;;  %v7175_v18 = vld [vmem:[#allocation19 + $0x140] sm:$0xf]  ;;  %v7352_v35 = vor.u32 %v8186_v1, %v7351_v62  ;;  %v7343_v38 = vld [vmem:[#allocation19 + $0x290] sm:$0xf]  ;;  %v7065_v2 = vld [vmem:[#allocation19 + $0x68] sm:$0xf0] }
 0x24a   :  { %4637 = vmatpush.bf16.msra.mxu0 %v7032_v12  ;;  %v6960_v12 = vor.u32 %v8088_v7, %v6959_v59  ;;  %v7279_v59 = vld [vmem:[#allocation19 + $0x210] sm:$0xf]  ;;  %v8168_v7 = vld [vmem:[#allocation19 + $0x214] sm:$0xf0]  ;;  %v7344_v30 = vor.u32 %v8184_v60, %v7343_v38  ;;  %v7057_v62 = vld [vmem:[#allocation19 + $0x58] sm:$0xf0] }
 0x24b   :  { %4651 = vmatpush.bf16.msra.mxu1 %v7096_v29  ;;  %v3224_v29 = vadd.f32 %v3223_v63, %v3210_v28  ;;  %v8188_v63 = vld [vmem:[#allocation19 + $0x2b4] sm:$0xf0]  ;;  %v8087_v1 = vld [vmem:[#allocation11 + $0x194] sm:$0xf] }
 0x24c   :  { %3789 = vmatpush.bf16.msra.mxu3 %v6968_v37  ;;  %v7360_v46 = vor.u32 %v8188_v63, %v7359_v22  ;;  %v8095_v37 = vld [vmem:[#allocation11 + $0x1d4] sm:$0xf]  ;;  %v6993_v28 = vld [vmem:[#allocation11 + $0x1d8] sm:$0xf0]  ;;  %v8089_v22 = vld [vmem:[#allocation11 + $0x1a4] sm:$0xf] }
 0x24d   :  { %v3225_v32 = vpop.f32.mrf.mxu3  ;;  %v3342_v47 = vmax.f32 %v3224_v29, 0.0  ;;  %v6996_v11 = vor.u32 %v8095_v37, %v6993_v28  ;;  %v7167_v29 = vld [vmem:[#allocation19 + $0x130] sm:$0xf]  ;;  %v6969_v63 = vld [vmem:[#allocation11 + $0x1a8] sm:$0xf0] }
 0x24e   :  { %4638 = vmatpush.bf16.msra.mxu0 %v7024_v0  ;;  %v3226_v33 = vadd.f32 %v3225_v32, %v3212_v23  ;;  %v8086_v0 = vld [vmem:[#allocation11 + $0x184] sm:$0xf0]  ;;  %v7280_v32 = vor.u32 %v8168_v7, %v7279_v59  ;;  %v8127_v37 = vld [vmem:[#allocation19 + $0xd4] sm:$0xf]  ;;  %v7121_v28 = vld [vmem:[#allocation19 + $0xd8] sm:$0xf0] }
 0x24f   :  { %4652 = vmatpush.bf16.msra.mxu1 %v7088_v20  ;;  %v6952_v58 = vor.u32 %v8086_v0, %v6951_v41  ;;  %v8099_v20 = vld [vmem:[#allocation11 + $0x1f4] sm:$0xf]  ;;  %v7073_v41 = vld [vmem:[#allocation19 + $0x78] sm:$0xf0]  ;;  %v8212_v59 = vld [vmem:[#allocation19 + $0x374] sm:$0xf0] }
 0x250   :  { %3790 = vmatpush.bf16.msra.mxu3 %v6960_v12  ;;  %v3346_v55 = vmax.f32 %v3226_v33, 0.0  ;;  %v7012_v48 = vor.u32 %v8099_v20, %v7009_v44  ;;  %v6985_v12 = vld [vmem:[#allocation11 + $0x1c8] sm:$0xf0]  ;;  %v7335_v33 = vld [vmem:[#allocation19 + $0x280] sm:$0xf] }
 0x251   :  { %v6988_v23 = vor.u32 %v8093_v15, %v6985_v12  ;;  %v8091_v0 = vld [vmem:[#allocation11 + $0x1b4] sm:$0xf]  ;;  %v7137_v20 = vld [vmem:[#allocation19 + $0xf8] sm:$0xf0]  ;;  %v8109_v7 = vld [vmem:[#allocation19 + $0x44] sm:$0xf]  ;;  %v7124_v15 = vor.u32 %v8127_v37, %v7121_v28 }
 0x252   :  { %4639 = vmatpush.bf16.msra.mxu0 %v7016_v54  ;;  %v9090_v17 = vpack.c.bf16 %v3346_v55, %v3342_v47  ;;  %v8097_v54 = vld [vmem:[#allocation11 + $0x1e4] sm:$0xf]  ;;  %v6980_v44 = vor.u32 %v8091_v0, %v6977_v21  ;;  %v9093_v47 = vpop.f32.mrf.mxu0  ;;  %v7049_v12 = vld [vmem:[#allocation19 + $0x48] sm:$0xf0]  ;;  %v8210_v21 = vld [vmem:[#allocation19 + $0x364] sm:$0xf0] }
 0x253   :  { %4653 = vmatpush.bf16.msra.mxu1 %v7080_v24  ;;  %v7001_v24 = vld [vmem:[#allocation11 + $0x1e8] sm:$0xf0]  ;;  %v7025_v37 = vld [vmem:[#allocation19 + $0x18] sm:$0xf0] }
 0x254   :  { %3791 = vmatpush.bf16.msra.mxu3 %v6952_v58  ;;  %3778 = vmatmul.bf16.vlgmr.msra.gmra.mxu2 %v9090_v17  ;;  %v8131_v58 = vld [vmem:[#allocation19 + $0xf4] sm:$0xf] }
 0x255   :  { %4640 = vmatmul.bf16.vlgmr.msra.gmra.mxu0 %v8886_v10  ;;  %4660 = vmatpush.bf16.msra.mxu2 %v7200_v49  ;;  %v7140_v36 = vor.u32 %v8131_v58, %v7137_v20  ;;  %v9096_v43 = vpop.f32.mrf.mxu1  ;;  %v8107_v58 = vld [vmem:[#allocation19 + $0x34] sm:$0xf]  ;;  %v7041_v20 = vld [vmem:[#allocation19 + $0x38] sm:$0xf0] }
 0x256   :  { %4688 = vmatpush.bf16.msrb.mxu0 %v7328_v40  ;;  %4654 = vmatmul.bf16.vlgmr.msra.gmra.mxu1 %v8888_v13  ;;  %v7004_v40 = vor.u32 %v8097_v54, %v7001_v24  ;;  %v8129_v54 = vld [vmem:[#allocation19 + $0xe4] sm:$0xf]  ;;  %v7129_v24 = vld [vmem:[#allocation19 + $0xe8] sm:$0xf0] }
 0x257   :  { %4702 = vmatpush.bf16.msrb.mxu1 %v7392_v31  ;;  %v8144_v31 = vld [vmem:[#allocation19 + $0x154] sm:$0xf0]  ;;  %v7132_v5 = vor.u32 %v8129_v54, %v7129_v24 }
 0x258   :  { %3840 = vmatpush.bf16.msrb.mxu3 %v7012_v48  ;;  %v7272_v48 = vor.u32 %v8166_v39, %v7271_v16  ;;  %v8125_v16 = vld [vmem:[#allocation19 + $0xc4] sm:$0xf]  ;;  %v7113_v39 = vld [vmem:[#allocation19 + $0xc8] sm:$0xf0] }
 0x259   :  { %4661 = vmatpush.bf16.msra.mxu2 %v7192_v42  ;;  %v7160_v42 = vor.u32 %v8138_v51, %v7159_v19  ;;  %v7116_v0 = vor.u32 %v8125_v16, %v7113_v39  ;;  %v7044_v19 = vor.u32 %v8107_v58, %v7041_v20  ;;  %v7439_v51 = vld [vmem:[#allocation19 + $0x350] sm:$0xf]  ;;  %v7415_v58 = vld [vmem:[#allocation19 + $0x320] sm:$0xf]  ;;  %v8202_v20 = vld [vmem:[#allocation19 + $0x324] sm:$0xf0] }
 0x25a   :  { %4689 = vmatpush.bf16.msrb.mxu0 %v7320_v3  ;;  %v7184_v3 = vor.u32 %v8144_v31, %v7183_v53  ;;  %v7151_v53 = vld [vmem:[#allocation19 + $0x110] sm:$0xf]  ;;  %v8136_v31 = vld [vmem:[#allocation19 + $0x114] sm:$0xf0]  ;;  %v3239_v38 = vpop.f32.mrf.mxu0 }
 0x25b   :  { %4703 = vmatpush.bf16.msrb.mxu1 %v7384_v6  ;;  %v8142_v6 = vld [vmem:[#allocation19 + $0x144] sm:$0xf0] }
 0x25c   :  { %3841 = vmatpush.bf16.msrb.mxu3 %v7004_v40  ;;  %v7176_v26 = vor.u32 %v8142_v6, %v7175_v18  ;;  %v6972_v40 = vor.u32 %v8089_v22, %v6969_v63  ;;  %v8134_v18 = vld [vmem:[#allocation19 + $0x104] sm:$0xf0]  ;;  %v8105_v22 = vld [vmem:[#allocation19 + $0x24] sm:$0xf]  ;;  %v7033_v63 = vld [vmem:[#allocation19 + $0x28] sm:$0xf0] }
 0x25d   :  { %4662 = vmatpush.bf16.msra.mxu2 %v7184_v3  ;;  %v7152_v3 = vor.u32 %v8136_v31, %v7151_v53 }
 0x25e   :  { %4690 = vmatpush.bf16.msrb.mxu0 %v7312_v8  ;;  %v8140_v8 = vld [vmem:[#allocation19 + $0x134] sm:$0xf0] }
 0x25f   :  { %4704 = vmatpush.bf16.msrb.mxu1 %v7376_v50  ;;  %v8182_v50 = vld [vmem:[#allocation19 + $0x284] sm:$0xf0]  ;;  %v7168_v55 = vor.u32 %v8140_v8, %v7167_v29  ;;  %v8085_v29 = vld [vmem:[#allocation11 + $0x184] sm:$0xf] }
 0x260   :  { %3842 = vmatpush.bf16.msrb.mxu3 %v6996_v11  ;;  %v7336_v49 = vor.u32 %v8182_v50, %v7335_v33  ;;  %v3265_v60 = vpop.f32.mrf.mxu2 }
 0x261   :  { %4663 = vmatpush.bf16.msra.mxu2 %v7176_v26  ;;  %v8286_v26 = vld [vmem:[#allocation10] sm:$0xf] }
 0x262   :  { %4691 = vmatpush.bf16.msrb.mxu0 %v7304_v52  ;;  %v7076_v52 = vor.u32 %v8115_v34, %v7073_v41  ;;  %v7052_v34 = vor.u32 %v8109_v7, %v7049_v12  ;;  %v7447_v41 = vld [vmem:[#allocation19 + $0x360] sm:$0xf]  ;;  %v8204_v7 = vld [vmem:[#allocation19 + $0x334] sm:$0xf0]  ;;  %v8117_v12 = vld [vmem:[#allocation19 + $0x84] sm:$0xf] }
 0x263   :  { %4705 = vmatpush.bf16.msrb.mxu1 %v7368_v25  ;;  %v8113_v25 = vld [vmem:[#allocation19 + $0x64] sm:$0xf]  ;;  %v3279_v8 = vpop.f32.mrf.mxu3 }
 0x264   :  { %3843 = vmatpush.bf16.msrb.mxu3 %v6988_v23  ;;  %3834 = vmatmul.bf16.vlgmr.msrb.gmra.mxu2 %v9090_v17  ;;  %v6961_v17 = vld [vmem:[#allocation11 + $0x198] sm:$0xf0]  ;;  %v6953_v23 = vld [vmem:[#allocation11 + $0x188] sm:$0xf0] }
 0x265   :  { %4664 = vmatpush.bf16.msra.mxu2 %v7168_v55  ;;  %v6964_v11 = vor.u32 %v8087_v1, %v6961_v17  ;;  %v8123_v55 = vld [vmem:[#allocation19 + $0xb4] sm:$0xf] }
 0x266   :  { %4692 = vmatpush.bf16.msrb.mxu0 %v7296_v57  ;;  %v7068_v57 = vor.u32 %v8113_v25, %v7065_v2  ;;  %v8208_v2 = vld [vmem:[#allocation19 + $0x354] sm:$0xf0]  ;;  %v8103_v17 = vld [vmem:[#allocation19 + $0x14] sm:$0xf] }
 0x267   :  { %4706 = vmatpush.bf16.msrb.mxu1 %v7360_v46  ;;  %v8111_v46 = vld [vmem:[#allocation19 + $0x54] sm:$0xf]  ;;  %v7440_v31 = vor.u32 %v8208_v2, %v7439_v51  ;;  %v7385_v51 = vld [vmem:[#allocation19 + $0x2e8] sm:$0xf0] }
 0x268   :  { %3844 = vmatpush.bf16.msrb.mxu3 %v6980_v44  ;;  %v7060_v6 = vor.u32 %v8111_v46, %v7057_v62  ;;  %v7036_v46 = vor.u32 %v8105_v22, %v7033_v63  ;;  %v8206_v62 = vld [vmem:[#allocation19 + $0x344] sm:$0xf0]  ;;  %v7407_v63 = vld [vmem:[#allocation19 + $0x310] sm:$0xf] }
 0x269   :  { %4665 = vmatpush.bf16.msra.mxu2 %v7160_v42  ;;  %v3267_v42 = vpop.f32.mrf.mxu2 }
 0x26a   :  { %4693 = vmatpush.bf16.msrb.mxu0 %v7288_v14  ;;  %v7143_v14 = vld [vmem:[#allocation19 + $0x100] sm:$0xf] }
 0x26b   :  { %4707 = vmatpush.bf16.msrb.mxu1 %v7352_v35  ;;  %v7455_v35 = vld [vmem:[#allocation19 + $0x370] sm:$0xf]  ;;  %v7144_v33 = vor.u32 %v8134_v18, %v7143_v14  ;;  %v3281_v53 = vpop.f32.mrf.mxu3 }
 0x26c   :  { %3845 = vmatpush.bf16.msrb.mxu3 %v6972_v40  ;;  %v7456_v50 = vor.u32 %v8212_v59, %v7455_v35  ;;  %v7097_v40 = vld [vmem:[#allocation19 + $0xa8] sm:$0xf0]  ;;  %v7028_v35 = vor.u32 %v8103_v17, %v7025_v37  ;;  %v7423_v59 = vld [vmem:[#allocation19 + $0x330] sm:$0xf] }
 0x26d   :  { %4666 = vmatpush.bf16.msra.mxu2 %v7152_v3 }
 0x26e   :  { %4694 = vmatpush.bf16.msrb.mxu0 %v7280_v32  ;;  %v1607_v32 = vperm.slane %v8286_v26, 3  ;;  %v8179_v26 = vld [vmem:[#allocation19 + $0x274] sm:$0xf] }
 0x26f   :  { %4708 = vmatpush.bf16.msrb.mxu1 %v7344_v30  ;;  %v6956_v30 = vor.u32 %v8085_v29, %v6953_v23  ;;  %v7081_v23 = vld [vmem:[#allocation19 + $0x88] sm:$0xf0] }
 0x270   :  { %3846 = vmatpush.bf16.msrb.mxu3 %v6964_v11  ;;  %v3238_v44 = vadd.f32 %v9093_v47, %v1607_v32  ;;  %v3240_v24 = vadd.f32 %v3239_v38, %v1607_v32  ;;  %v8121_v47 = vld [vmem:[#allocation19 + $0xa4] sm:$0xf]  ;;  %v7089_v11 = vld [vmem:[#allocation19 + $0x98] sm:$0xf0] }
 0x271   :  { %4667 = vmatpush.bf16.msra.mxu2 %v7144_v33  ;;  %v7100_v1 = vor.u32 %v8121_v47, %v7097_v40  ;;  %v7329_v32 = vld [vmem:[#allocation19 + $0x278] sm:$0xf0]  ;;  %v8175_v40 = vld [vmem:[#allocation19 + $0x254] sm:$0xf] }
 0x272   :  { %4695 = vmatpush.bf16.msrb.mxu0 %v7272_v48  ;;  %v7105_v48 = vld [vmem:[#allocation19 + $0xb8] sm:$0xf0]  ;;  %v3293_v25 = vpop.f32.mrf.mxu0  ;;  %v3252_v54 = vadd.f32 %v9096_v43, %v3238_v44  ;;  %v8119_v43 = vld [vmem:[#allocation19 + $0x94] sm:$0xf] }
 0x273   :  { %4709 = vmatpush.bf16.msrb.mxu1 %v7336_v49  ;;  %v3253_v49 = vpop.f32.mrf.mxu1  ;;  %v7092_v38 = vor.u32 %v8119_v43, %v7089_v11  ;;  %v7393_v33 = vld [vmem:[#allocation19 + $0x2f8] sm:$0xf0]  ;;  %v7263_v43 = vld [vmem:[#allocation19 + $0x1f0] sm:$0xf]  ;;  %v8164_v11 = vld [vmem:[#allocation19 + $0x1f4] sm:$0xf0] }
 0x274   :  { %3847 = vmatpush.bf16.msrb.mxu3 %v6956_v30  ;;  %4668 = vmatmul.bf16.vlgmr.msra.gmra.mxu2 %v8898_v56  ;;  %v3254_v28 = vadd.f32 %v3253_v49, %v3240_v24  ;;  %v8195_v30 = vld [vmem:[#allocation19 + $0x2f4] sm:$0xf]  ;;  %v8177_v49 = vld [vmem:[#allocation19 + $0x264] sm:$0xf] }
 0x275   :  { %4696 = vmatmul.bf16.vlgmr.msrb.gmra.mxu0 %v8972_v9  ;;  %4716 = vmatpush.bf16.msrb.mxu2 %v7456_v50 }
 0x276   :  { %4744 = vmatpush.bf16.msra.mxu0 %v7076_v52  ;;  %4710 = vmatmul.bf16.vlgmr.msrb.gmra.mxu1 %v8978_v45  ;;  %v7448_v52 = vor.u32 %v8210_v21, %v7447_v41  ;;  %v7332_v21 = vor.u32 %v8179_v26, %v7329_v32 }
 0x277   :  { %4758 = vmatpush.bf16.msra.mxu1 %v7140_v36  ;;  %v7108_v36 = vor.u32 %v8123_v55, %v7105_v48  ;;  %v7396_v48 = vor.u32 %v8195_v30, %v7393_v33  ;;  %v7193_v30 = vld [vmem:[#allocation19 + $0x168] sm:$0xf0]  ;;  %v8171_v33 = vld [vmem:[#allocation19 + $0x234] sm:$0xf] }
 0x279   :  { %4717 = vmatpush.bf16.msrb.mxu2 %v7448_v52  ;;  %v7321_v52 = vld [vmem:[#allocation19 + $0x268] sm:$0xf0] }
 0x27a   :  { %4745 = vmatpush.bf16.msra.mxu0 %v7068_v57  ;;  %v3266_v57 = vadd.f32 %v3265_v60, %v3252_v54  ;;  %v8101_v60 = vld [vmem:[#allocation19 + $0x4] sm:$0xf]  ;;  %v3295_v16 = vpop.f32.mrf.mxu0  ;;  %v7324_v22 = vor.u32 %v8177_v49, %v7321_v52  ;;  %v8200_v54 = vld [vmem:[#allocation19 + $0x314] sm:$0xf0]  ;;  %v7289_v52 = vld [vmem:[#allocation19 + $0x228] sm:$0xf0] }
 0x27b   :  { %4759 = vmatpush.bf16.msra.mxu1 %v7132_v5  ;;  %v7431_v5 = vld [vmem:[#allocation19 + $0x340] sm:$0xf]  ;;  %v3307_v3 = vpop.f32.mrf.mxu1  ;;  %v8169_v49 = vld [vmem:[#allocation19 + $0x224] sm:$0xf] }
 0x27c   :  { %v7432_v14 = vor.u32 %v8206_v62, %v7431_v5  ;;  %v3280_v18 = vadd.f32 %v3279_v8, %v3266_v57  ;;  %v7408_v62 = vor.u32 %v8200_v54, %v7407_v63  ;;  %v7292_v63 = vor.u32 %v8169_v49, %v7289_v52 }
 0x27d   :  { %4718 = vmatpush.bf16.msrb.mxu2 %v7440_v31  ;;  %v7377_v31 = vld [vmem:[#allocation19 + $0x2d8] sm:$0xf0] }
 0x27e   :  { %4746 = vmatpush.bf16.msra.mxu0 %v7060_v6  ;;  %v3268_v6 = vadd.f32 %v3267_v42, %v3254_v28  ;;  %v3294_v29 = vadd.f32 %v3293_v25, %v3280_v18  ;;  %v7313_v42 = vld [vmem:[#allocation19 + $0x258] sm:$0xf0]  ;;  %v8198_v28 = vld [vmem:[#allocation19 + $0x304] sm:$0xf0]  ;;  %v8147_v18 = vld [vmem:[#allocation19 + $0x174] sm:$0xf] }
 0x27f   :  { %4760 = vmatpush.bf16.msra.mxu1 %v7124_v15  ;;  %v7017_v15 = vld [vmem:[#allocation19 + $0x8] sm:$0xf0]  ;;  %v7316_v37 = vor.u32 %v8175_v40, %v7313_v42  ;;  %v8167_v40 = vld [vmem:[#allocation19 + $0x214] sm:$0xf]  ;;  %v7281_v42 = vld [vmem:[#allocation19 + $0x218] sm:$0xf0] }
 0x280   :  { %v3321_v39 = vpop.f32.mrf.mxu2  ;;  %v3282_v8 = vadd.f32 %v3281_v53, %v3268_v6  ;;  %v7020_v41 = vor.u32 %v8101_v60, %v7017_v15  ;;  %v3308_v44 = vadd.f32 %v3307_v3, %v3294_v29  ;;  %v8191_v53 = vld [vmem:[#allocation19 + $0x2d4] sm:$0xf]  ;;  %v8173_v6 = vld [vmem:[#allocation19 + $0x244] sm:$0xf]  ;;  %v7264_v15 = vor.u32 %v8164_v11, %v7263_v43  ;;  %v7255_v29 = vld [vmem:[#allocation19 + $0x1e0] sm:$0xf] }
 0x281   :  { %v3335_v50 = vpop.f32.mrf.mxu3  ;;  %4719 = vmatpush.bf16.msrb.mxu2 %v7432_v14  ;;  %v7380_v14 = vor.u32 %v8191_v53, %v7377_v31  ;;  %v7345_v53 = vld [vmem:[#allocation19 + $0x298] sm:$0xf0]  ;;  %v8165_v43 = vld [vmem:[#allocation19 + $0x204] sm:$0xf] }
 0x282   :  { %4747 = vmatpush.bf16.msra.mxu0 %v7052_v34  ;;  %v7424_v34 = vor.u32 %v8204_v7, %v7423_v59  ;;  %v3296_v55 = vadd.f32 %v3295_v16, %v3282_v8  ;;  %v3322_v25 = vadd.f32 %v3321_v39, %v3308_v44  ;;  %v8189_v59 = vld [vmem:[#allocation19 + $0x2c4] sm:$0xf]  ;;  %v7369_v7 = vld [vmem:[#allocation19 + $0x2c8] sm:$0xf0]  ;;  %v7297_v8 = vld [vmem:[#allocation19 + $0x238] sm:$0xf0] }
 0x283   :  { %4761 = vmatpush.bf16.msra.mxu1 %v7116_v0  ;;  %v7084_v0 = vor.u32 %v8117_v12, %v7081_v23  ;;  %v3309_v2 = vpop.f32.mrf.mxu1  ;;  %v8162_v23 = vld [vmem:[#allocation19 + $0x1e4] sm:$0xf0]  ;;  %v7372_v16 = vor.u32 %v8189_v59, %v7369_v7  ;;  %v8145_v39 = vld [vmem:[#allocation19 + $0x164] sm:$0xf]  ;;  %v7223_v59 = vld [vmem:[#allocation19 + $0x1a0] sm:$0xf] }
 0x284   :  { %v3310_v24 = vadd.f32 %v3309_v2, %v3296_v55  ;;  %v8143_v55 = vld [vmem:[#allocation19 + $0x154] sm:$0xf]  ;;  %v7239_v2 = vld [vmem:[#allocation19 + $0x1c0] sm:$0xf] }
 0x285   :  { %4720 = vmatpush.bf16.msrb.mxu2 %v7424_v34  ;;  %v7361_v34 = vld [vmem:[#allocation19 + $0x2b8] sm:$0xf0] }
 0x286   :  { %4748 = vmatpush.bf16.msra.mxu0 %v7044_v19  ;;  %v8193_v19 = vld [vmem:[#allocation19 + $0x2e4] sm:$0xf] }
 0x287   :  { %4762 = vmatpush.bf16.msra.mxu1 %v7108_v36  ;;  %v7416_v36 = vor.u32 %v8202_v20, %v7415_v58  ;;  %v7388_v47 = vor.u32 %v8193_v19, %v7385_v51  ;;  %v8160_v58 = vld [vmem:[#allocation19 + $0x1d4] sm:$0xf0]  ;;  %v7300_v20 = vor.u32 %v8171_v33, %v7297_v8  ;;  %v8185_v19 = vld [vmem:[#allocation19 + $0x2a4] sm:$0xf]  ;;  %v7353_v51 = vld [vmem:[#allocation19 + $0x2a8] sm:$0xf0] }
 0x288   :  { %v3323_v57 = vpop.f32.mrf.mxu2  ;;  %v7356_v54 = vor.u32 %v8185_v19, %v7353_v51 }
 0x289   :  { %v3324_v5 = vadd.f32 %v3323_v57, %v3310_v24  ;;  %4721 = vmatpush.bf16.msrb.mxu2 %v7416_v36  ;;  %v3337_v17 = vpop.f32.mrf.mxu3  ;;  %v8141_v24 = vld [vmem:[#allocation19 + $0x144] sm:$0xf]  ;;  %v8183_v57 = vld [vmem:[#allocation19 + $0x294] sm:$0xf] }
 0x28a   :  { %4749 = vmatpush.bf16.msra.mxu0 %v7036_v46  ;;  %v3336_v46 = vadd.f32 %v3335_v50, %v3322_v25  ;;  %v8187_v50 = vld [vmem:[#allocation19 + $0x2b4] sm:$0xf] }
 0x28b   :  { %4763 = vmatpush.bf16.msra.mxu1 %v7100_v1  ;;  %v7399_v1 = vld [vmem:[#allocation19 + $0x300] sm:$0xf]  ;;  %v3338_v3 = vadd.f32 %v3337_v17, %v3324_v5  ;;  %v7364_v44 = vor.u32 %v8187_v50, %v7361_v34  ;;  %v7231_v5 = vld [vmem:[#allocation19 + $0x1b0] sm:$0xf]  ;;  %v7348_v17 = vor.u32 %v8183_v57, %v7345_v53  ;;  %v8150_v34 = vld [vmem:[#allocation19 + $0x184] sm:$0xf0] }
 0x28c   :  { %v7207_v50 = vld [vmem:[#allocation19 + $0x180] sm:$0xf]  ;;  %v7441_v57 = vld [vmem:[#allocation19 + $0x358] sm:$0xf0] }
 0x28d   :  { %v3347_v60 = vmax.f32 %v3338_v3, 0.0  ;;  %4722 = vmatpush.bf16.msrb.mxu2 %v7408_v62  ;;  %v8156_v62 = vld [vmem:[#allocation19 + $0x1b4] sm:$0xf0]  ;;  %v7273_v3 = vld [vmem:[#allocation19 + $0x208] sm:$0xf0] }
 0x28e   :  { %4750 = vmatpush.bf16.msra.mxu0 %v7028_v35  ;;  %v7305_v35 = vld [vmem:[#allocation19 + $0x248] sm:$0xf0]  ;;  %v7276_v7 = vor.u32 %v8165_v43, %v7273_v3 }
 0x28f   :  { %4764 = vmatpush.bf16.msra.mxu1 %v7092_v38  ;;  %v3343_v38 = vmax.f32 %v3336_v46, 0.0  ;;  %v7308_v32 = vor.u32 %v8173_v6, %v7305_v35  ;;  %v7232_v6 = vor.u32 %v8156_v62, %v7231_v5  ;;  %v7495_v5 = vld [vmem:[#allocation19 + $0x3c0] sm:$0xf]  ;;  %v8222_v62 = vld [vmem:[#allocation19 + $0x3c4] sm:$0xf0] }
 0x290   :  { %v7496_v43 = vor.u32 %v8222_v62, %v7495_v5  ;;  %v8149_v5 = vld [vmem:[#allocation19 + $0x184] sm:$0xf]  ;;  %v7209_v62 = vld [vmem:[#allocation19 + $0x188] sm:$0xf0] }
 0x291   :  { %v9105_v26 = vpack.c.bf16 %v3347_v60, %v3343_v38  ;;  %v8154_v60 = vld [vmem:[#allocation19 + $0x1a4] sm:$0xf0] }
 0x292   :  { %4751 = vmatpush.bf16.msra.mxu0 %v7020_v41  ;;  %v7256_v41 = vor.u32 %v8162_v23, %v7255_v29  ;;  %v9109_v11 = vpop.f32.mrf.mxu0  ;;  %v7215_v23 = vld [vmem:[#allocation19 + $0x190] sm:$0xf] }
 0x293   :  { %4765 = vmatpush.bf16.msra.mxu1 %v7084_v0  ;;  %3792 = vmatmul.bf16.vlgmr.msra.gmra.mxu3 %v9105_v26  ;;  %v7196_v0 = vor.u32 %v8145_v39, %v7193_v30  ;;  %v7153_v39 = vld [vmem:[#allocation19 + $0x118] sm:$0xf0] }
 0x294   :  { %4674 = vmatpush.bf16.msra.mxu3 %v7264_v15  ;;  %v7161_v15 = vld [vmem:[#allocation19 + $0x128] sm:$0xf0] }
 0x295   :  { %4752 = vmatmul.bf16.vlgmr.msra.gmra.mxu0 %v8886_v10  ;;  %v7201_v10 = vld [vmem:[#allocation19 + $0x178] sm:$0xf0] }
 0x296   :  { %4800 = vmatpush.bf16.msrb.mxu0 %v7332_v21  ;;  %4766 = vmatmul.bf16.vlgmr.msra.gmra.mxu1 %v8888_v13  ;;  %v7400_v13 = vor.u32 %v8198_v28, %v7399_v1  ;;  %v7204_v12 = vor.u32 %v8147_v18, %v7201_v10  ;;  %v7247_v21 = vld [vmem:[#allocation19 + $0x1d0] sm:$0xf]  ;;  %v7284_v1 = vor.u32 %v8167_v40, %v7281_v42  ;;  %v7169_v28 = vld [vmem:[#allocation19 + $0x138] sm:$0xf0]  ;;  %v7337_v18 = vld [vmem:[#allocation19 + $0x288] sm:$0xf0]  ;;  %v9111_v10 = vpop.f32.mrf.mxu1 }
 0x297   :  { %4814 = vmatpush.bf16.msrb.mxu1 %v7396_v48  ;;  %v7185_v48 = vld [vmem:[#allocation19 + $0x158] sm:$0xf0]  ;;  %v7248_v25 = vor.u32 %v8160_v58, %v7247_v21  ;;  %v7519_v21 = vld [vmem:[#allocation19 + $0x3f0] sm:$0xf]  ;;  %v8228_v58 = vld [vmem:[#allocation19 + $0x3f4] sm:$0xf0] }
 0x298   :  { %4723 = vmatpush.bf16.msrb.mxu2 %v7400_v13  ;;  %4675 = vmatpush.bf16.msra.mxu3 %v7256_v41  ;;  %v7188_v36 = vor.u32 %v8143_v55, %v7185_v48  ;;  %v8137_v13 = vld [vmem:[#allocation19 + $0x124] sm:$0xf]  ;;  %v9120_v55 = vld [vmem:[#allocation13] sm:$0x3]  ;;  %v7208_v48 = vor.u32 %v8150_v34, %v7207_v50  ;;  %v7520_v19 = vor.u32 %v8228_v58, %v7519_v21  ;;  %v8224_v40 = vld [vmem:[#allocation19 + $0x3d4] sm:$0xf0] }
 0x299   :  { %v7164_v29 = vor.u32 %v8137_v13, %v7161_v15  ;;  %v3419_v52 = vperm.slane %v9120_v55, 1  ;;  %v8207_v42 = vld [vmem:[#allocation19 + $0x354] sm:$0xf]  ;;  %v8218_v13 = vld [vmem:[#allocation19 + $0x3a4] sm:$0xf0] }
 0x29a   :  { %4801 = vmatpush.bf16.msrb.mxu0 %v7324_v22  ;;  %v8158_v22 = vld [vmem:[#allocation19 + $0x1c4] sm:$0xf0]  ;;  %v9114_v30 = vpop.f32.mrf.mxu0  ;;  %v8201_v15 = vld [vmem:[#allocation19 + $0x324] sm:$0xf]  ;;  %v7463_v34 = vld [vmem:[#allocation19 + $0x380] sm:$0xf] }
 0x29b   :  { %4815 = vmatpush.bf16.msrb.mxu1 %v7388_v47  ;;  %4724 = vmatmul.bf16.vlgmr.msrb.gmra.mxu2 %v8990_v27  ;;  %v7177_v47 = vld [vmem:[#allocation19 + $0x148] sm:$0xf0]  ;;  %v7240_v31 = vor.u32 %v8158_v22, %v7239_v2  ;;  %v8163_v58 = vld [vmem:[#allocation19 + $0x1f4] sm:$0xf] }
 0x29c   :  { %4772 = vmatpush.bf16.msra.mxu2 %v7204_v12  ;;  %4676 = vmatpush.bf16.msra.mxu3 %v7248_v25  ;;  %v7180_v46 = vor.u32 %v8141_v24, %v7177_v47  ;;  %v7224_v12 = vor.u32 %v8154_v60, %v7223_v59  ;;  %v7511_v25 = vld [vmem:[#allocation19 + $0x3e0] sm:$0xf]  ;;  %v7503_v47 = vld [vmem:[#allocation19 + $0x3d0] sm:$0xf]  ;;  %v7401_v21 = vld [vmem:[#allocation19 + $0x308] sm:$0xf0] }
 0x29d   :  { %v7479_v60 = vld [vmem:[#allocation19 + $0x3a0] sm:$0xf] }
 0x29e   :  { %4802 = vmatpush.bf16.msrb.mxu0 %v7316_v37  ;;  %v8139_v37 = vld [vmem:[#allocation19 + $0x134] sm:$0xf]  ;;  %v9116_v41 = vpop.f32.mrf.mxu1 }
 0x29f   :  { %4816 = vmatpush.bf16.msrb.mxu1 %v7380_v14  ;;  %v8181_v14 = vld [vmem:[#allocation19 + $0x284] sm:$0xf]  ;;  %v7172_v35 = vor.u32 %v8139_v37, %v7169_v28 }
 0x2a0   :  { %4773 = vmatpush.bf16.msra.mxu2 %v7196_v0  ;;  %4677 = vmatpush.bf16.msra.mxu3 %v7240_v31  ;;  %v7340_v38 = vor.u32 %v8181_v14, %v7337_v18  ;;  %v7145_v0 = vld [vmem:[#allocation19 + $0x108] sm:$0xf0]  ;;  %v7504_v31 = vor.u32 %v8224_v40, %v7503_v47  ;;  %v7487_v14 = vld [vmem:[#allocation19 + $0x3b0] sm:$0xf]  ;;  %v8153_v47 = vld [vmem:[#allocation19 + $0x1a4] sm:$0xf] }
 0x2a1   :  { %v7225_v40 = vld [vmem:[#allocation19 + $0x1a8] sm:$0xf0] }
 0x2a2   :  { %4803 = vmatpush.bf16.msrb.mxu0 %v7308_v32  ;;  %v8152_v32 = vld [vmem:[#allocation19 + $0x194] sm:$0xf0] }
 0x2a3   :  { %4817 = vmatpush.bf16.msrb.mxu1 %v7372_v16  ;;  %3848 = vmatmul.bf16.vlgmr.msrb.gmra.mxu3 %v9105_v26  ;;  %v8135_v16 = vld [vmem:[#allocation19 + $0x114] sm:$0xf]  ;;  %v7216_v33 = vor.u32 %v8152_v32, %v7215_v23  ;;  %v8133_v26 = vld [vmem:[#allocation19 + $0x104] sm:$0xf]  ;;  %v7471_v32 = vld [vmem:[#allocation19 + $0x390] sm:$0xf] }
 0x2a4   :  { %4774 = vmatpush.bf16.msra.mxu2 %v7188_v36  ;;  %4678 = vmatpush.bf16.msra.mxu3 %v7232_v6  ;;  %v7156_v8 = vor.u32 %v8135_v16, %v7153_v39  ;;  %v7148_v49 = vor.u32 %v8133_v26, %v7145_v0  ;;  %v8209_v36 = vld [vmem:[#allocation19 + $0x364] sm:$0xf]  ;;  %v8220_v6 = vld [vmem:[#allocation19 + $0x3b4] sm:$0xf0]  ;;  %v8199_v39 = vld [vmem:[#allocation19 + $0x314] sm:$0xf] }
 0x2a5   :  { %v8216_v16 = vld [vmem:[#allocation19 + $0x394] sm:$0xf0]  ;;  %v8214_v26 = vld [vmem:[#allocation19 + $0x384] sm:$0xf0]  ;;  %v8197_v0 = vld [vmem:[#allocation19 + $0x304] sm:$0xf] }
 0x2a6   :  { %4804 = vmatpush.bf16.msrb.mxu0 %v7300_v20  ;;  %v8211_v20 = vld [vmem:[#allocation19 + $0x374] sm:$0xf] }
 0x2a7   :  { %4818 = vmatpush.bf16.msrb.mxu1 %v7364_v44  ;;  %v7457_v44 = vld [vmem:[#allocation19 + $0x378] sm:$0xf0] }
 0x2a8   :  { %4775 = vmatpush.bf16.msra.mxu2 %v7180_v46  ;;  %4679 = vmatpush.bf16.msra.mxu3 %v7224_v12  ;;  %v7460_v51 = vor.u32 %v8211_v20, %v7457_v44  ;;  %v7444_v46 = vor.u32 %v8207_v42, %v7441_v57  ;;  %v7417_v12 = vld [vmem:[#allocation19 + $0x328] sm:$0xf0]  ;;  %v7265_v20 = vld [vmem:[#allocation19 + $0x1f8] sm:$0xf0]  ;;  %v7464_v44 = vor.u32 %v8214_v26, %v7463_v34  ;;  %v8213_v34 = vld [vmem:[#allocation19 + $0x384] sm:$0xf] }
 0x2a9   :  { %v7420_v23 = vor.u32 %v8201_v15, %v7417_v12  ;;  %v7228_v57 = vor.u32 %v8153_v47, %v7225_v40  ;;  %v7465_v26 = vld [vmem:[#allocation19 + $0x388] sm:$0xf0] }
 0x2aa   :  { %4805 = vmatpush.bf16.msrb.mxu0 %v7292_v63 }
 0x2ab   :  { %4819 = vmatpush.bf16.msrb.mxu1 %v7356_v54 }
 0x2ac   :  { %4776 = vmatpush.bf16.msra.mxu2 %v7172_v35  ;;  %4680 = vmatpush.bf16.msra.mxu3 %v7216_v33  ;;  %v7425_v35 = vld [vmem:[#allocation19 + $0x338] sm:$0xf0] }
 0x2ad   :  { %v7409_v33 = vld [vmem:[#allocation19 + $0x318] sm:$0xf0] }
 0x2ae   :  { %4806 = vmatpush.bf16.msrb.mxu0 %v7284_v1  ;;  %v8205_v1 = vld [vmem:[#allocation19 + $0x344] sm:$0xf]  ;;  %v7412_v50 = vor.u32 %v8199_v39, %v7409_v33  ;;  %v7481_v33 = vld [vmem:[#allocation19 + $0x3a8] sm:$0xf0] }
 0x2af   :  { %4820 = vmatpush.bf16.msrb.mxu1 %v7348_v17  ;;  %v7433_v17 = vld [vmem:[#allocation19 + $0x348] sm:$0xf0]  ;;  %v8217_v39 = vld [vmem:[#allocation19 + $0x3a4] sm:$0xf] }
 0x2b0   :  { %4777 = vmatpush.bf16.msra.mxu2 %v7164_v29  ;;  %4681 = vmatpush.bf16.msra.mxu3 %v7208_v48  ;;  %v7436_v3 = vor.u32 %v8205_v1, %v7433_v17  ;;  %v7480_v29 = vor.u32 %v8218_v13, %v7479_v60  ;;  %v7404_v48 = vor.u32 %v8197_v0, %v7401_v21  ;;  %v8227_v17 = vld [vmem:[#allocation19 + $0x3f4] sm:$0xf]  ;;  %v8221_v60 = vld [vmem:[#allocation19 + $0x3c4] sm:$0xf]  ;;  %v7497_v13 = vld [vmem:[#allocation19 + $0x3c8] sm:$0xf0] }
 0x2b1   :  { %v7500_v15 = vor.u32 %v8221_v60, %v7497_v13  ;;  %v7468_v0 = vor.u32 %v8213_v34, %v7465_v26 }
 0x2b2   :  { %4807 = vmatpush.bf16.msrb.mxu0 %v7276_v7  ;;  %v3807_v2 = vpop.f32.mrf.mxu0  ;;  %v7488_v7 = vor.u32 %v8220_v6, %v7487_v14  ;;  %v7513_v14 = vld [vmem:[#allocation19 + $0x3e8] sm:$0xf0] }
 0x2b3   :  { %4821 = vmatpush.bf16.msrb.mxu1 %v7340_v38  ;;  %v3808_v22 = vadd.f32 %v3807_v2, %v3419_v52  ;;  %v3821_v63 = vpop.f32.mrf.mxu1  ;;  %4682 = vmatmul.bf16.vlgmr.msra.gmra.mxu3 %v8900_v61  ;;  %v7241_v2 = vld [vmem:[#allocation19 + $0x1c8] sm:$0xf0] }
 0x2b4   :  { %4778 = vmatpush.bf16.msra.mxu2 %v7156_v8  ;;  %4730 = vmatpush.bf16.msrb.mxu3 %v7520_v19  ;;  %v7472_v8 = vor.u32 %v8216_v16, %v7471_v32  ;;  %v7257_v19 = vld [vmem:[#allocation19 + $0x1e8] sm:$0xf0] }
 0x2b5   :  { %4808 = vmatmul.bf16.vlgmr.msrb.gmra.mxu0 %v8972_v9  ;;  %v8226_v9 = vld [vmem:[#allocation19 + $0x3e4] sm:$0xf0]  ;;  %v9123_v53 = vadd.f32 %v3821_v63, %v3808_v22  ;;  %v8155_v63 = vld [vmem:[#allocation19 + $0x1b4] sm:$0xf] }
 0x2b6   :  { %4822 = vmatmul.bf16.vlgmr.msrb.gmra.mxu1 %v8978_v45  ;;  %v7449_v45 = vld [vmem:[#allocation19 + $0x368] sm:$0xf0]  ;;  %v7512_v54 = vor.u32 %v8226_v9, %v7511_v25  ;;  %v8159_v25 = vld [vmem:[#allocation19 + $0x1d4] sm:$0xf]  ;;  %v7249_v9 = vld [vmem:[#allocation19 + $0x1d8] sm:$0xf0] }
 0x2b7   :  { %v7452_v24 = vor.u32 %v8209_v36, %v7449_v45  ;;  %v7252_v36 = vor.u32 %v8159_v25, %v7249_v9  ;;  %v8157_v45 = vld [vmem:[#allocation19 + $0x1c4] sm:$0xf]  ;;  %v8232_v25 = vld [vmem:[#allocation14 + $0x18] sm:$0xff] }
 0x2b8   :  { %4779 = vmatpush.bf16.msra.mxu2 %v7148_v49  ;;  %4731 = vmatpush.bf16.msrb.mxu3 %v7512_v54  ;;  %v7268_v49 = vor.u32 %v8163_v58, %v7265_v20  ;;  %v7244_v22 = vor.u32 %v8157_v45, %v7241_v2  ;;  %v7233_v54 = vld [vmem:[#allocation19 + $0x1b8] sm:$0xf0]  ;;  %v8235_v20 = vld [vmem:[#allocation14 + $0x30] sm:$0xff]  ;;  %v9146_v45 = vld [vmem:[%s9183_s12] sm:$0x3] }
 0x2b9   :  { %v8230_v2 = vld [vmem:[#allocation14 + $0x8] sm:$0xff] }
 0x2ba   :  { %v3809_v37 = vpop.f32.mrf.mxu0 }
 0x2bb   :  { %4780 = vmatmul.bf16.vlgmr.msra.gmra.mxu2 %v8898_v56  ;;  %v3810_v28 = vadd.f32 %v3809_v37, %v3419_v52  ;;  %v3823_v18 = vpop.f32.mrf.mxu1  ;;  %v8203_v56 = vld [vmem:[#allocation19 + $0x334] sm:$0xf]  ;;  %v8161_v52 = vld [vmem:[#allocation19 + $0x1e4] sm:$0xf]  ;;  %v7521_v37 = vld [vmem:[#allocation19 + $0x3f8] sm:$0xf0] }
 0x2bc   :  { %4828 = vmatpush.bf16.msrb.mxu2 %v7460_v51  ;;  %4732 = vmatpush.bf16.msrb.mxu3 %v7504_v31  ;;  %v7428_v38 = vor.u32 %v8203_v56, %v7425_v35  ;;  %v7260_v51 = vor.u32 %v8161_v52, %v7257_v19  ;;  %v8151_v31 = vld [vmem:[#allocation19 + $0x194] sm:$0xf]  ;;  %v7505_v35 = vld [vmem:[#allocation19 + $0x3d8] sm:$0xf0] }
 0x2bd   :  { %v9127_v59 = vadd.f32 %v3823_v18, %v3810_v28  ;;  %v7212_v28 = vor.u32 %v8149_v5, %v7209_v62  ;;  %v8223_v56 = vld [vmem:[#allocation19 + $0x3d4] sm:$0xf]  ;;  %v8233_v52 = vld [vmem:[#allocation14 + $0x20] sm:$0xff] }
 0x2c0   :  { %4829 = vmatpush.bf16.msrb.mxu2 %v7452_v24  ;;  %4733 = vmatpush.bf16.msrb.mxu3 %v7496_v43  ;;  %v7236_v24 = vor.u32 %v8155_v63, %v7233_v54  ;;  %v7524_v43 = vor.u32 %v8227_v17, %v7521_v37  ;;  %v3988_v63 = vperm.slane %v9146_v45, 0 }
 0x2c4   :  { %4830 = vmatpush.bf16.msrb.mxu2 %v7444_v46  ;;  %4734 = vmatpush.bf16.msrb.mxu3 %v7488_v7  ;;  %v7217_v46 = vld [vmem:[#allocation19 + $0x198] sm:$0xf0] }
 0x2c8   :  { %4831 = vmatpush.bf16.msrb.mxu2 %v7436_v3  ;;  %4735 = vmatpush.bf16.msrb.mxu3 %v7480_v29  ;;  %v8225_v3 = vld [vmem:[#allocation19 + $0x3e4] sm:$0xf]  ;;  %v8219_v29 = vld [vmem:[#allocation19 + $0x3b4] sm:$0xf] }
 0x2c9   :  { %v7516_v18 = vor.u32 %v8225_v3, %v7513_v14 }
 0x2cc   :  { %4832 = vmatpush.bf16.msrb.mxu2 %v7428_v38  ;;  %4736 = vmatpush.bf16.msrb.mxu3 %v7472_v8  ;;  %v7508_v38 = vor.u32 %v8223_v56, %v7505_v35  ;;  %v7484_v8 = vor.u32 %v8217_v39, %v7481_v33  ;;  %v3418_v56 = vperm.slane %v9120_v55, 0 }
 0x2ce   :  { %v3752_v13 = vadd.f32 %v9109_v11, %v3418_v56  ;;  %v8244_v11 = vld [vmem:[#allocation14 + $0x78] sm:$0xff] }
 0x2cf   :  { %5012 = vmatpush.bf16.msra.mxu1 %v8244_v11  ;;  %v8260_v11 = vld [vmem:[#allocation22 + $0x38] sm:$0xff] }
 0x2d0   :  { %4833 = vmatpush.bf16.msrb.mxu2 %v7420_v23  ;;  %4737 = vmatpush.bf16.msrb.mxu3 %v7464_v44  ;;  %v7489_v23 = vld [vmem:[#allocation19 + $0x3b8] sm:$0xf0] }
 0x2d1   :  { %v7492_v16 = vor.u32 %v8219_v29, %v7489_v23  ;;  %v3766_v29 = vadd.f32 %v9111_v10, %v3752_v13 }
 0x2d2   :  { %v4641_v9 = vpop.f32.mrf.mxu0 }
 0x2d3   :  { %4738 = vmatmul.bf16.vlgmr.msrb.gmra.mxu3 %v8992_v4  ;;  %v4642_v40 = vadd.f32 %v4641_v9, %v3988_v63 }
 0x2d4   :  { %4834 = vmatpush.bf16.msrb.mxu2 %v7412_v50  ;;  %4786 = vmatpush.bf16.msra.mxu3 %v7268_v49  ;;  %v7473_v50 = vld [vmem:[#allocation19 + $0x398] sm:$0xf0]  ;;  %v8234_v49 = vld [vmem:[#allocation14 + $0x28] sm:$0xff] }
 0x2d7   :  { %v9131_v42 = vpop.f32.mrf.mxu2 }
 0x2d8   :  { %4835 = vmatpush.bf16.msrb.mxu2 %v7404_v48  ;;  %4787 = vmatpush.bf16.msra.mxu3 %v7260_v51  ;;  %v3780_v39 = vadd.f32 %v9131_v42, %v3766_v29  ;;  %v8242_v42 = vld [vmem:[#allocation14 + $0x68] sm:$0xff] }
 0x2da   :  { %v4643_v54 = vpop.f32.mrf.mxu0 }
 0x2db   :  { %4836 = vmatmul.bf16.vlgmr.msrb.gmra.mxu2 %v8990_v27  ;;  %v7220_v27 = vor.u32 %v8151_v31, %v7217_v46  ;;  %v4644_v46 = vadd.f32 %v4643_v54, %v3988_v63 }
 0x2dc   :  { %4788 = vmatpush.bf16.msra.mxu3 %v7252_v36  ;;  %v4655_v36 = vpop.f32.mrf.mxu1 }
 0x2dd   :  { %v4656_v31 = vadd.f32 %v4655_v36, %v4642_v40 }
 0x2df   :  { %v9133_v1 = vpop.f32.mrf.mxu2 }
 0x2e0   :  { %4789 = vmatpush.bf16.msra.mxu3 %v7244_v22 }
 0x2e4   :  { %4790 = vmatpush.bf16.msra.mxu3 %v7236_v24  ;;  %v8229_v24 = vld [vmem:[#allocation14] sm:$0xff] }
 0x2e7   :  { %v3835_v6 = vpop.f32.mrf.mxu2 }
 0x2e8   :  { %4791 = vmatpush.bf16.msra.mxu3 %v7228_v57  ;;  %v3836_v7 = vadd.f32 %v3835_v6, %v9123_v53  ;;  %v8215_v53 = vld [vmem:[#allocation19 + $0x394] sm:$0xf]  ;;  %v4657_v57 = vpop.f32.mrf.mxu1 }
 0x2e9   :  { %v4658_v17 = vadd.f32 %v4657_v57, %v4644_v46 }
 0x2ec   :  { %4792 = vmatpush.bf16.msra.mxu3 %v7220_v27 }
 0x2ef   :  { %v3837_v12 = vpop.f32.mrf.mxu2 }
 0x2f0   :  { %4793 = vmatpush.bf16.msra.mxu3 %v7212_v28  ;;  %v3838_v32 = vadd.f32 %v3837_v12, %v9127_v59  ;;  %v8236_v59 = vld [vmem:[#allocation14 + $0x38] sm:$0xff] }
 0x2f1   :  { %4998 = vmatpush.bf16.msra.mxu0 %v8236_v59 }
 0x2f2   :  { %v4697_v27 = vpop.f32.mrf.mxu0 }
 0x2f3   :  { %4794 = vmatmul.bf16.vlgmr.msra.gmra.mxu3 %v8900_v61  ;;  %v7476_v61 = vor.u32 %v8215_v53, %v7473_v50  ;;  %v4711_v28 = vpop.f32.mrf.mxu1 }
 0x2f4   :  { %4842 = vmatpush.bf16.msrb.mxu3 %v7524_v43 }
 0x2f5   :  { %4999 = vmatpush.bf16.msra.mxu0 %v8235_v20 }
 0x2f7   :  { %v4669_v22 = vpop.f32.mrf.mxu2 }
 0x2f8   :  { %4843 = vmatpush.bf16.msrb.mxu3 %v7516_v18  ;;  %v4670_v62 = vadd.f32 %v4669_v22, %v4656_v31 }
 0x2f9   :  { %5000 = vmatpush.bf16.msra.mxu0 %v8234_v49 }
 0x2fa   :  { %v4699_v35 = vpop.f32.mrf.mxu0 }
 0x2fb   :  { %v4713_v12 = vpop.f32.mrf.mxu1 }
 0x2fc   :  { %4844 = vmatpush.bf16.msrb.mxu3 %v7508_v38 }
 0x2fd   :  { %5001 = vmatpush.bf16.msra.mxu0 %v8233_v52  ;;  %v8239_v52 = vld [vmem:[#allocation14 + $0x50] sm:$0xff] }
 0x2ff   :  { %v4671_v5 = vpop.f32.mrf.mxu2 }
 0x300   :  { %4845 = vmatpush.bf16.msrb.mxu3 %v7500_v15  ;;  %v4672_v3 = vadd.f32 %v4671_v5, %v4658_v17  ;;  %v3754_v15 = vadd.f32 %v9114_v30, %v3418_v56 }
 0x301   :  { %5002 = vmatpush.bf16.msra.mxu0 %v8232_v25  ;;  %v8238_v25 = vld [vmem:[#allocation14 + $0x48] sm:$0xff] }
 0x302   :  { %v3768_v23 = vadd.f32 %v9116_v41, %v3754_v15 }
 0x304   :  { %4846 = vmatpush.bf16.msrb.mxu3 %v7492_v16  ;;  %v3782_v33 = vadd.f32 %v9133_v1, %v3768_v23  ;;  %v8241_v1 = vld [vmem:[#allocation14 + $0x60] sm:$0xff] }
 0x308   :  { %4847 = vmatpush.bf16.msrb.mxu3 %v7484_v8 }
 0x30c   :  { %4848 = vmatpush.bf16.msrb.mxu3 %v7476_v61 }
 0x310   :  { %4849 = vmatpush.bf16.msrb.mxu3 %v7468_v0  ;;  %v8243_v0 = vld [vmem:[#allocation14 + $0x70] sm:$0xff] }
 0x311   :  { %5013 = vmatpush.bf16.msra.mxu1 %v8243_v0  ;;  %v8257_v0 = vld [vmem:[#allocation22 + $0x20] sm:$0xff] }
 0x313   :  { %4850 = vmatmul.bf16.vlgmr.msrb.gmra.mxu3 %v8992_v4  ;;  %v8231_v4 = vld [vmem:[#allocation14 + $0x10] sm:$0xff] }
 0x314   :  { %5003 = vmatpush.bf16.msra.mxu0 %v8231_v4  ;;  %v3989_v4 = vperm.slane %v9146_v45, 1  ;;  %5180 = vmatpush.bf16.msra.mxu3 %v8260_v11 }
 0x315   :  { %5014 = vmatpush.bf16.msra.mxu1 %v8242_v42 }
 0x316   :  { %v3793_v21 = vpop.f32.mrf.mxu3 }
 0x317   :  { %v3794_v53 = vadd.f32 %v3793_v21, %v3780_v39  ;;  %v8240_v21 = vld [vmem:[#allocation14 + $0x58] sm:$0xff] }
 0x318   :  { %5004 = vmatpush.bf16.msra.mxu0 %v8230_v2  ;;  %v8237_v2 = vld [vmem:[#allocation14 + $0x40] sm:$0xff] }
 0x319   :  { %v3854_v10 = vmax.f32 %v3794_v53, 0.0  ;;  %5015 = vmatpush.bf16.msra.mxu1 %v8241_v1  ;;  %v8250_v53 = vld [vmem:[#allocation20 + $0x28] sm:$0xff] }
 0x31c   :  { %5005 = vmatpush.bf16.msra.mxu0 %v8229_v24 }
 0x31d   :  { %5016 = vmatpush.bf16.msra.mxu1 %v8240_v21 }
 0x31e   :  { %v3795_v58 = vpop.f32.mrf.mxu3  ;;  %v4725_v6 = vpop.f32.mrf.mxu2 }
 0x31f   :  { %v3796_v50 = vadd.f32 %v3795_v58, %v3782_v33  ;;  %v4753_v58 = vpop.f32.mrf.mxu0 }
 0x320   :  { %v4754_v63 = vadd.f32 %v4753_v58, %v3989_v4 }
 0x321   :  { %v3856_v59 = vmax.f32 %v3796_v50, 0.0  ;;  %5017 = vmatpush.bf16.msra.mxu1 %v8239_v52  ;;  %v8249_v50 = vld [vmem:[#allocation20 + $0x20] sm:$0xff] }
 0x325   :  { %5018 = vmatpush.bf16.msra.mxu1 %v8238_v25 }
 0x326   :  { %v3849_v44 = vpop.f32.mrf.mxu3  ;;  %v4727_v8 = vpop.f32.mrf.mxu2 }
 0x327   :  { %v9139_v48 = vadd.f32 %v3849_v44, %v3836_v7  ;;  %v4755_v36 = vpop.f32.mrf.mxu0 }
 0x329   :  { %5019 = vmatpush.bf16.msra.mxu1 %v8237_v2  ;;  %v3855_v29 = vmax.f32 %v9139_v48, 0.0  ;;  %v8246_v48 = vld [vmem:[#allocation20 + $0x8] sm:$0xff] }
 0x32e   :  { %v3851_v19 = vpop.f32.mrf.mxu3 }
 0x32f   :  { %v9141_v51 = vadd.f32 %v3851_v19, %v3838_v32  ;;  %v4767_v19 = vpop.f32.mrf.mxu1 }
 0x330   :  { %v4768_v24 = vadd.f32 %v4767_v19, %v4754_v63 }
 0x331   :  { %v3857_v23 = vmax.f32 %v9141_v51, 0.0  ;;  %v8245_v51 = vld [vmem:[#allocation20] sm:$0xff] }
 0x332   :  { %v4809_v40 = vpop.f32.mrf.mxu0 }
 0x336   :  { %v4683_v47 = vpop.f32.mrf.mxu3 }
 0x337   :  { %v4684_v37 = vadd.f32 %v4683_v47, %v4670_v62  ;;  %v4769_v54 = vpop.f32.mrf.mxu1  ;;  %v4756_v47 = vadd.f32 %v4755_v36, %v3989_v4  ;;  %v8254_v4 = vld [vmem:[#allocation22 + $0x8] sm:$0xff]  ;;  %v8253_v36 = vld [vmem:[#allocation22] sm:$0xff] }
 0x339   :  { %v4698_v14 = vadd.f32 %v4697_v27, %v4684_v37  ;;  %v4770_v46 = vadd.f32 %v4769_v54, %v4756_v47 }
 0x33b   :  { %v4712_v38 = vadd.f32 %v4711_v28, %v4698_v14 }
 0x33d   :  { %v4726_v32 = vadd.f32 %v4725_v6, %v4712_v38 }
 0x33e   :  { %v4685_v43 = vpop.f32.mrf.mxu3  ;;  %v4781_v9 = vpop.f32.mrf.mxu2 }
 0x33f   :  { %v4686_v18 = vadd.f32 %v4685_v43, %v4672_v3  ;;  %v4782_v31 = vadd.f32 %v4781_v9, %v4768_v24  ;;  %v4823_v5 = vpop.f32.mrf.mxu1  ;;  %v4811_v43 = vpop.f32.mrf.mxu0  ;;  %v8255_v9 = vld [vmem:[#allocation22 + $0x10] sm:$0xff] }
 0x341   :  { %v4700_v7 = vadd.f32 %v4699_v35, %v4686_v18 }
 0x343   :  { %v4714_v16 = vadd.f32 %v4713_v12, %v4700_v7 }
 0x345   :  { %v4728_v61 = vadd.f32 %v4727_v8, %v4714_v16  ;;  %v8251_v8 = vld [vmem:[#allocation20 + $0x30] sm:$0xff] }
 0x346   :  { %v4783_v57 = vpop.f32.mrf.mxu2 }
 0x347   :  { %v4784_v17 = vadd.f32 %v4783_v57, %v4770_v46  ;;  %v4825_v6 = vpop.f32.mrf.mxu1 }
 0x356   :  { %v4739_v60 = vpop.f32.mrf.mxu3 }
 0x357   :  { %v4740_v55 = vadd.f32 %v4739_v60, %v4726_v32 }
 0x359   :  { %v4856_v26 = vmax.f32 %v4740_v55, 0.0  ;;  %v8252_v55 = vld [vmem:[#allocation20 + $0x38] sm:$0xff] }
 0x35a   :  { %5097 = vmatpush.bf16.msra.mxu2 %v8252_v55 }
 0x35b   :  { %v4860_v20 = vadd.f32 %v4856_v26, %v3854_v10  ;;  %v8259_v26 = vld [vmem:[#allocation22 + $0x30] sm:$0xff] }
 0x35c   :  { %5181 = vmatpush.bf16.msra.mxu3 %v8259_v26 }
 0x35e   :  { %v4741_v34 = vpop.f32.mrf.mxu3  ;;  %v4837_v45 = vpop.f32.mrf.mxu2  ;;  %5098 = vmatpush.bf16.msra.mxu2 %v8251_v8 }
 0x35f   :  { %v4742_v30 = vadd.f32 %v4741_v34, %v4728_v61  ;;  %v8248_v61 = vld [vmem:[#allocation20 + $0x18] sm:$0xff]  ;;  %v8247_v34 = vld [vmem:[#allocation20 + $0x10] sm:$0xff] }
 0x361   :  { %v4858_v41 = vmax.f32 %v4742_v30, 0.0  ;;  %v8258_v30 = vld [vmem:[#allocation22 + $0x28] sm:$0xff] }
 0x362   :  { %5099 = vmatpush.bf16.msra.mxu2 %v8250_v53  ;;  %5182 = vmatpush.bf16.msra.mxu3 %v8258_v30 }
 0x363   :  { %v4862_v44 = vadd.f32 %v4858_v41, %v3856_v59  ;;  %v8256_v59 = vld [vmem:[#allocation22 + $0x18] sm:$0xff] }
 0x365   :  { %v4864_v49 = vpack.c.bf16 %v4862_v44, %v4860_v20  ;;  %v8283_v20 = vld [vmem:[#allocation16] ss:$0 sm:$0xff] }
 0x366   :  { %v4839_v38 = vpop.f32.mrf.mxu2  ;;  %5100 = vmatpush.bf16.msra.mxu2 %v8249_v50  ;;  %5183 = vmatpush.bf16.msra.mxu3 %v8257_v0 }
 0x367   :  { %5006 = vmatmul.bf16.vlgmr.msra.gmra.mxu0 %v4864_v49 }
 0x36a   :  { %5101 = vmatpush.bf16.msra.mxu2 %v8248_v61  ;;  %5184 = vmatpush.bf16.msra.mxu3 %v8256_v59 }
 0x36e   :  { %5102 = vmatpush.bf16.msra.mxu2 %v8247_v34  ;;  %5185 = vmatpush.bf16.msra.mxu3 %v8255_v9 }
 0x372   :  { %5103 = vmatpush.bf16.msra.mxu2 %v8246_v48  ;;  %5186 = vmatpush.bf16.msra.mxu3 %v8254_v4 }
 0x376   :  { %v4795_v22 = vpop.f32.mrf.mxu3  ;;  %5104 = vmatpush.bf16.msra.mxu2 %v8245_v51  ;;  %5187 = vmatpush.bf16.msra.mxu3 %v8253_v36 }
 0x377   :  { %v4796_v27 = vadd.f32 %v4795_v22, %v4782_v31  ;;  %v8284_v22 = vld [vmem:[%s9185_s14] ss:$0 sm:$0xff] }
 0x379   :  { %v4810_v37 = vadd.f32 %v4809_v40, %v4796_v27  ;;  %v8285_v40 = vld [vmem:[%s9187_s16] ss:$0 sm:$0xff] }
 0x37b   :  { %v4824_v14 = vadd.f32 %v4823_v5, %v4810_v37 }
 0x37d   :  { %v4838_v56 = vadd.f32 %v4837_v45, %v4824_v14 }
 0x37e   :  { %v4797_v62 = vpop.f32.mrf.mxu3 }
 0x37f   :  { %v4798_v28 = vadd.f32 %v4797_v62, %v4784_v17 }
 0x381   :  { %v4812_v3 = vadd.f32 %v4811_v43, %v4798_v28 }
 0x383   :  { %v4826_v35 = vadd.f32 %v4825_v6, %v4812_v3 }
 0x385   :  { %v4840_v60 = vadd.f32 %v4839_v38, %v4826_v35 }
 0x396   :  { %v4851_v18 = vpop.f32.mrf.mxu3 }
 0x397   :  { %v4852_v7 = vadd.f32 %v4851_v18, %v4838_v56 }
 0x399   :  { %v4857_v15 = vmax.f32 %v4852_v7, 0.0 }
 0x39b   :  { %v4861_v16 = vadd.f32 %v4857_v15, %v3855_v29 }
 0x39e   :  { %v4853_v13 = vpop.f32.mrf.mxu3 }
 0x39f   :  { %v4854_v12 = vadd.f32 %v4853_v13, %v4840_v60 }
 0x3a1   :  { %v4859_v32 = vmax.f32 %v4854_v12, 0.0 }
 0x3a3   :  { %v4863_v39 = vadd.f32 %v4859_v32, %v3857_v23 }
 0x3a5   :  { %v4865_v33 = vpack.c.bf16 %v4863_v39, %v4861_v16 }
 0x3a7   :  { %5020 = vmatmul.bf16.vlgmr.msra.gmra.mxu1 %v4865_v33 }
 0x3e4   :  { %v5007_v10 = vpop.f32.mrf.mxu0 }
 0x3e5   :  { %v5008_v42 = vadd.f32 %v8283_v20, %v5007_v10 }
 0x3ec   :  { %v5009_v44 = vpop.f32.mrf.mxu0 }
 0x3ed   :  { %v5010_v49 = vadd.f32 %v8283_v20, %v5009_v44 }
 0x424   :  { %v5021_v41 = vpop.f32.mrf.mxu1 }
 0x425   :  { %v5022_v1 = vadd.f32 %v5021_v41, %v5008_v42 }
 0x427   :  { %v5026_v52 = vmax.f32 %v5022_v1, 0.0 }
 0x42c   :  { %v5023_v21 = vpop.f32.mrf.mxu1 }
 0x42d   :  { %v5024_v58 = vadd.f32 %v5023_v21, %v5010_v49 }
 0x42f   :  { %v5027_v19 = vmax.f32 %v5024_v58, 0.0 }
 0x431   :  { %v5028_v25 = vpack.c.bf16 %v5027_v19, %v5026_v52 }
 0x433   :  { %5105 = vmatmul.bf16.vlgmr.msra.gmra.mxu2 %v5028_v25 }
 0x4b6   :  { %v5106_v2 = vpop.f32.mrf.mxu2 }
 0x4b7   :  { %v5107_v54 = vadd.f32 %v8284_v22, %v5106_v2 }
 0x4be   :  { %v5108_v63 = vpop.f32.mrf.mxu2 }
 0x4bf   :  { %v5109_v24 = vadd.f32 %v8284_v22, %v5108_v63 }
 0x4c1   :  { %v5111_v47 = vpack.c.bf16 %v5109_v24, %v5107_v54 }
 0x4c3   :  { %5188 = vmatmul.bf16.vlgmr.msra.gmra.mxu3 %v5111_v47 }
 0x546   :  { %v5189_v57 = vpop.f32.mrf.mxu3 }
 0x547   :  { %v5190_v31 = vadd.f32 %v8285_v40, %v5189_v57 }
 0x549   :  { %5194 = vst [vmem:[#allocation23] sm:$0xff] %v5190_v31 }
 0x54e   :  { %v5191_v46 = vpop.f32.mrf.mxu3 }
 0x54f   :  { %v5192_v27 = vadd.f32 %v8285_v40, %v5191_v46 }
 0x551   :  { %5195 = vst [vmem:[#allocation23 + $0x8] sm:$0xff] %v5192_v27 }
 0x552   :  { %5208 = dma.vmem_to_hbm [thread:$0]  %s5201_s17, 256, %s5203_s9, [#allocation4], %s8646_s27, %s8646_s27, %s8647_s29  }
 0x553   :  { %8637 = dma.done.wait [#allocation4], 256  }
 0x554   :  { %8638 = vsyncadd [#allocation4], 4294967040 }
 0x555   :  { %5213 = vsyncpa [#allocation3], 1 }
 0x556   :  { %5214 = vsyncpa [#allocation6], 1 }
 0x557   :  { %5215 = vsyncpa [#allocation9], 1 }
 0x558   :  { %5216 = vsyncpa [#allocation12], 1 }
 0x559   :  { %5217 = vsyncpa [#allocation15], 1 }
 0x55a   :  { %5218 = vsyncpa [#allocation18], 1 }
 0x55b   :  { %5219 = vsyncpa [#allocation21], 1 }
 0x55c   :  { %5220 = vsyncpa [#allocation4], 1 }

</bundles_post_ra>
